<compile_context>
chip_gen: v5e
topology: v5e:2x2
jax: 0.10.0
libtpu: 0.0.40
codegen_flags: <defaults>
</compile_context>

<pallas_src>
import functools

import jax
import jax.numpy as jnp
from jax.experimental import pallas as pl
from jax.experimental.pallas import tpu as pltpu


def _round_up(v, m):
    return ((v + m - 1) // m) * m


def _pick_tiling(B):
    """Pick (tb, Bp): single tile for small batches, else an even number of <=512-row tiles."""
    B8 = _round_up(max(B, 8), 8)
    if B8 <= 512:
        return B8, B8                       # one tile; batch too small to split usefully
    n = -(-B8 // 512)                       # ceil(B8 / 512) tiles of at most 512 rows
    n += n % 2                              # even tile count -> balanced across v7x's 2 TCs
    tb = _round_up(-(-B8 // n), 8)
    return tb, tb * n


def dann_kernel(x_ref, w1_ref, b1_ref, w2_ref, b2_ref, w3_ref, b3_ref,
                y_ref, x3_ref, y2_ref):
    # layer_input + ReLU  (bf16 matmul inputs, f32 accumulate / elementwise)
    h1 = jnp.dot(x_ref[...], w1_ref[...],
                 preferred_element_type=jnp.float32) + b1_ref[...]
    h1 = jnp.maximum(h1, 0.0)

    # layer_hidden (x3 is the PRE-ReLU activation returned by the module)
    x3 = jnp.dot(h1.astype(jnp.bfloat16), w2_ref[...],
                 preferred_element_type=jnp.float32) + b2_ref[...]
    h2 = jnp.maximum(x3, 0.0)

    # layer_hidden2
    y1 = jnp.dot(h2.astype(jnp.bfloat16), w3_ref[...],
                 preferred_element_type=jnp.float32) + b3_ref[...]

    # Shared row-max for both heads: max(y1/10) == max(y1)/10, so one XLU max.
    # Softmax math stays in f32; only the stores are cast down.
    m = jnp.max(y1, axis=-1, keepdims=True)
    s = y1 - m
    y = s - jnp.log(jnp.sum(jnp.exp(s), axis=-1, keepdims=True))
    s2 = s * 0.1
    y2 = s2 - jnp.log(jnp.sum(jnp.exp(s2), axis=-1, keepdims=True))

    y_ref[...] = y.astype(y_ref.dtype)
    y2_ref[...] = y2.astype(y2_ref.dtype)
    x3_ref[...] = x3.astype(x3_ref.dtype)


def prepare_params(params):
    """Pad + cast weights/biases ONCE (hoisted off the per-forward hot path).

    params = (w1, b1, w2, b2, w3, b3); w_i stored (in, out), b_i stored (1, out).
    Returns (prepared_tuple, meta_dict).
    """
    w1, b1, w2, b2, w3, b3 = params
    n_in, H1 = w1.shape
    H2, NC = w3.shape

    Kp = _round_up(max(n_in, 1), 8)       # sublane-align the tiny first contraction
    NCp = _round_up(NC, 128)              # lane-dense log-softmax outputs

    w1_p = jnp.zeros((Kp, H1), jnp.bfloat16).at[:n_in, :].set(w1.astype(jnp.bfloat16))
    w2_p = w2.astype(jnp.bfloat16)
    w3_p = jnp.zeros((H2, NCp), jnp.bfloat16).at[:, :NC].set(w3.astype(jnp.bfloat16))
    b1_p = b1.astype(jnp.float32).reshape(1, H1)
    b2_p = b2.astype(jnp.float32).reshape(1, H2)
    # Padded classes get a huge negative bias so they contribute ~0 to both softmaxes.
    b3_p = (jnp.full((1, NCp), -1e30, jnp.float32)
            .at[:, :NC].set(b3.astype(jnp.float32).reshape(1, NC)))

    meta = {"n_in": int(n_in), "n_class": int(NC)}
    return (w1_p, b1_p, w2_p, b2_p, w3_p, b3_p), meta


def dann_forward(x, prepared, *, n_in, n_class, tb=None, trim=True,
                 out_dtype=jnp.bfloat16):
    """Fused DaNN forward.  Returns (y, x3, y2) matching the PyTorch module.

    If trim=False, returns the batch/class padded outputs (no post-kernel slice
    copies) for fusion into downstream ops.
    """
    w1_p, b1_p, w2_p, b2_p, w3_p, b3_p = prepared
    B = x.shape[0]
    Kp, H1 = w1_p.shape
    H2, NCp = w3_p.shape
    assert x.shape[1] == n_in

    if tb is None:
        tb, Bp = _pick_tiling(B)
    else:
        Bp = _round_up(max(B, 1), tb)

    # Only x is padded/cast per call (weights were prepared once).
    x_p = jnp.zeros((Bp, Kp), jnp.bfloat16).at[:B, :n_in].set(x.astype(jnp.bfloat16))

    grid = (Bp // tb,)
    tiled = lambda i: (i, 0)
    const = lambda i: (0, 0)

    out_bytes = jnp.dtype(out_dtype).itemsize
    cost = pl.CostEstimate(
        flops=int(2 * Bp * (Kp * H1 + H1 * H2 + H2 * NCp)),
        transcendentals=int(2 * Bp * NCp + 2 * Bp),
        bytes_accessed=int(2 * (x_p.size + w1_p.size + w2_p.size + w3_p.size)
                           + 4 * (b1_p.size + b2_p.size + b3_p.size)
                           + out_bytes * (2 * Bp * NCp + Bp * H2)),
    )

    y_p, x3_p, y2_p = pl.pallas_call(
        dann_kernel,
        grid=grid,
        in_specs=[
            pl.BlockSpec((tb, Kp), tiled),     # x          (pipelined over batch)
            pl.BlockSpec((Kp, H1), const),     # w1         (VMEM-resident)
            pl.BlockSpec((1, H1), const),      # b1
            pl.BlockSpec((H1, H2), const),     # w2
            pl.BlockSpec((1, H2), const),      # b2
            pl.BlockSpec((H2, NCp), const),    # w3 (class-padded)
            pl.BlockSpec((1, NCp), const),     # b3 (class-padded with -1e30)
        ],
        out_specs=(
            pl.BlockSpec((tb, NCp), tiled),    # y  = log_softmax(y1)
            pl.BlockSpec((tb, H2), tiled),     # x3 (pre-ReLU hidden)
            pl.BlockSpec((tb, NCp), tiled),    # y2 = log_softmax(y1/10)
        ),
        out_shape=(
            jax.ShapeDtypeStruct((Bp, NCp), out_dtype),
            jax.ShapeDtypeStruct((Bp, H2), out_dtype),
            jax.ShapeDtypeStruct((Bp, NCp), out_dtype),
        ),
        compiler_params=pltpu.CompilerParams(
            dimension_semantics=("parallel",)),
        cost_estimate=cost,
    )(x_p, w1_p, b1_p, w2_p, b2_p, w3_p, b3_p)

    if not trim:
        return y_p, x3_p, y2_p
    # Slice off batch and class padding (module-exact output shapes).
    return y_p[:B, :n_class], x3_p[:B, :], y2_p[:B, :n_class]


def init_params(key, n_input, n_hidden1, n_hidden2, n_class):
    """Deterministic init mimicking nn.Linear's U(-1/sqrt(in), 1/sqrt(in))."""
    ks = jax.random.split(key, 6)

    def lin(kw, kb, n_in, n_out):
        bound = 1.0 / jnp.sqrt(jnp.float32(n_in))
        # stored as (in, out), i.e. transposed relative to torch's (out, in)
        w = jax.random.uniform(kw, (n_in, n_out), jnp.float32, -bound, bound)
        b = jax.random.uniform(kb, (1, n_out), jnp.float32, -bound, bound)
        return w, b

    w1, b1 = lin(ks[0], ks[1], n_input, n_hidden1)
    w2, b2 = lin(ks[2], ks[3], n_hidden1, n_hidden2)
    w3, b3 = lin(ks[4], ks[5], n_hidden2, n_class)
    return (w1, b1, w2, b2, w3, b3)


def dann_reference(x, params):
    """Pure-JAX reference using the same bf16-matmul / f32-softmax recipe."""
    w1, b1, w2, b2, w3, b3 = params
    bf = jnp.bfloat16
    h1 = jnp.maximum(jnp.dot(x.astype(bf), w1.astype(bf),
                             preferred_element_type=jnp.float32) + b1, 0.0)
    x3 = jnp.dot(h1.astype(bf), w2.astype(bf),
                 preferred_element_type=jnp.float32) + b2
    h2 = jnp.maximum(x3, 0.0)
    y1 = jnp.dot(h2.astype(bf), w3.astype(bf),
                 preferred_element_type=jnp.float32) + b3
    return (jax.nn.log_softmax(y1, axis=-1), x3,
            jax.nn.log_softmax(y1 / 10.0, axis=-1))


if __name__ == "__main__":
    # Module-default widths; batch chosen so the auto-tiler gives 2 parallel tiles.
    B, n_input, n_hidden1, n_hidden2, n_class = 1024, 3, 256, 256, 88

    key = jax.random.PRNGKey(0)
    k_x, k_p = jax.random.split(key)
    x = jax.random.normal(k_x, (B, n_input), jnp.float32)
    params = init_params(k_p, n_input, n_hidden1, n_hidden2, n_class)

    # Weight padding/casting happens exactly once, off the per-call path.
    prepared, meta = prepare_params(params)
    prepared = jax.block_until_ready(prepared)

    fwd = jax.jit(functools.partial(dann_forward, n_in=meta["n_in"],
                                    n_class=meta["n_class"]))
    y, x3, y2 = fwd(x, prepared)
    jax.block_until_ready((y, x3, y2))

    # Sanity check against the pure-JAX reference (bf16 matmuls + bf16 output stores
    # => relaxed tolerances; softmax math itself is f32 in both paths).
    y_ref, x3_ref, y2_ref = dann_reference(x, params)
    assert y.shape == (B, n_class) and y2.shape == (B, n_class) and x3.shape == (B, n_hidden2)
    assert jnp.allclose(y.astype(jnp.float32), y_ref, atol=5e-2, rtol=3e-2), "y mismatch"
    assert jnp.allclose(x3.astype(jnp.float32), x3_ref, atol=3e-2, rtol=3e-2), "x3 mismatch"
    assert jnp.allclose(y2.astype(jnp.float32), y2_ref, atol=5e-2, rtol=3e-2), "y2 mismatch"

    print("KERNEL_OK")
</pallas_src>

<mosaic_0001>
module attributes {stable_mosaic.version = 11 : i64} {
  func.func @dann_kernel(%arg0: i32, %arg1: memref<512x8xbf16, #tpu.memory_space<vmem>>, %arg2: memref<8x256xbf16, #tpu.memory_space<vmem>>, %arg3: memref<1x256xf32, #tpu.memory_space<vmem>>, %arg4: memref<256x256xbf16, #tpu.memory_space<vmem>>, %arg5: memref<1x256xf32, #tpu.memory_space<vmem>>, %arg6: memref<256x128xbf16, #tpu.memory_space<vmem>>, %arg7: memref<1x128xf32, #tpu.memory_space<vmem>>, %arg8: memref<512x128xbf16, #tpu.memory_space<vmem>>, %arg9: memref<512x256xbf16, #tpu.memory_space<vmem>>, %arg10: memref<512x128xbf16, #tpu.memory_space<vmem>>) attributes {dimension_semantics = [#tpu.dimension_semantics<parallel>], iteration_bounds = array<i64: 2>, scalar_prefetch = 0 : i64, scratch_operands = 0 : i64, tpu.core_type = #tpu.core_type<tc>, window_params = [{transform_indices = @transform_0, window_bounds = array<i64: 512, 8>}, {pipeline_mode = #tpu.pipeline_mode<synchronous>, transform_indices = @transform_1, window_bounds = array<i64: 8, 256>}, {pipeline_mode = #tpu.pipeline_mode<synchronous>, transform_indices = @transform_2, window_bounds = array<i64: 1, 256>}, {pipeline_mode = #tpu.pipeline_mode<synchronous>, transform_indices = @transform_3, window_bounds = array<i64: 256, 256>}, {pipeline_mode = #tpu.pipeline_mode<synchronous>, transform_indices = @transform_4, window_bounds = array<i64: 1, 256>}, {pipeline_mode = #tpu.pipeline_mode<synchronous>, transform_indices = @transform_5, window_bounds = array<i64: 256, 128>}, {pipeline_mode = #tpu.pipeline_mode<synchronous>, transform_indices = @transform_6, window_bounds = array<i64: 1, 128>}, {transform_indices = @transform_7, window_bounds = array<i64: 512, 128>}, {transform_indices = @transform_8, window_bounds = array<i64: 512, 256>}, {transform_indices = @transform_9, window_bounds = array<i64: 512, 128>}]} {
    %c0 = arith.constant 0 : index
    %c0_0 = arith.constant 0 : index
    %0 = vector.load %arg1[%c0, %c0_0] : memref<512x8xbf16, #tpu.memory_space<vmem>>, vector<512x8xbf16>
    %c0_1 = arith.constant 0 : index
    %c0_2 = arith.constant 0 : index
    %1 = vector.load %arg2[%c0_1, %c0_2] : memref<8x256xbf16, #tpu.memory_space<vmem>>, vector<8x256xbf16>
    %cst = arith.constant dense<0.000000e+00> : vector<512x256xf32>
    %2 = tpu.matmul %0, %1, %cst {dimension_numbers = #tpu.dot_dimension_numbers<[1], [0], [0], [1], [0, 0, 1, 1], [], []>} : vector<512x8xbf16>, vector<8x256xbf16>, vector<512x256xf32> -> vector<512x256xf32>
    %c0_3 = arith.constant 0 : index
    %c0_4 = arith.constant 0 : index
    %3 = vector.load %arg3[%c0_3, %c0_4] : memref<1x256xf32, #tpu.memory_space<vmem>>, vector<1x256xf32>
    %4 = vector.broadcast %3 : vector<1x256xf32> to vector<512x256xf32>
    %5 = arith.addf %2, %4 : vector<512x256xf32>
    %cst_5 = arith.constant 0.000000e+00 : f32
    %6 = vector.broadcast %cst_5 : f32 to vector<512x256xf32>
    %7 = arith.maximumf %5, %6 : vector<512x256xf32>
    %8 = arith.truncf %7 : vector<512x256xf32> to vector<512x256xbf16>
    %c0_6 = arith.constant 0 : index
    %c0_7 = arith.constant 0 : index
    %9 = vector.load %arg4[%c0_6, %c0_7] : memref<256x256xbf16, #tpu.memory_space<vmem>>, vector<256x256xbf16>
    %cst_8 = arith.constant dense<0.000000e+00> : vector<512x256xf32>
    %10 = tpu.matmul %8, %9, %cst_8 {dimension_numbers = #tpu.dot_dimension_numbers<[1], [0], [0], [1], [0, 0, 1, 1], [], []>} : vector<512x256xbf16>, vector<256x256xbf16>, vector<512x256xf32> -> vector<512x256xf32>
    %c0_9 = arith.constant 0 : index
    %c0_10 = arith.constant 0 : index
    %11 = vector.load %arg5[%c0_9, %c0_10] : memref<1x256xf32, #tpu.memory_space<vmem>>, vector<1x256xf32>
    %12 = vector.broadcast %11 : vector<1x256xf32> to vector<512x256xf32>
    %13 = arith.addf %10, %12 : vector<512x256xf32>
    %cst_11 = arith.constant 0.000000e+00 : f32
    %14 = vector.broadcast %cst_11 : f32 to vector<512x256xf32>
    %15 = arith.maximumf %13, %14 : vector<512x256xf32>
    %16 = arith.truncf %15 : vector<512x256xf32> to vector<512x256xbf16>
    %c0_12 = arith.constant 0 : index
    %c0_13 = arith.constant 0 : index
    %17 = vector.load %arg6[%c0_12, %c0_13] : memref<256x128xbf16, #tpu.memory_space<vmem>>, vector<256x128xbf16>
    %cst_14 = arith.constant dense<0.000000e+00> : vector<512x128xf32>
    %18 = tpu.matmul %16, %17, %cst_14 {dimension_numbers = #tpu.dot_dimension_numbers<[1], [0], [0], [1], [0, 0, 1, 1], [], []>} : vector<512x256xbf16>, vector<256x128xbf16>, vector<512x128xf32> -> vector<512x128xf32>
    %c0_15 = arith.constant 0 : index
    %c0_16 = arith.constant 0 : index
    %19 = vector.load %arg7[%c0_15, %c0_16] : memref<1x128xf32, #tpu.memory_space<vmem>>, vector<1x128xf32>
    %20 = vector.broadcast %19 : vector<1x128xf32> to vector<512x128xf32>
    %21 = arith.addf %18, %20 : vector<512x128xf32>
    %cst_17 = arith.constant dense<0xFF800000> : vector<512xf32>
    %22 = vector.multi_reduction <maximumf>, %21, %cst_17 [1] : vector<512x128xf32> to vector<512xf32>
    %23 = vector.shape_cast %22 : vector<512xf32> to vector<512x1xf32>
    %24 = vector.broadcast %23 : vector<512x1xf32> to vector<512x128xf32>
    %25 = arith.subf %21, %24 : vector<512x128xf32>
    %26 = math.exp %25 : vector<512x128xf32>
    %cst_18 = arith.constant dense<0.000000e+00> : vector<512xf32>
    %27 = vector.multi_reduction <add>, %26, %cst_18 [1] : vector<512x128xf32> to vector<512xf32>
    %28 = vector.shape_cast %27 : vector<512xf32> to vector<512x1xf32>
    %29 = math.log %28 : vector<512x1xf32>
    %30 = vector.broadcast %29 : vector<512x1xf32> to vector<512x128xf32>
    %31 = arith.subf %25, %30 : vector<512x128xf32>
    %cst_19 = arith.constant 1.000000e-01 : f32
    %32 = vector.broadcast %cst_19 : f32 to vector<512x128xf32>
    %33 = arith.mulf %25, %32 : vector<512x128xf32>
    %34 = math.exp %33 : vector<512x128xf32>
    %cst_20 = arith.constant dense<0.000000e+00> : vector<512xf32>
    %35 = vector.multi_reduction <add>, %34, %cst_20 [1] : vector<512x128xf32> to vector<512xf32>
    %36 = vector.shape_cast %35 : vector<512xf32> to vector<512x1xf32>
    %37 = math.log %36 : vector<512x1xf32>
    %38 = vector.broadcast %37 : vector<512x1xf32> to vector<512x128xf32>
    %39 = arith.subf %33, %38 : vector<512x128xf32>
    %40 = arith.truncf %31 : vector<512x128xf32> to vector<512x128xbf16>
    %c0_21 = arith.constant 0 : index
    %c0_22 = arith.constant 0 : index
    %41 = vector.load %arg8[%c0_21, %c0_22] : memref<512x128xbf16, #tpu.memory_space<vmem>>, vector<512x128xbf16>
    tpu.vector_store %arg8[%c0_21, %c0_22], %40 {strides = array<i32>} : memref<512x128xbf16, #tpu.memory_space<vmem>>, vector<512x128xbf16>,
    %42 = arith.truncf %39 : vector<512x128xf32> to vector<512x128xbf16>
    %c0_23 = arith.constant 0 : index
    %c0_24 = arith.constant 0 : index
    %43 = vector.load %arg10[%c0_23, %c0_24] : memref<512x128xbf16, #tpu.memory_space<vmem>>, vector<512x128xbf16>
    tpu.vector_store %arg10[%c0_23, %c0_24], %42 {strides = array<i32>} : memref<512x128xbf16, #tpu.memory_space<vmem>>, vector<512x128xbf16>,
    %44 = arith.truncf %13 : vector<512x256xf32> to vector<512x256xbf16>
    %c0_25 = arith.constant 0 : index
    %c0_26 = arith.constant 0 : index
    %45 = vector.load %arg9[%c0_25, %c0_26] : memref<512x256xbf16, #tpu.memory_space<vmem>>, vector<512x256xbf16>
    tpu.vector_store %arg9[%c0_25, %c0_26], %44 {strides = array<i32>} : memref<512x256xbf16, #tpu.memory_space<vmem>>, vector<512x256xbf16>,
    return
  }
  func.func @transform_0(%arg0: i32) -> (i32, i32) {
    %c0_i32 = arith.constant 0 : i32
    %c0_i32_0 = arith.constant 0 : i32
    return %arg0, %c0_i32 : i32, i32
  }
  func.func @transform_1(%arg0: i32) -> (i32, i32) {
    %c0_i32 = arith.constant 0 : i32
    %c0_i32_0 = arith.constant 0 : i32
    %c0_i32_1 = arith.constant 0 : i32
    return %c0_i32, %c0_i32_0 : i32, i32
  }
  func.func @transform_2(%arg0: i32) -> (i32, i32) {
    %c0_i32 = arith.constant 0 : i32
    %c0_i32_0 = arith.constant 0 : i32
    %c0_i32_1 = arith.constant 0 : i32
    return %c0_i32, %c0_i32_0 : i32, i32
  }
  func.func @transform_3(%arg0: i32) -> (i32, i32) {
    %c0_i32 = arith.constant 0 : i32
    %c0_i32_0 = arith.constant 0 : i32
    %c0_i32_1 = arith.constant 0 : i32
    return %c0_i32, %c0_i32_0 : i32, i32
  }
  func.func @transform_4(%arg0: i32) -> (i32, i32) {
    %c0_i32 = arith.constant 0 : i32
    %c0_i32_0 = arith.constant 0 : i32
    %c0_i32_1 = arith.constant 0 : i32
    return %c0_i32, %c0_i32_0 : i32, i32
  }
  func.func @transform_5(%arg0: i32) -> (i32, i32) {
    %c0_i32 = arith.constant 0 : i32
    %c0_i32_0 = arith.constant 0 : i32
    %c0_i32_1 = arith.constant 0 : i32
    return %c0_i32, %c0_i32_0 : i32, i32
  }
  func.func @transform_6(%arg0: i32) -> (i32, i32) {
    %c0_i32 = arith.constant 0 : i32
    %c0_i32_0 = arith.constant 0 : i32
    %c0_i32_1 = arith.constant 0 : i32
    return %c0_i32, %c0_i32_0 : i32, i32
  }
  func.func @transform_7(%arg0: i32) -> (i32, i32) {
    %c0_i32 = arith.constant 0 : i32
    %c0_i32_0 = arith.constant 0 : i32
    return %arg0, %c0_i32 : i32, i32
  }
  func.func @transform_8(%arg0: i32) -> (i32, i32) {
    %c0_i32 = arith.constant 0 : i32
    %c0_i32_0 = arith.constant 0 : i32
    return %arg0, %c0_i32 : i32, i32
  }
  func.func @transform_9(%arg0: i32) -> (i32, i32) {
    %c0_i32 = arith.constant 0 : i32
    %c0_i32_0 = arith.constant 0 : i32
    return %arg0, %c0_i32 : i32, i32
  }
}

</mosaic_0001>

<bundles_post_ra>
// kernel: dann_forward.1
= control target key start
LH: loop header
LB: loop body
LE: loop exit
PB: predicated region body
PF: predicated region fallthrough
CT: control target
= control target key end

     0   :  { %s8476_s0 = inlined_call_operand.vmem [shape: bf16[1024,8], index: 0, kind: input, shape index: {}]   ;;  %s8477_s1 = inlined_call_operand.vmem [shape: bf16[8,256], index: 1, kind: input, shape index: {}]   ;;  %s8478_s2 = inlined_call_operand.vmem [shape: f32[1,256], index: 2, kind: input, shape index: {}]   ;;  %s8479_s3 = inlined_call_operand.vmem [shape: bf16[256,256], index: 3, kind: input, shape index: {}]   ;;  %s8480_s4 = inlined_call_operand.vmem [shape: f32[1,256], index: 4, kind: input, shape index: {}]   ;;  %s8481_s5 = inlined_call_operand.vmem [shape: bf16[256,128], index: 5, kind: input, shape index: {}]   ;;  %s8482_s6 = inlined_call_operand.vmem [shape: f32[1,128], index: 6, kind: input, shape index: {}]   ;;  %s8483_s7 = inlined_call_operand.vmem [shape: bf16[1024,128], index: 7, kind: output, shape index: {0}]   ;;  %s8484_s8 = inlined_call_operand.hbm [shape: bf16[1024,256], index: 8, kind: output, shape index: {1}]   ;;  %s8485_s9 = inlined_call_operand.vmem [shape: bf16[1024,128], index: 9, kind: output, shape index: {2}]  }
   0x1   :  { %8576 = sst [smem:[#allocation77_spill]] %s8476_s0 }
   0x2   :  { %15 = vsyncpa [#allocation3], 0 }
   0x3   :  { %17 = vsyncpa [#allocation3 + $0x1], 0  ;;  %s5990_s30 = smov 0   ;;  %s5992_s10 = smov 0  }
   0x4   :  { %s5994_s11 = smov 0   ;;  %s5996_s12 = smov 0  }
   0x5 LB: > { %s6011_s13 = sadd.s32 4294967295, %s5936_s12   ;;  %s4451_s14 = sadd.s32 4294967294, %s5936_s12   ;;  %s5936_s12 = sphi %s5996_s12, %s8807_s12   ;;  %s5932_s11 = sphi %s5994_s11, %s8806_s11   ;;  %s5928_s10 = sphi %s5992_s10, %s8805_s10   ;;  %s5924_s30 = sphi %s5990_s30, %s8804_s30  }
   0x6   : > { %s6015_s15 = sadd.s32 1, %s5936_s12   ;;  %s208_s16 = sadd.s32 1, %s5932_s11 }
   0x7   : > { %s205_s17 = ssub.s32 %s5936_s12, %s6015_s15  ;;  %p218_p0 = scmp.ne.s32.totalorder %s5932_s11, %s5928_s10 }
   0x8   : > { %p206_p1 = scmp.eq.s32.totalorder %s205_s17, 0  ;;  %p219_p2 = scmp.eq.s32.totalorder %s6011_s13, 1 }
   0x9   : > { %p224_p3 = scmp.ne.s32.totalorder %s5928_s10, %s5924_s30  ;;  %p225_p4 = scmp.eq.s32.totalorder %s4451_s14, 1 }
   0xa   : > { %s6026_s18 = scalar_select %p206_p1, %s5932_s11, %s208_s16  }
   0xb   : > { %p6028_p5 = por %p219_p2, %p218_p0  ;;  %p6032_p6 = por %p225_p4, %p224_p3 }
   0xc   : > { %p4454_p7 = scmp.ge.s32.totalorder %s5936_s12, 1  ;;  %p296_p8 = scmp.lt.s32.totalorder %s5936_s12, 3 }
   0xe   : > { %p297_p9 = pnand %p4454_p7, %p296_p8 }
  0x10   : > { %300 = sbr.rel (%p297_p9) target bundleno = 1622 (0x656), region = 48 }
  0x15   : > { %v426_v0 = vld [vmem:[%s8477_s1] sm:$0xff]  ;;  %s4456_s23 = sshll.u32 %s6011_s13, 6  ;;  %v4898_v1 = vld [vmem:[%s8479_s3 + $0x74] sm:$0xf]  ;;  %v4714_v4 = vld [vmem:[%s8479_s3 + $0x78] sm:$0xf0] }
  0x16   : > { %v594_v2 = vunpack.c.l.b16 %v426_v0  ;;  %v595_v3 = vunpack.c.h.b16 %v426_v0  ;;  %p343_p10 = scmp.lt.s32.totalorder %s4456_s23, 127  ;;  %v4914_v5 = vld [vmem:[%s8479_s3 + $0xf4] sm:$0xf]  ;;  %vm695_vm0 = vcmask 1043456   ;;  %v4778_v6 = vld [vmem:[%s8479_s3 + $0xf8] sm:$0xf0]  ;;  %v4717_v9 = vor.u32 %v4898_v1, %v4714_v4 }
  0x17   : > { %v4781_v10 = vor.u32 %v4914_v5, %v4778_v6  ;;  %s8579_s0 = sld [smem:[#allocation77_spill]]  ;;  %vm598_vm1 = vcmask 64512   ;;  %v4896_v16 = vld [vmem:[%s8479_s3 + $0x64] sm:$0xf]  ;;  %v4706_v17 = vld [vmem:[%s8479_s3 + $0x68] sm:$0xf0] }
  0x18   : > { %v596_v7 = vpack.c.b16 %v594_v2, %v594_v2  ;;  %v597_v8 = vpack.c.b16 %v595_v3, %v595_v3  ;;  %s8809_s23 = smov (!%p343_p10, %s4456_s23), 127  ;;  %v4912_v18 = vld [vmem:[%s8479_s3 + $0xe4] sm:$0xf]  ;;  %v4709_v19 = vor.u32 %v4896_v16, %v4706_v17  ;;  %v4770_v20 = vld [vmem:[%s8479_s3 + $0xe8] sm:$0xf0]  ;;  %v4923_v17 = vld [vmem:[%s8481_s5 + $0x38] sm:$0xff] }
  0x19   : > { %s6054_s17 = sshll.u32 %s8809_s23, 2  ;;  %v4773_v21 = vor.u32 %v4912_v18, %v4770_v20  ;;  %v4712_v24 = vld [vmem:[%s8479_s3 + $0x70] sm:$0xf]  ;;  %v4899_v25 = vld [vmem:[%s8479_s3 + $0x74] sm:$0xf0]  ;;  %s332_s16 = sand.u32 1, %s5928_s10  }
  0x1a   : > { %v697_v11 = vsel %vm695_vm0, %v596_v7, 0  ;;  %v700_v12 = vsel %vm695_vm0, %v597_v8, 0  ;;  %v4776_v26 = vld [vmem:[%s8479_s3 + $0xf0] sm:$0xf]  ;;  %v4713_v27 = vor.u32 %v4899_v25, %v4712_v24  ;;  %v4915_v28 = vld [vmem:[%s8479_s3 + $0xf4] sm:$0xf0]  ;;  %s7581_s29 = scalar_lea.vmem %s8483_s7, %s6054_s17  ;;  %s7588_s23 = scalar_lea.vmem %s8485_s9, %s6054_s17 }
  0x1b   : > { %709 = vmatpush.bf16.msra.mxu0 %v697_v11  ;;  %878 = vmatpush.bf16.msra.mxu1 %v700_v12  ;;  %v4777_v29 = vor.u32 %v4915_v28, %v4776_v26  ;;  %v4704_v31 = vld [vmem:[%s8479_s3 + $0x60] sm:$0xf]  ;;  %v4897_v32 = vld [vmem:[%s8479_s3 + $0x64] sm:$0xf0]  ;;  %v4696_v37 = vld [vmem:[%s8479_s3 + $0x50] sm:$0xf] }
  0x1c   : > { %1430 = vmatpush.bf16.msra.mxu2 %v4713_v27  ;;  %v4768_v33 = vld [vmem:[%s8479_s3 + $0xe0] sm:$0xf]  ;;  %v4705_v34 = vor.u32 %v4897_v32, %v4704_v31  ;;  %v4913_v35 = vld [vmem:[%s8479_s3 + $0xe4] sm:$0xf0]  ;;  %v4895_v38 = vld [vmem:[%s8479_s3 + $0x54] sm:$0xf0] }
  0x1d   : > { %s6060_s24 = scalar_lea.vmem %s8579_s0, %s6054_s17  ;;  %1599 = vmatpush.bf16.msra.mxu3 %v4777_v29  ;;  %v4769_v36 = vor.u32 %v4913_v35, %v4768_v33  ;;  %v4760_v39 = vld [vmem:[%s8479_s3 + $0xd0] sm:$0xf]  ;;  %v4697_v40 = vor.u32 %v4895_v38, %v4696_v37  ;;  %v4911_v41 = vld [vmem:[%s8479_s3 + $0xd4] sm:$0xf0]  ;;  %v4688_v43 = vld [vmem:[%s8479_s3 + $0x40] sm:$0xf] }
  0x1e   : > { %v4852_v13 = vld [vmem:[%s6060_s24] sm:$0xff]  ;;  %v4853_v14 = vld [vmem:[%s6060_s24 + $0x8] sm:$0xff]  ;;  %v4854_v15 = vld [vmem:[%s6060_s24 + $0x10] sm:$0xff]  ;;  %v4761_v42 = vor.u32 %v4911_v41, %v4760_v39  ;;  %s4455_s21 = sshll.u32 %s332_s16, 9  ;;  %s4933_s27 = sshll.u32 %s6011_s13, 9 }
  0x1f   : > { %1768 = vmatpush.bf16.msrb.mxu0 %v4717_v9  ;;  %1937 = vmatpush.bf16.msrb.mxu1 %v4781_v10  ;;  %v4855_v22 = vld [vmem:[%s6060_s24 + $0x18] sm:$0xff]  ;;  %v4856_v23 = vld [vmem:[%s6060_s24 + $0x20] sm:$0xff]  ;;  %v4857_v30 = vld [vmem:[%s6060_s24 + $0x28] sm:$0xff]  ;;  %s6979_s22 = scalar_lea.vmem [#allocation2], %s4455_s21  ;;  %s4331_s21 = scalar_lea.hbm %s8484_s8, %s4933_s27 }
  0x20   : > { %4590 = vmatmul.msk.bf16.vlgmr.msra.gmra.mxu0 %vm598_vm1, %v4852_v13  ;;  %4622 = vmatmul.msk.bf16.vlgmr.msra.gmra.mxu1 %vm598_vm1, %v4852_v13  ;;  %v4893_v44 = vld [vmem:[%s8479_s3 + $0x44] sm:$0xf0]  ;;  %v4752_v45 = vld [vmem:[%s8479_s3 + $0xc0] sm:$0xf]  ;;  %v4680_v49 = vld [vmem:[%s8479_s3 + $0x30] sm:$0xf] }
  0x21   : > { %1431 = vmatpush.bf16.msra.mxu2 %v4705_v34  ;;  %1600 = vmatpush.bf16.msra.mxu3 %v4769_v36  ;;  %v4909_v46 = vld [vmem:[%s8479_s3 + $0xc4] sm:$0xf0]  ;;  %v4689_v47 = vor.u32 %v4893_v44, %v4688_v43  ;;  %v4891_v50 = vld [vmem:[%s8479_s3 + $0x34] sm:$0xf0]  ;;  %v4744_v51 = vld [vmem:[%s8479_s3 + $0xb0] sm:$0xf] }
  0x22   : > { %v4753_v48 = vor.u32 %v4909_v46, %v4752_v45  ;;  %v4681_v52 = vor.u32 %v4891_v50, %v4680_v49  ;;  %v4907_v53 = vld [vmem:[%s8479_s3 + $0xb4] sm:$0xf0]  ;;  %v4858_v54 = vld [vmem:[%s6060_s24 + $0x30] sm:$0xff]  ;;  %v4672_v56 = vld [vmem:[%s8479_s3 + $0x20] sm:$0xf]  ;;  %s4332_s17 = sshll.u32 %s6979_s22, 4  ;;  %s4333_s17 = int_to_ptr.vmem [resolvable:$true] %s4332_s17 }
  0x23   : > { %1769 = vmatpush.bf16.msrb.mxu0 %v4709_v19  ;;  %1938 = vmatpush.bf16.msrb.mxu1 %v4773_v21  ;;  %v4745_v55 = vor.u32 %v4907_v53, %v4744_v51  ;;  %v4889_v57 = vld [vmem:[%s8479_s3 + $0x24] sm:$0xf0]  ;;  %v4736_v59 = vld [vmem:[%s8479_s3 + $0xa0] sm:$0xf]  ;;  %v4894_v61 = vld [vmem:[%s8479_s3 + $0x54] sm:$0xf] }
  0x24   : > { %v4673_v58 = vor.u32 %v4889_v57, %v4672_v56  ;;  %v4905_v60 = vld [vmem:[%s8479_s3 + $0xa4] sm:$0xf0]  ;;  %v4698_v62 = vld [vmem:[%s8479_s3 + $0x58] sm:$0xf0]  ;;  %v4910_v0 = vld [vmem:[%s8479_s3 + $0xd4] sm:$0xf] }
  0x25   : > { %1432 = vmatpush.bf16.msra.mxu2 %v4697_v40  ;;  %1601 = vmatpush.bf16.msra.mxu3 %v4761_v42  ;;  %v4737_v63 = vor.u32 %v4905_v60, %v4736_v59  ;;  %v4701_v1 = vor.u32 %v4894_v61, %v4698_v62  ;;  %v4762_v2 = vld [vmem:[%s8479_s3 + $0xd8] sm:$0xf0]  ;;  %v4664_v4 = vld [vmem:[%s8479_s3 + $0x10] sm:$0xf]  ;;  %v4887_v5 = vld [vmem:[%s8479_s3 + $0x14] sm:$0xf0] }
  0x26   : > { %v4765_v3 = vor.u32 %v4910_v0, %v4762_v2  ;;  %v4728_v6 = vld [vmem:[%s8479_s3 + $0x90] sm:$0xf]  ;;  %v4665_v7 = vor.u32 %v4887_v5, %v4664_v4  ;;  %v4903_v8 = vld [vmem:[%s8479_s3 + $0x94] sm:$0xf0]  ;;  %v4656_v10 = vld [vmem:[%s8479_s3] sm:$0xf] }
  0x27   : > { %1770 = vmatpush.bf16.msrb.mxu0 %v4701_v1  ;;  %v4729_v9 = vor.u32 %v4903_v8, %v4728_v6  ;;  %v4885_v11 = vld [vmem:[%s8479_s3 + $0x4] sm:$0xf0]  ;;  %v4720_v12 = vld [vmem:[%s8479_s3 + $0x80] sm:$0xf]  ;;  %v4859_v16 = vld [vmem:[%s6060_s24 + $0x38] sm:$0xff]  ;;  %s4334_s25 = sshll.u32 %s4331_s21, 4  ;;  %s4335_s25 = int_to_ptr.hbm [resolvable:$true] %s4334_s25 }
  0x28   : > { %1939 = vmatpush.bf16.msrb.mxu1 %v4765_v3  ;;  %v4657_v13 = vor.u32 %v4885_v11, %v4656_v10  ;;  %v4931_v18 = vld [vmem:[%s8481_s5 + $0x78] sm:$0xff]  ;;  %v4860_v19 = vld [vmem:[%s6060_s24 + $0x40] sm:$0xff]  ;;  %v4861_v37 = vld [vmem:[%s6060_s24 + $0x48] sm:$0xff]  ;;  %s4310_s13 = scalar_lea.sflag [#allocation3], %s332_s16 }
  0x29   : > { %1433 = vmatpush.bf16.msra.mxu2 %v4689_v47  ;;  %1602 = vmatpush.bf16.msra.mxu3 %v4753_v48  ;;  %v427_v20 = vld [vmem:[%s8478_s2] sm:$0x3]  ;;  %v4690_v56 = vld [vmem:[%s8479_s3 + $0x48] sm:$0xf0]  ;;  %v4922_v10 = vld [vmem:[%s8481_s5 + $0x30] sm:$0xff] }
  0x2a   : > { %v6218_v24 = vperm.slane %v427_v20, 1  ;;  %v4754_v59 = vld [vmem:[%s8479_s3 + $0xc8] sm:$0xf0] }
  0x2d   : > { %1434 = vmatpush.bf16.msra.mxu2 %v4681_v52  ;;  %1603 = vmatpush.bf16.msra.mxu3 %v4745_v55  ;;  %v4862_v52 = vld [vmem:[%s6060_s24 + $0x50] sm:$0xff]  ;;  %v4892_v55 = vld [vmem:[%s8479_s3 + $0x44] sm:$0xf] }
  0x2e   : > { %v4693_v57 = vor.u32 %v4892_v55, %v4690_v56 }
  0x30   : > { %4591 = vmatmul.msk.bf16.gmra.mxu0 %vm598_vm1, %v4853_v14  ;;  %4623 = vmatmul.msk.bf16.gmra.mxu1 %vm598_vm1, %v4853_v14  ;;  %v4901_v14 = vld [vmem:[%s8479_s3 + $0x84] sm:$0xf0] }
  0x31   : > { %1435 = vmatpush.bf16.msra.mxu2 %v4673_v58  ;;  %1604 = vmatpush.bf16.msra.mxu3 %v4737_v63  ;;  %v4908_v58 = vld [vmem:[%s8479_s3 + $0xc4] sm:$0xf] }
  0x32   : > { %v4757_v60 = vor.u32 %v4908_v58, %v4754_v59  ;;  %1771 = vmatpush.bf16.msrb.mxu0 %v4693_v57 }
  0x34   : > { %1940 = vmatpush.bf16.msrb.mxu1 %v4757_v60 }
  0x35   : > { %1436 = vmatpush.bf16.msra.mxu2 %v4665_v7  ;;  %1605 = vmatpush.bf16.msra.mxu3 %v4729_v9  ;;  %v4863_v9 = vld [vmem:[%s6060_s24 + $0x58] sm:$0xff] }
  0x39   : > { %1437 = vmatpush.bf16.msra.mxu2 %v4657_v13  ;;  %v4930_v13 = vld [vmem:[%s8481_s5 + $0x70] sm:$0xff] }
  0x3d   : > { %2430 = vmatpush.bf16.msrb.mxu2 %v4923_v17 }
  0x40   : > { %4592 = vmatmul.msk.bf16.gmra.mxu0 %vm598_vm1, %v4854_v15  ;;  %4624 = vmatmul.msk.bf16.gmra.mxu1 %vm598_vm1, %v4854_v15  ;;  %v4721_v15 = vor.u32 %v4901_v14, %v4720_v12 }
  0x41   : > { %2431 = vmatpush.bf16.msrb.mxu2 %v4922_v10 }
  0x42   : > { %1606 = vmatpush.bf16.msra.mxu3 %v4721_v15 }
  0x46   : > { %2599 = vmatpush.bf16.msrb.mxu3 %v4931_v18 }
  0x4a   : > { %2600 = vmatpush.bf16.msrb.mxu3 %v4930_v13 }
  0x50   : > { %4593 = vmatmul.msk.bf16.gmra.mxu0 %vm598_vm1, %v4855_v22  ;;  %4625 = vmatmul.msk.bf16.gmra.mxu1 %vm598_vm1, %v4855_v22 }
  0x60   : > { %4594 = vmatmul.msk.bf16.gmra.mxu0 %vm598_vm1, %v4856_v23  ;;  %4626 = vmatmul.msk.bf16.gmra.mxu1 %vm598_vm1, %v4856_v23  ;;  %v6216_v23 = vperm.slane %v427_v20, 0 }
  0x70   : > { %4595 = vmatmul.msk.bf16.gmra.mxu0 %vm598_vm1, %v4857_v30  ;;  %4627 = vmatmul.msk.bf16.gmra.mxu1 %vm598_vm1, %v4857_v30 }
  0x80   : > { %4596 = vmatmul.msk.bf16.gmra.mxu0 %vm598_vm1, %v4858_v54  ;;  %4628 = vmatmul.msk.bf16.gmra.mxu1 %vm598_vm1, %v4858_v54 }
  0x90   : > { %4597 = vmatmul.msk.bf16.gmra.mxu0 %vm598_vm1, %v4859_v16  ;;  %4629 = vmatmul.msk.bf16.gmra.mxu1 %vm598_vm1, %v4859_v16 }
  0x9d   : > { %v711_v21 = vpop.f32.mrf.mxu0  ;;  %v880_v22 = vpop.f32.mrf.mxu1 }
  0x9e   : > { %v712_v25 = vadd.f32 %v711_v21, %v6216_v23  ;;  %v881_v26 = vadd.f32 %v880_v22, %v6218_v24 }
  0xa0   : > { %4598 = vmatmul.msk.bf16.gmra.mxu0 %vm598_vm1, %v4860_v19  ;;  %4630 = vmatmul.msk.bf16.gmra.mxu1 %vm598_vm1, %v4860_v19  ;;  %v1040_v31 = vmax.f32 %v712_v25, 0.0  ;;  %v1041_v32 = vmax.f32 %v881_v26, 0.0 }
  0xa5   : > { %v713_v27 = vpop.f32.mrf.mxu0  ;;  %v882_v28 = vpop.f32.mrf.mxu1 }
  0xa6   : > { %v714_v29 = vadd.f32 %v713_v27, %v6216_v23  ;;  %v883_v30 = vadd.f32 %v882_v28, %v6218_v24  ;;  %v4864_v28 = vld [vmem:[%s6060_s24 + $0x60] sm:$0xff] }
  0xa8   : > { %v1042_v33 = vmax.f32 %v714_v29, 0.0  ;;  %v1043_v34 = vmax.f32 %v883_v30, 0.0 }
  0xaa   : > { %v6226_v35 = vpack.c.bf16 %v1042_v33, %v1040_v31  ;;  %v6228_v36 = vpack.c.bf16 %v1043_v34, %v1041_v32 }
  0xac   : > { %1438 = vmatmul.bf16.vlgmr.msra.gmra.mxu2 %v6226_v35  ;;  %1607 = vmatmul.bf16.vlgmr.msra.gmra.mxu3 %v6228_v36 }
  0xad   : > { %v716_v38 = vpop.f32.mrf.mxu0  ;;  %v885_v39 = vpop.f32.mrf.mxu1 }
  0xae   : > { %v717_v40 = vadd.f32 %v716_v38, %v6216_v23  ;;  %v886_v41 = vadd.f32 %v885_v39, %v6218_v24 }
  0xb0   : > { %4599 = vmatmul.msk.bf16.gmra.mxu0 %vm598_vm1, %v4861_v37  ;;  %4631 = vmatmul.msk.bf16.gmra.mxu1 %vm598_vm1, %v4861_v37  ;;  %v1044_v46 = vmax.f32 %v717_v40, 0.0  ;;  %v1045_v47 = vmax.f32 %v886_v41, 0.0 }
  0xb5   : > { %v718_v42 = vpop.f32.mrf.mxu0  ;;  %v887_v43 = vpop.f32.mrf.mxu1 }
  0xb6   : > { %v719_v44 = vadd.f32 %v718_v42, %v6216_v23  ;;  %v888_v45 = vadd.f32 %v887_v43, %v6218_v24 }
  0xb8   : > { %v1046_v48 = vmax.f32 %v719_v44, 0.0  ;;  %v1047_v49 = vmax.f32 %v888_v45, 0.0  ;;  %v4865_v45 = vld [vmem:[%s6060_s24 + $0x68] sm:$0xff] }
  0xba   : > { %v6239_v50 = vpack.c.bf16 %v1046_v48, %v1044_v46  ;;  %v6241_v51 = vpack.c.bf16 %v1047_v49, %v1045_v47 }
  0xbc   : > { %1443 = vmatmul.bf16.gmra.mxu2 %v6239_v50  ;;  %1612 = vmatmul.bf16.gmra.mxu3 %v6241_v51 }
  0xbd   : > { %v721_v53 = vpop.f32.mrf.mxu0  ;;  %v890_v54 = vpop.f32.mrf.mxu1 }
  0xbe   : > { %v722_v61 = vadd.f32 %v721_v53, %v6216_v23  ;;  %v891_v62 = vadd.f32 %v890_v54, %v6218_v24 }
  0xc0   : > { %4600 = vmatmul.msk.bf16.gmra.mxu0 %vm598_vm1, %v4862_v52  ;;  %4632 = vmatmul.msk.bf16.gmra.mxu1 %vm598_vm1, %v4862_v52  ;;  %v1048_v3 = vmax.f32 %v722_v61, 0.0  ;;  %v1049_v4 = vmax.f32 %v891_v62, 0.0  ;;  %v4866_v62 = vld [vmem:[%s6060_s24 + $0x70] sm:$0xff] }
  0xc5   : > { %v723_v63 = vpop.f32.mrf.mxu0  ;;  %v892_v0 = vpop.f32.mrf.mxu1 }
  0xc6   : > { %v724_v1 = vadd.f32 %v723_v63, %v6216_v23  ;;  %v893_v2 = vadd.f32 %v892_v0, %v6218_v24 }
  0xc8   : > { %v1050_v5 = vmax.f32 %v724_v1, 0.0  ;;  %v1051_v6 = vmax.f32 %v893_v2, 0.0  ;;  %v4890_v1 = vld [vmem:[%s8479_s3 + $0x34] sm:$0xf]  ;;  %v4682_v2 = vld [vmem:[%s8479_s3 + $0x38] sm:$0xf0] }
  0xca   : > { %v6264_v7 = vpack.c.bf16 %v1050_v5, %v1048_v3  ;;  %v6266_v8 = vpack.c.bf16 %v1051_v6, %v1049_v4  ;;  %v4685_v3 = vor.u32 %v4890_v1, %v4682_v2  ;;  %v4906_v4 = vld [vmem:[%s8479_s3 + $0xb4] sm:$0xf]  ;;  %v4746_v5 = vld [vmem:[%s8479_s3 + $0xb8] sm:$0xf0] }
  0xcb   : > { %v4749_v6 = vor.u32 %v4906_v4, %v4746_v5 }
  0xcc   : > { %1448 = vmatmul.bf16.gmra.mxu2 %v6264_v7  ;;  %1617 = vmatmul.bf16.gmra.mxu3 %v6266_v8 }
  0xcd   : > { %v726_v11 = vpop.f32.mrf.mxu0  ;;  %v895_v12 = vpop.f32.mrf.mxu1  ;;  %1772 = vmatpush.bf16.msrb.mxu0 %v4685_v3  ;;  %1941 = vmatpush.bf16.msrb.mxu1 %v4749_v6  ;;  %v4869_v3 = vld [vmem:[%s6060_s24 + $0x88] sm:$0xff] }
  0xce   : > { %v727_v14 = vadd.f32 %v726_v11, %v6216_v23  ;;  %v896_v15 = vadd.f32 %v895_v12, %v6218_v24 }
  0xd0   : > { %4601 = vmatmul.msk.bf16.gmra.mxu0 %vm598_vm1, %v4863_v9  ;;  %4633 = vmatmul.msk.bf16.gmra.mxu1 %vm598_vm1, %v4863_v9  ;;  %v1052_v20 = vmax.f32 %v727_v14, 0.0  ;;  %v1053_v21 = vmax.f32 %v896_v15, 0.0 }
  0xd5   : > { %v728_v16 = vpop.f32.mrf.mxu0  ;;  %v897_v17 = vpop.f32.mrf.mxu1 }
  0xd6   : > { %v729_v18 = vadd.f32 %v728_v16, %v6216_v23  ;;  %v898_v19 = vadd.f32 %v897_v17, %v6218_v24 }
  0xd8   : > { %v1054_v22 = vmax.f32 %v729_v18, 0.0  ;;  %v1055_v25 = vmax.f32 %v898_v19, 0.0 }
  0xda   : > { %v6283_v26 = vpack.c.bf16 %v1054_v22, %v1052_v20  ;;  %v6285_v27 = vpack.c.bf16 %v1055_v25, %v1053_v21  ;;  %v4867_v21 = vld [vmem:[%s6060_s24 + $0x78] sm:$0xff]  ;;  %v4921_v22 = vld [vmem:[%s8481_s5 + $0x28] sm:$0xff] }
  0xdb   : > { %2432 = vmatpush.bf16.msrb.mxu2 %v4921_v22 }
  0xdc   : > { %1453 = vmatmul.bf16.gmra.mxu2 %v6283_v26  ;;  %1622 = vmatmul.bf16.gmra.mxu3 %v6285_v27 }
  0xdd   : > { %v731_v29 = vpop.f32.mrf.mxu0  ;;  %v900_v30 = vpop.f32.mrf.mxu1 }
  0xde   : > { %v732_v31 = vadd.f32 %v731_v29, %v6216_v23  ;;  %v901_v32 = vadd.f32 %v900_v30, %v6218_v24  ;;  %v4929_v29 = vld [vmem:[%s8481_s5 + $0x68] sm:$0xff] }
  0xdf   : > { %2601 = vmatpush.bf16.msrb.mxu3 %v4929_v29 }
  0xe0   : > { %4602 = vmatmul.msk.bf16.gmra.mxu0 %vm598_vm1, %v4864_v28  ;;  %4634 = vmatmul.msk.bf16.gmra.mxu1 %vm598_vm1, %v4864_v28  ;;  %v1056_v39 = vmax.f32 %v732_v31, 0.0  ;;  %v1057_v40 = vmax.f32 %v901_v32, 0.0 }
  0xe5   : > { %v733_v33 = vpop.f32.mrf.mxu0  ;;  %v902_v34 = vpop.f32.mrf.mxu1 }
  0xe6   : > { %v734_v37 = vadd.f32 %v733_v33, %v6216_v23  ;;  %v903_v38 = vadd.f32 %v902_v34, %v6218_v24 }
  0xe8   : > { %v1058_v41 = vmax.f32 %v734_v37, 0.0  ;;  %v1059_v42 = vmax.f32 %v903_v38, 0.0 }
  0xea   : > { %v6296_v43 = vpack.c.bf16 %v1058_v41, %v1056_v39  ;;  %v6298_v44 = vpack.c.bf16 %v1059_v42, %v1057_v40 }
  0xec   : > { %1458 = vmatmul.bf16.gmra.mxu2 %v6296_v43  ;;  %1627 = vmatmul.bf16.gmra.mxu3 %v6298_v44 }
  0xed   : > { %v736_v46 = vpop.f32.mrf.mxu0  ;;  %v905_v47 = vpop.f32.mrf.mxu1 }
  0xee   : > { %v737_v48 = vadd.f32 %v736_v46, %v6216_v23  ;;  %v906_v49 = vadd.f32 %v905_v47, %v6218_v24  ;;  %v4868_v46 = vld [vmem:[%s6060_s24 + $0x80] sm:$0xff] }
  0xf0   : > { %4603 = vmatmul.msk.bf16.gmra.mxu0 %vm598_vm1, %v4865_v45  ;;  %4635 = vmatmul.msk.bf16.gmra.mxu1 %vm598_vm1, %v4865_v45  ;;  %v1060_v56 = vmax.f32 %v737_v48, 0.0  ;;  %v1061_v57 = vmax.f32 %v906_v49, 0.0 }
  0xf5   : > { %v738_v52 = vpop.f32.mrf.mxu0  ;;  %v907_v53 = vpop.f32.mrf.mxu1 }
  0xf6   : > { %v739_v54 = vadd.f32 %v738_v52, %v6216_v23  ;;  %v908_v55 = vadd.f32 %v907_v53, %v6218_v24 }
  0xf8   : > { %v1062_v58 = vmax.f32 %v739_v54, 0.0  ;;  %v1063_v59 = vmax.f32 %v908_v55, 0.0 }
  0xfa   : > { %v6309_v60 = vpack.c.bf16 %v1062_v58, %v1060_v56  ;;  %v6311_v61 = vpack.c.bf16 %v1063_v59, %v1061_v57 }
  0xfc   : > { %1463 = vmatmul.bf16.gmra.mxu2 %v6309_v60  ;;  %1632 = vmatmul.bf16.gmra.mxu3 %v6311_v61 }
  0xfd   : > { %v741_v63 = vpop.f32.mrf.mxu0  ;;  %v910_v0 = vpop.f32.mrf.mxu1 }
  0xfe   : > { %v742_v9 = vadd.f32 %v741_v63, %v6216_v23  ;;  %v911_v10 = vadd.f32 %v910_v0, %v6218_v24  ;;  %v1264_v63 = vld [vmem:[%s8480_s4] sm:$0x3] }
  0xff   : > { %v6375_v2 = vperm.slane %v1264_v63, 0 }
 0x100   : > { %4604 = vmatmul.msk.bf16.gmra.mxu0 %vm598_vm1, %v4866_v62  ;;  %4636 = vmatmul.msk.bf16.gmra.mxu1 %vm598_vm1, %v4866_v62  ;;  %v1064_v15 = vmax.f32 %v742_v9, 0.0  ;;  %v1065_v16 = vmax.f32 %v911_v10, 0.0 }
 0x105   : > { %v743_v11 = vpop.f32.mrf.mxu0  ;;  %v912_v12 = vpop.f32.mrf.mxu1 }
 0x106   : > { %v744_v13 = vadd.f32 %v743_v11, %v6216_v23  ;;  %v913_v14 = vadd.f32 %v912_v12, %v6218_v24 }
 0x108   : > { %v1066_v17 = vmax.f32 %v744_v13, 0.0  ;;  %v1067_v18 = vmax.f32 %v913_v14, 0.0 }
 0x10a   : > { %v6334_v19 = vpack.c.bf16 %v1066_v17, %v1064_v15  ;;  %v6336_v20 = vpack.c.bf16 %v1067_v18, %v1065_v16 }
 0x10c   : > { %1468 = vmatmul.bf16.gmra.mxu2 %v6334_v19  ;;  %1637 = vmatmul.bf16.gmra.mxu3 %v6336_v20 }
 0x10d   : > { %v746_v25 = vpop.f32.mrf.mxu0  ;;  %v915_v28 = vpop.f32.mrf.mxu1 }
 0x10e   : > { %v747_v30 = vadd.f32 %v746_v25, %v6216_v23  ;;  %v916_v31 = vadd.f32 %v915_v28, %v6218_v24 }
 0x110   : > { %4605 = vmatmul.msk.bf16.gmra.mxu0 %vm598_vm1, %v4867_v21  ;;  %4637 = vmatmul.msk.bf16.gmra.mxu1 %vm598_vm1, %v4867_v21  ;;  %v1068_v38 = vmax.f32 %v747_v30, 0.0  ;;  %v1069_v39 = vmax.f32 %v916_v31, 0.0 }
 0x115   : > { %v748_v32 = vpop.f32.mrf.mxu0  ;;  %v917_v33 = vpop.f32.mrf.mxu1 }
 0x116   : > { %v749_v34 = vadd.f32 %v748_v32, %v6216_v23  ;;  %v918_v37 = vadd.f32 %v917_v33, %v6218_v24 }
 0x118   : > { %v1070_v40 = vmax.f32 %v749_v34, 0.0  ;;  %v1071_v41 = vmax.f32 %v918_v37, 0.0 }
 0x11a   : > { %v6353_v42 = vpack.c.bf16 %v1070_v40, %v1068_v38  ;;  %v6355_v45 = vpack.c.bf16 %v1071_v41, %v1069_v39  ;;  %v4870_v38 = vld [vmem:[%s6060_s24 + $0x90] sm:$0xff] }
 0x11c   : > { %1473 = vmatmul.bf16.gmra.mxu2 %v6353_v42  ;;  %1642 = vmatmul.bf16.gmra.mxu3 %v6355_v45 }
 0x11d   : > { %v751_v47 = vpop.f32.mrf.mxu0  ;;  %v920_v48 = vpop.f32.mrf.mxu1 }
 0x11e   : > { %v752_v49 = vadd.f32 %v751_v47, %v6216_v23  ;;  %v921_v52 = vadd.f32 %v920_v48, %v6218_v24 }
 0x120   : > { %4606 = vmatmul.msk.bf16.gmra.mxu0 %vm598_vm1, %v4868_v46  ;;  %4638 = vmatmul.msk.bf16.gmra.mxu1 %vm598_vm1, %v4868_v46  ;;  %v1072_v57 = vmax.f32 %v752_v49, 0.0  ;;  %v1073_v58 = vmax.f32 %v921_v52, 0.0 }
 0x125   : > { %v753_v53 = vpop.f32.mrf.mxu0  ;;  %v922_v54 = vpop.f32.mrf.mxu1 }
 0x126   : > { %v754_v55 = vadd.f32 %v753_v53, %v6216_v23  ;;  %v923_v56 = vadd.f32 %v922_v54, %v6218_v24  ;;  %v4888_v54 = vld [vmem:[%s8479_s3 + $0x24] sm:$0xf] }
 0x128   : > { %v1074_v59 = vmax.f32 %v754_v55, 0.0  ;;  %v1075_v62 = vmax.f32 %v923_v56, 0.0  ;;  %v4674_v55 = vld [vmem:[%s8479_s3 + $0x28] sm:$0xf0] }
 0x12a   : > { %v6369_v0 = vpack.c.bf16 %v1074_v59, %v1072_v57  ;;  %v6371_v1 = vpack.c.bf16 %v1075_v62, %v1073_v58  ;;  %v4677_v58 = vor.u32 %v4888_v54, %v4674_v55  ;;  %v4904_v59 = vld [vmem:[%s8479_s3 + $0xa4] sm:$0xf]  ;;  %v4738_v62 = vld [vmem:[%s8479_s3 + $0xa8] sm:$0xf0] }
 0x12c   : > { %1478 = vmatmul.bf16.gmra.mxu2 %v6369_v0  ;;  %1647 = vmatmul.bf16.gmra.mxu3 %v6371_v1 }
 0x12d   : > { %v756_v4 = vpop.f32.mrf.mxu0  ;;  %v925_v5 = vpop.f32.mrf.mxu1  ;;  %1773 = vmatpush.bf16.msrb.mxu0 %v4677_v58 }
 0x12e   : > { %v757_v12 = vadd.f32 %v756_v4, %v6216_v23  ;;  %v926_v13 = vadd.f32 %v925_v5, %v6218_v24  ;;  %v4741_v4 = vor.u32 %v4904_v59, %v4738_v62 }
 0x12f   : > { %v1439_v6 = vpop.f32.mrf.mxu2  ;;  %v1608_v9 = vpop.f32.mrf.mxu3 }
 0x130   : > { %v1440_v10 = vadd.f32 %v1439_v6, %v6375_v2  ;;  %4607 = vmatmul.msk.bf16.gmra.mxu0 %vm598_vm1, %v4869_v3  ;;  %4639 = vmatmul.msk.bf16.gmra.mxu1 %vm598_vm1, %v4869_v3  ;;  %v1076_v18 = vmax.f32 %v757_v12, 0.0  ;;  %v1077_v25 = vmax.f32 %v926_v13, 0.0 }
 0x131   : > { %1942 = vmatpush.bf16.msrb.mxu1 %v4741_v4 }
 0x132   : > { %v6381_v11 = vadd.f32 %v1608_v9, %v1440_v10 }
 0x134   : > { %v2106_v34 = vmax.f32 %v6381_v11, 0.0 }
 0x135   : > { %v758_v14 = vpop.f32.mrf.mxu0  ;;  %v927_v15 = vpop.f32.mrf.mxu1 }
 0x136   : > { %v759_v16 = vadd.f32 %v758_v14, %v6216_v23  ;;  %v928_v17 = vadd.f32 %v927_v15, %v6218_v24 }
 0x137   : > { %v1441_v21 = vpop.f32.mrf.mxu2  ;;  %v1610_v22 = vpop.f32.mrf.mxu3 }
 0x138   : > { %v1078_v28 = vmax.f32 %v759_v16, 0.0  ;;  %v1079_v29 = vmax.f32 %v928_v17, 0.0  ;;  %v1442_v30 = vadd.f32 %v1441_v21, %v6375_v2 }
 0x13a   : > { %v6388_v31 = vadd.f32 %v1610_v22, %v1442_v30  ;;  %v6390_v32 = vpack.c.bf16 %v1078_v28, %v1076_v18  ;;  %v6392_v33 = vpack.c.bf16 %v1079_v29, %v1077_v25  ;;  %v4871_v22 = vld [vmem:[%s6060_s24 + $0x98] sm:$0xff]  ;;  %v4920_v25 = vld [vmem:[%s8481_s5 + $0x20] sm:$0xff] }
 0x13b   : > { %2433 = vmatpush.bf16.msrb.mxu2 %v4920_v25 }
 0x13c   : > { %v2108_v37 = vmax.f32 %v6388_v31, 0.0  ;;  %1483 = vmatmul.bf16.gmra.mxu2 %v6390_v32  ;;  %1652 = vmatmul.bf16.gmra.mxu3 %v6392_v33 }
 0x13d   : > { %v761_v39 = vpop.f32.mrf.mxu0  ;;  %v930_v40 = vpop.f32.mrf.mxu1 }
 0x13e   : > { %v6399_v41 = vpack.c.bf16 %v2108_v37, %v2106_v34  ;;  %v762_v52 = vadd.f32 %v761_v39, %v6216_v23  ;;  %v931_v53 = vadd.f32 %v930_v40, %v6218_v24  ;;  %v4928_v39 = vld [vmem:[%s8481_s5 + $0x60] sm:$0xff] }
 0x13f   : > { %v1444_v46 = vpop.f32.mrf.mxu2  ;;  %v1613_v47 = vpop.f32.mrf.mxu3  ;;  %2602 = vmatpush.bf16.msrb.mxu3 %v4928_v39 }
 0x140   : > { %v1445_v48 = vadd.f32 %v1444_v46, %v6375_v2  ;;  %4608 = vmatmul.msk.bf16.gmra.mxu0 %vm598_vm1, %v4870_v38  ;;  %4640 = vmatmul.msk.bf16.gmra.mxu1 %vm598_vm1, %v4870_v38  ;;  %v1080_v5 = vmax.f32 %v762_v52, 0.0  ;;  %v1081_v10 = vmax.f32 %v931_v53, 0.0 }
 0x142   : > { %v6404_v49 = vadd.f32 %v1613_v47, %v1445_v48 }
 0x144   : > { %v2110_v18 = vmax.f32 %v6404_v49, 0.0 }
 0x145   : > { %v763_v56 = vpop.f32.mrf.mxu0  ;;  %v932_v57 = vpop.f32.mrf.mxu1 }
 0x146   : > { %v764_v63 = vadd.f32 %v763_v56, %v6216_v23  ;;  %v933_v3 = vadd.f32 %v932_v57, %v6218_v24 }
 0x147   : > { %v1446_v6 = vpop.f32.mrf.mxu2  ;;  %v1615_v9 = vpop.f32.mrf.mxu3 }
 0x148   : > { %v1082_v12 = vmax.f32 %v764_v63, 0.0  ;;  %v1083_v13 = vmax.f32 %v933_v3, 0.0  ;;  %v1447_v14 = vadd.f32 %v1446_v6, %v6375_v2 }
 0x14a   : > { %v6423_v15 = vadd.f32 %v1615_v9, %v1447_v14  ;;  %v6425_v16 = vpack.c.bf16 %v1082_v12, %v1080_v5  ;;  %v6427_v17 = vpack.c.bf16 %v1083_v13, %v1081_v10  ;;  %v4872_v10 = vld [vmem:[%s6060_s24 + $0xa0] sm:$0xff] }
 0x14c   : > { %v2112_v21 = vmax.f32 %v6423_v15, 0.0  ;;  %1488 = vmatmul.bf16.gmra.mxu2 %v6425_v16  ;;  %1657 = vmatmul.bf16.gmra.mxu3 %v6427_v17 }
 0x14d   : > { %v766_v28 = vpop.f32.mrf.mxu0  ;;  %v935_v29 = vpop.f32.mrf.mxu1 }
 0x14e   : > { %v6437_v30 = vpack.c.bf16 %v2112_v21, %v2110_v18  ;;  %v767_v46 = vadd.f32 %v766_v28, %v6216_v23  ;;  %v936_v47 = vadd.f32 %v935_v29, %v6218_v24 }
 0x14f   : > { %v1449_v34 = vpop.f32.mrf.mxu2  ;;  %v1618_v37 = vpop.f32.mrf.mxu3 }
 0x150   : > { %v1450_v38 = vadd.f32 %v1449_v34, %v6375_v2  ;;  %4609 = vmatmul.msk.bf16.gmra.mxu0 %vm598_vm1, %v4871_v22  ;;  %4641 = vmatmul.msk.bf16.gmra.mxu1 %vm598_vm1, %v4871_v22  ;;  %v1084_v55 = vmax.f32 %v767_v46, 0.0  ;;  %v1085_v58 = vmax.f32 %v936_v47, 0.0 }
 0x152   : > { %v6445_v40 = vadd.f32 %v1618_v37, %v1450_v38 }
 0x154   : > { %v2114_v6 = vmax.f32 %v6445_v40, 0.0 }
 0x155   : > { %v768_v48 = vpop.f32.mrf.mxu0  ;;  %v937_v52 = vpop.f32.mrf.mxu1 }
 0x156   : > { %v769_v53 = vadd.f32 %v768_v48, %v6216_v23  ;;  %v938_v54 = vadd.f32 %v937_v52, %v6218_v24 }
 0x157   : > { %v1451_v56 = vpop.f32.mrf.mxu2  ;;  %v1620_v57 = vpop.f32.mrf.mxu3 }
 0x158   : > { %v1086_v59 = vmax.f32 %v769_v53, 0.0  ;;  %v1087_v62 = vmax.f32 %v938_v54, 0.0  ;;  %v1452_v63 = vadd.f32 %v1451_v56, %v6375_v2 }
 0x15a   : > { %v6452_v3 = vadd.f32 %v1620_v57, %v1452_v63  ;;  %v6454_v4 = vpack.c.bf16 %v1086_v59, %v1084_v55  ;;  %v6456_v5 = vpack.c.bf16 %v1087_v62, %v1085_v58  ;;  %v4873_v63 = vld [vmem:[%s6060_s24 + $0xa8] sm:$0xff] }
 0x15c   : > { %v2116_v9 = vmax.f32 %v6452_v3, 0.0  ;;  %1493 = vmatmul.bf16.gmra.mxu2 %v6454_v4  ;;  %1662 = vmatmul.bf16.gmra.mxu3 %v6456_v5 }
 0x15d   : > { %v771_v12 = vpop.f32.mrf.mxu0  ;;  %v940_v13 = vpop.f32.mrf.mxu1 }
 0x15e   : > { %v6463_v14 = vpack.c.bf16 %v2116_v9, %v2114_v6  ;;  %v772_v28 = vadd.f32 %v771_v12, %v6216_v23  ;;  %v941_v29 = vadd.f32 %v940_v13, %v6218_v24 }
 0x15f   : > { %v1454_v18 = vpop.f32.mrf.mxu2  ;;  %v1623_v21 = vpop.f32.mrf.mxu3 }
 0x160   : > { %v1455_v22 = vadd.f32 %v1454_v18, %v6375_v2  ;;  %4610 = vmatmul.msk.bf16.gmra.mxu0 %vm598_vm1, %v4872_v10  ;;  %4642 = vmatmul.msk.bf16.gmra.mxu1 %vm598_vm1, %v4872_v10  ;;  %v1088_v46 = vmax.f32 %v772_v28, 0.0  ;;  %v1089_v52 = vmax.f32 %v941_v29, 0.0 }
 0x162   : > { %v6468_v25 = vadd.f32 %v1623_v21, %v1455_v22 }
 0x164   : > { %v2118_v59 = vmax.f32 %v6468_v25, 0.0 }
 0x165   : > { %v773_v34 = vpop.f32.mrf.mxu0  ;;  %v942_v37 = vpop.f32.mrf.mxu1 }
 0x166   : > { %v774_v38 = vadd.f32 %v773_v34, %v6216_v23  ;;  %v943_v39 = vadd.f32 %v942_v37, %v6218_v24 }
 0x167   : > { %v1456_v47 = vpop.f32.mrf.mxu2  ;;  %v1625_v48 = vpop.f32.mrf.mxu3 }
 0x168   : > { %v1090_v53 = vmax.f32 %v774_v38, 0.0  ;;  %v1091_v54 = vmax.f32 %v943_v39, 0.0  ;;  %v1457_v55 = vadd.f32 %v1456_v47, %v6375_v2 }
 0x16a   : > { %v6475_v56 = vadd.f32 %v1625_v48, %v1457_v55  ;;  %v6477_v57 = vpack.c.bf16 %v1090_v53, %v1088_v46  ;;  %v6479_v58 = vpack.c.bf16 %v1091_v54, %v1089_v52 }
 0x16c   : > { %v2120_v62 = vmax.f32 %v6475_v56, 0.0  ;;  %1498 = vmatmul.bf16.gmra.mxu2 %v6477_v57  ;;  %1667 = vmatmul.bf16.gmra.mxu3 %v6479_v58 }
 0x16d   : > { %v776_v6 = vpop.f32.mrf.mxu0  ;;  %v945_v9 = vpop.f32.mrf.mxu1 }
 0x16e   : > { %v6486_v10 = vpack.c.bf16 %v2120_v62, %v2118_v59  ;;  %v777_v22 = vadd.f32 %v776_v6, %v6216_v23  ;;  %v946_v28 = vadd.f32 %v945_v9, %v6218_v24  ;;  %v4874_v9 = vld [vmem:[%s6060_s24 + $0xb0] sm:$0xff] }
 0x16f   : > { %v1459_v12 = vpop.f32.mrf.mxu2  ;;  %v1628_v13 = vpop.f32.mrf.mxu3 }
 0x170   : > { %v1460_v18 = vadd.f32 %v1459_v12, %v6375_v2  ;;  %4611 = vmatmul.msk.bf16.gmra.mxu0 %vm598_vm1, %v4873_v63  ;;  %4643 = vmatmul.msk.bf16.gmra.mxu1 %vm598_vm1, %v4873_v63  ;;  %v1092_v39 = vmax.f32 %v777_v22, 0.0  ;;  %v1093_v48 = vmax.f32 %v946_v28, 0.0 }
 0x172   : > { %v6491_v21 = vadd.f32 %v1628_v13, %v1460_v18 }
 0x174   : > { %v2122_v63 = vmax.f32 %v6491_v21, 0.0 }
 0x175   : > { %v778_v29 = vpop.f32.mrf.mxu0  ;;  %v947_v34 = vpop.f32.mrf.mxu1 }
 0x176   : > { %v779_v37 = vadd.f32 %v778_v29, %v6216_v23  ;;  %v948_v38 = vadd.f32 %v947_v34, %v6218_v24 }
 0x177   : > { %v1461_v46 = vpop.f32.mrf.mxu2  ;;  %v1630_v47 = vpop.f32.mrf.mxu3 }
 0x178   : > { %v1094_v52 = vmax.f32 %v779_v37, 0.0  ;;  %v1095_v53 = vmax.f32 %v948_v38, 0.0  ;;  %v1462_v54 = vadd.f32 %v1461_v46, %v6375_v2  ;;  %v4666_v46 = vld [vmem:[%s8479_s3 + $0x18] sm:$0xf0] }
 0x17a   : > { %v6498_v55 = vadd.f32 %v1630_v47, %v1462_v54  ;;  %v6500_v59 = vpack.c.bf16 %v1094_v52, %v1092_v39  ;;  %v6502_v62 = vpack.c.bf16 %v1095_v53, %v1093_v48  ;;  %v4886_v39 = vld [vmem:[%s8479_s3 + $0x14] sm:$0xf]  ;;  %v4730_v54 = vld [vmem:[%s8479_s3 + $0x98] sm:$0xf0] }
 0x17b   : > { %v4669_v52 = vor.u32 %v4886_v39, %v4666_v46  ;;  %v4902_v53 = vld [vmem:[%s8479_s3 + $0x94] sm:$0xf] }
 0x17c   : > { %8580 = vst [vmem:[#allocation5_spill] sm:$0xff] %v6500_v59  ;;  %v2124_v6 = vmax.f32 %v6498_v55, 0.0  ;;  %1503 = vmatmul.bf16.gmra.mxu2 %v6500_v59  ;;  %1672 = vmatmul.bf16.gmra.mxu3 %v6502_v62 }
 0x17d   : > { %8581 = vst [vmem:[#allocation6_spill] sm:$0xff] %v6502_v62  ;;  %v781_v12 = vpop.f32.mrf.mxu0  ;;  %v950_v13 = vpop.f32.mrf.mxu1  ;;  %1774 = vmatpush.bf16.msrb.mxu0 %v4669_v52 }
 0x17e   : > { %v6509_v18 = vpack.c.bf16 %v2124_v6, %v2122_v63  ;;  %v782_v37 = vadd.f32 %v781_v12, %v6216_v23  ;;  %v951_v38 = vadd.f32 %v950_v13, %v6218_v24 }
 0x17f   : > { %v1464_v22 = vpop.f32.mrf.mxu2  ;;  %v1633_v28 = vpop.f32.mrf.mxu3 }
 0x180   : > { %8582 = vst [vmem:[#allocation7_spill] sm:$0xff] %v6509_v18  ;;  %v1465_v29 = vadd.f32 %v1464_v22, %v6375_v2  ;;  %4612 = vmatmul.msk.bf16.gmra.mxu0 %vm598_vm1, %v4874_v9  ;;  %4644 = vmatmul.msk.bf16.gmra.mxu1 %vm598_vm1, %v4874_v9  ;;  %v4733_v9 = vor.u32 %v4902_v53, %v4730_v54  ;;  %v1096_v12 = vmax.f32 %v782_v37, 0.0 }
 0x182   : > { %v6514_v34 = vadd.f32 %v1633_v28, %v1465_v29  ;;  %v1097_v28 = vmax.f32 %v951_v38, 0.0  ;;  %1943 = vmatpush.bf16.msrb.mxu1 %v4733_v9  ;;  %v4875_v38 = vld [vmem:[%s6060_s24 + $0xb8] sm:$0xff] }
 0x184   : > { %8583 = vst [vmem:[#allocation8_spill] sm:$0xff] %v6514_v34 }
 0x185   : > { %v783_v47 = vpop.f32.mrf.mxu0  ;;  %v952_v48 = vpop.f32.mrf.mxu1 }
 0x186   : > { %v784_v63 = vadd.f32 %v783_v47, %v6216_v23  ;;  %v953_v6 = vadd.f32 %v952_v48, %v6218_v24  ;;  %v2126_v47 = vmax.f32 %v6514_v34, 0.0  ;;  %v4919_v48 = vld [vmem:[%s8481_s5 + $0x18] sm:$0xff] }
 0x187   : > { %v1466_v13 = vpop.f32.mrf.mxu2  ;;  %v1635_v22 = vpop.f32.mrf.mxu3  ;;  %2434 = vmatpush.bf16.msrb.mxu2 %v4919_v48 }
 0x188   : > { %v1098_v29 = vmax.f32 %v784_v63, 0.0  ;;  %v1099_v39 = vmax.f32 %v953_v6, 0.0  ;;  %v1467_v46 = vadd.f32 %v1466_v13, %v6375_v2 }
 0x18a   : > { %v6533_v62 = vadd.f32 %v1635_v22, %v1467_v46  ;;  %v6535_v59 = vpack.c.bf16 %v1098_v29, %v1096_v12  ;;  %v6537_v18 = vpack.c.bf16 %v1099_v39, %v1097_v28  ;;  %v4927_v12 = vld [vmem:[%s8481_s5 + $0x58] sm:$0xff] }
 0x18b   : > { %2603 = vmatpush.bf16.msrb.mxu3 %v4927_v12 }
 0x18c   : > { %8584 = vst [vmem:[#allocation9_spill] sm:$0xff] %v6533_v62  ;;  %v2128_v37 = vmax.f32 %v6533_v62, 0.0  ;;  %1508 = vmatmul.bf16.gmra.mxu2 %v6535_v59  ;;  %1677 = vmatmul.bf16.gmra.mxu3 %v6537_v18 }
 0x18d   : > { %8585 = vst [vmem:[#allocation10_spill] sm:$0xff] %v6535_v59  ;;  %v786_v52 = vpop.f32.mrf.mxu0  ;;  %v955_v53 = vpop.f32.mrf.mxu1 }
 0x18e   : > { %8586 = vst [vmem:[#allocation11_spill] sm:$0xff] %v6537_v18  ;;  %v6547_v54 = vpack.c.bf16 %v2128_v37, %v2126_v47  ;;  %v787_v22 = vadd.f32 %v786_v52, %v6216_v23  ;;  %v956_v28 = vadd.f32 %v955_v53, %v6218_v24 }
 0x18f   : > { %v1469_v63 = vpop.f32.mrf.mxu2  ;;  %v1638_v6 = vpop.f32.mrf.mxu3 }
 0x190   : > { %8587 = vst [vmem:[#allocation12_spill] sm:$0xff] %v6547_v54  ;;  %v1470_v9 = vadd.f32 %v1469_v63, %v6375_v2  ;;  %4613 = vmatmul.msk.bf16.gmra.mxu0 %vm598_vm1, %v4875_v38  ;;  %4645 = vmatmul.msk.bf16.gmra.mxu1 %vm598_vm1, %v4875_v38  ;;  %v1100_v37 = vmax.f32 %v787_v22, 0.0  ;;  %v1101_v63 = vmax.f32 %v956_v28, 0.0  ;;  %v4876_v22 = vld [vmem:[%s6060_s24 + $0xc0] sm:$0xff] }
 0x192   : > { %v6555_v13 = vadd.f32 %v1638_v6, %v1470_v9 }
 0x194   : > { %8588 = vst [vmem:[#allocation13_spill] sm:$0xff] %v6555_v13  ;;  %v2130_v12 = vmax.f32 %v6555_v13, 0.0 }
 0x195   : > { %v788_v29 = vpop.f32.mrf.mxu0  ;;  %v957_v39 = vpop.f32.mrf.mxu1 }
 0x196   : > { %v789_v46 = vadd.f32 %v788_v29, %v6216_v23  ;;  %v958_v47 = vadd.f32 %v957_v39, %v6218_v24 }
 0x197   : > { %v1471_v38 = vpop.f32.mrf.mxu2  ;;  %v1640_v48 = vpop.f32.mrf.mxu3 }
 0x198   : > { %v1102_v18 = vmax.f32 %v789_v46, 0.0  ;;  %v1103_v59 = vmax.f32 %v958_v47, 0.0  ;;  %v1472_v6 = vadd.f32 %v1471_v38, %v6375_v2 }
 0x19a   : > { %v6562_v9 = vadd.f32 %v1640_v48, %v1472_v6  ;;  %v6564_v52 = vpack.c.bf16 %v1102_v18, %v1100_v37  ;;  %v6566_v53 = vpack.c.bf16 %v1103_v59, %v1101_v63 }
 0x19c   : > { %8589 = vst [vmem:[#allocation14_spill] sm:$0xff] %v6562_v9  ;;  %v2132_v29 = vmax.f32 %v6562_v9, 0.0  ;;  %1513 = vmatmul.bf16.gmra.mxu2 %v6564_v52  ;;  %1682 = vmatmul.bf16.gmra.mxu3 %v6566_v53 }
 0x19d   : > { %8590 = vst [vmem:[#allocation15_spill] sm:$0xff] %v6564_v52  ;;  %v791_v28 = vpop.f32.mrf.mxu0  ;;  %v960_v39 = vpop.f32.mrf.mxu1 }
 0x19e   : > { %8591 = vst [vmem:[#allocation16_spill] sm:$0xff] %v6566_v53  ;;  %v6573_v46 = vpack.c.bf16 %v2132_v29, %v2130_v12  ;;  %v792_v37 = vadd.f32 %v791_v28, %v6216_v23  ;;  %v961_v48 = vadd.f32 %v960_v39, %v6218_v24 }
 0x19f   : > { %v1474_v47 = vpop.f32.mrf.mxu2  ;;  %v1643_v38 = vpop.f32.mrf.mxu3 }
 0x1a0   : > { %8592 = vst [vmem:[#allocation17_spill] sm:$0xff] %v6573_v46  ;;  %v1475_v18 = vadd.f32 %v1474_v47, %v6375_v2  ;;  %4614 = vmatmul.msk.bf16.gmra.mxu0 %vm598_vm1, %v4876_v22  ;;  %4646 = vmatmul.msk.bf16.gmra.mxu1 %vm598_vm1, %v4876_v22  ;;  %v1104_v29 = vmax.f32 %v792_v37, 0.0  ;;  %v1105_v46 = vmax.f32 %v961_v48, 0.0  ;;  %v4877_v37 = vld [vmem:[%s6060_s24 + $0xc8] sm:$0xff] }
 0x1a2   : > { %v6578_v59 = vadd.f32 %v1643_v38, %v1475_v18 }
 0x1a4   : > { %8593 = vst [vmem:[#allocation18_spill] sm:$0xff] %v6578_v59  ;;  %v2134_v18 = vmax.f32 %v6578_v59, 0.0 }
 0x1a5   : > { %v793_v63 = vpop.f32.mrf.mxu0  ;;  %v962_v6 = vpop.f32.mrf.mxu1 }
 0x1a6   : > { %v794_v53 = vadd.f32 %v793_v63, %v6216_v23  ;;  %v963_v12 = vadd.f32 %v962_v6, %v6218_v24 }
 0x1a7   : > { %v1476_v52 = vpop.f32.mrf.mxu2  ;;  %v1645_v47 = vpop.f32.mrf.mxu3 }
 0x1a8   : > { %v1106_v9 = vmax.f32 %v794_v53, 0.0  ;;  %v1107_v13 = vmax.f32 %v963_v12, 0.0  ;;  %v1477_v22 = vadd.f32 %v1476_v52, %v6375_v2 }
 0x1aa   : > { %v6585_v38 = vadd.f32 %v1645_v47, %v1477_v22  ;;  %v6587_v28 = vpack.c.bf16 %v1106_v9, %v1104_v29  ;;  %v6589_v39 = vpack.c.bf16 %v1107_v13, %v1105_v46 }
 0x1ac   : > { %8594 = vst [vmem:[#allocation19_spill] sm:$0xff] %v6585_v38  ;;  %v2136_v63 = vmax.f32 %v6585_v38, 0.0  ;;  %1518 = vmatmul.bf16.gmra.mxu2 %v6587_v28  ;;  %1687 = vmatmul.bf16.gmra.mxu3 %v6589_v39 }
 0x1ad   : > { %8595 = vst [vmem:[#allocation20_spill] sm:$0xff] %v6587_v28  ;;  %v796_v48 = vpop.f32.mrf.mxu0  ;;  %v965_v53 = vpop.f32.mrf.mxu1 }
 0x1ae   : > { %8596 = vst [vmem:[#allocation21_spill] sm:$0xff] %v6589_v39  ;;  %v6596_v6 = vpack.c.bf16 %v2136_v63, %v2134_v18  ;;  %v797_v46 = vadd.f32 %v796_v48, %v6216_v23  ;;  %v966_v29 = vadd.f32 %v965_v53, %v6218_v24 }
 0x1af   : > { %v1479_v52 = vpop.f32.mrf.mxu2  ;;  %v1648_v12 = vpop.f32.mrf.mxu3 }
 0x1b0   : > { %8597 = vst [vmem:[#allocation22_spill] sm:$0xff] %v6596_v6  ;;  %v1480_v9 = vadd.f32 %v1479_v52, %v6375_v2  ;;  %4615 = vmatmul.msk.bf16.gmra.mxu0 %vm598_vm1, %v4877_v37  ;;  %4647 = vmatmul.msk.bf16.gmra.mxu1 %vm598_vm1, %v4877_v37  ;;  %v1108_v63 = vmax.f32 %v797_v46, 0.0  ;;  %v1109_v6 = vmax.f32 %v966_v29, 0.0  ;;  %v4878_v46 = vld [vmem:[%s6060_s24 + $0xd0] sm:$0xff] }
 0x1b2   : > { %v6601_v13 = vadd.f32 %v1648_v12, %v1480_v9 }
 0x1b4   : > { %8598 = vst [vmem:[#allocation23_spill] sm:$0xff] %v6601_v13  ;;  %v2138_v9 = vmax.f32 %v6601_v13, 0.0 }
 0x1b5   : > { %v798_v47 = vpop.f32.mrf.mxu0  ;;  %v967_v22 = vpop.f32.mrf.mxu1 }
 0x1b6   : > { %v799_v39 = vadd.f32 %v798_v47, %v6216_v23  ;;  %v968_v18 = vadd.f32 %v967_v22, %v6218_v24 }
 0x1b7   : > { %v1481_v28 = vpop.f32.mrf.mxu2  ;;  %v1650_v52 = vpop.f32.mrf.mxu3 }
 0x1b8   : > { %v1110_v38 = vmax.f32 %v799_v39, 0.0  ;;  %v1111_v59 = vmax.f32 %v968_v18, 0.0  ;;  %v1482_v37 = vadd.f32 %v1481_v28, %v6375_v2 }
 0x1ba   : > { %v6608_v12 = vadd.f32 %v1650_v52, %v1482_v37  ;;  %v6610_v48 = vpack.c.bf16 %v1110_v38, %v1108_v63  ;;  %v6612_v53 = vpack.c.bf16 %v1111_v59, %v1109_v6  ;;  %v4884_v52 = vld [vmem:[%s8479_s3 + $0x4] sm:$0xf]  ;;  %v4658_v37 = vld [vmem:[%s8479_s3 + $0x8] sm:$0xf0] }
 0x1bc   : > { %8599 = vst [vmem:[#allocation24_spill] sm:$0xff] %v6608_v12  ;;  %v2140_v47 = vmax.f32 %v6608_v12, 0.0  ;;  %1523 = vmatmul.bf16.gmra.mxu2 %v6610_v48  ;;  %1692 = vmatmul.bf16.gmra.mxu3 %v6612_v53 }
 0x1bd   : > { %8600 = vst [vmem:[#allocation25_spill] sm:$0xff] %v6610_v48  ;;  %v801_v29 = vpop.f32.mrf.mxu0  ;;  %v970_v39 = vpop.f32.mrf.mxu1 }
 0x1be   : > { %8601 = vst [vmem:[#allocation26_spill] sm:$0xff] %v6612_v53  ;;  %v6619_v22 = vpack.c.bf16 %v2140_v47, %v2138_v9  ;;  %v802_v6 = vadd.f32 %v801_v29, %v6216_v23  ;;  %v971_v63 = vadd.f32 %v970_v39, %v6218_v24  ;;  %v4722_v29 = vld [vmem:[%s8479_s3 + $0x88] sm:$0xf0] }
 0x1bf   : > { %v1484_v28 = vpop.f32.mrf.mxu2  ;;  %v1653_v18 = vpop.f32.mrf.mxu3 }
 0x1c0   : > { %8602 = vst [vmem:[#allocation27_spill] sm:$0xff] %v6619_v22  ;;  %v1485_v38 = vadd.f32 %v1484_v28, %v6375_v2  ;;  %4616 = vmatmul.msk.bf16.gmra.mxu0 %vm598_vm1, %v4878_v46  ;;  %4648 = vmatmul.msk.bf16.gmra.mxu1 %vm598_vm1, %v4878_v46  ;;  %v4661_v28 = vor.u32 %v4884_v52, %v4658_v37  ;;  %v4900_v46 = vld [vmem:[%s8479_s3 + $0x84] sm:$0xf]  ;;  %v1112_v53 = vmax.f32 %v802_v6, 0.0  ;;  %v1113_v12 = vmax.f32 %v971_v63, 0.0  ;;  %v4879_v63 = vld [vmem:[%s6060_s24 + $0xd8] sm:$0xff] }
 0x1c2   : > { %v6624_v59 = vadd.f32 %v1653_v18, %v1485_v38  ;;  %v4725_v38 = vor.u32 %v4900_v46, %v4722_v29  ;;  %1775 = vmatpush.bf16.msrb.mxu0 %v4661_v28  ;;  %v4926_v46 = vld [vmem:[%s8481_s5 + $0x50] sm:$0xff] }
 0x1c3   : > { %2604 = vmatpush.bf16.msrb.mxu3 %v4926_v46 }
 0x1c4   : > { %1944 = vmatpush.bf16.msrb.mxu1 %v4725_v38 }
 0x1c5   : > { %v803_v9 = vpop.f32.mrf.mxu0  ;;  %v972_v47 = vpop.f32.mrf.mxu1 }
 0x1c6   : > { %v804_v39 = vadd.f32 %v803_v9, %v6216_v23  ;;  %v973_v18 = vadd.f32 %v972_v47, %v6218_v24  ;;  %v2142_v9 = vmax.f32 %v6624_v59, 0.0 }
 0x1c7   : > { %v1486_v48 = vpop.f32.mrf.mxu2  ;;  %v1655_v22 = vpop.f32.mrf.mxu3 }
 0x1c8   : > { %v1114_v52 = vmax.f32 %v804_v39, 0.0  ;;  %v1115_v37 = vmax.f32 %v973_v18, 0.0  ;;  %v1487_v13 = vadd.f32 %v1486_v48, %v6375_v2  ;;  %v4918_v48 = vld [vmem:[%s8481_s5 + $0x10] sm:$0xff] }
 0x1c9   : > { %2435 = vmatpush.bf16.msrb.mxu2 %v4918_v48 }
 0x1ca   : > { %v6643_v54 = vadd.f32 %v1655_v22, %v1487_v13  ;;  %v6645_v62 = vpack.c.bf16 %v1114_v52, %v1112_v53  ;;  %v6647_v34 = vpack.c.bf16 %v1115_v37, %v1113_v12 }
 0x1cc   : > { %8603 = vst [vmem:[#allocation28_spill] sm:$0xff] %v6645_v62  ;;  %v2144_v6 = vmax.f32 %v6643_v54, 0.0  ;;  %1528 = vmatmul.bf16.gmra.mxu2 %v6645_v62  ;;  %1697 = vmatmul.bf16.gmra.mxu3 %v6647_v34 }
 0x1cd   : > { %8604 = vst [vmem:[#allocation29_spill] sm:$0xff] %v6647_v34  ;;  %v806_v47 = vpop.f32.mrf.mxu0  ;;  %v975_v13 = vpop.f32.mrf.mxu1 }
 0x1ce   : > { %v6657_v53 = vpack.c.bf16 %v2144_v6, %v2142_v9  ;;  %v807_v39 = vadd.f32 %v806_v47, %v6216_v23  ;;  %v976_v18 = vadd.f32 %v975_v13, %v6218_v24 }
 0x1cf   : > { %v1489_v12 = vpop.f32.mrf.mxu2  ;;  %v1658_v22 = vpop.f32.mrf.mxu3 }
 0x1d0   : > { %v1490_v28 = vadd.f32 %v1489_v12, %v6375_v2  ;;  %4617 = vmatmul.msk.bf16.gmra.mxu0 %vm598_vm1, %v4879_v63  ;;  %4649 = vmatmul.msk.bf16.gmra.mxu1 %vm598_vm1, %v4879_v63  ;;  %v1116_v6 = vmax.f32 %v807_v39, 0.0  ;;  %v1117_v12 = vmax.f32 %v976_v18, 0.0  ;;  %v4880_v39 = vld [vmem:[%s6060_s24 + $0xe0] sm:$0xff] }
 0x1d2   : > { %v6665_v29 = vadd.f32 %v1658_v22, %v1490_v28 }
 0x1d4   : > { %8605 = vst [vmem:[#allocation30_spill] sm:$0xff] %v6665_v29  ;;  %v2146_v46 = vmax.f32 %v6665_v29, 0.0 }
 0x1d5   : > { %v808_v38 = vpop.f32.mrf.mxu0  ;;  %v977_v52 = vpop.f32.mrf.mxu1 }
 0x1d6   : > { %v809_v37 = vadd.f32 %v808_v38, %v6216_v23  ;;  %v978_v9 = vadd.f32 %v977_v52, %v6218_v24 }
 0x1d7   : > { %v1491_v63 = vpop.f32.mrf.mxu2  ;;  %v1660_v48 = vpop.f32.mrf.mxu3 }
 0x1d8   : > { %v1118_v34 = vmax.f32 %v809_v37, 0.0  ;;  %v1119_v62 = vmax.f32 %v978_v9, 0.0  ;;  %v1492_v22 = vadd.f32 %v1491_v63, %v6375_v2 }
 0x1da   : > { %v6672_v28 = vadd.f32 %v1660_v48, %v1492_v22  ;;  %v6674_v47 = vpack.c.bf16 %v1118_v34, %v1116_v6  ;;  %v6676_v13 = vpack.c.bf16 %v1119_v62, %v1117_v12 }
 0x1dc   : > { %8606 = vst [vmem:[#allocation31_spill] sm:$0xff] %v6672_v28  ;;  %v2148_v38 = vmax.f32 %v6672_v28, 0.0  ;;  %1533 = vmatmul.bf16.gmra.mxu2 %v6674_v47  ;;  %1702 = vmatmul.bf16.gmra.mxu3 %v6676_v13 }
 0x1dd   : > { %8607 = vst [vmem:[#allocation32_spill] sm:$0xff] %v6674_v47  ;;  %v811_v18 = vpop.f32.mrf.mxu0  ;;  %v980_v52 = vpop.f32.mrf.mxu1 }
 0x1de   : > { %8608 = vst [vmem:[#allocation33_spill] sm:$0xff] %v6676_v13  ;;  %v6683_v37 = vpack.c.bf16 %v2148_v38, %v2146_v46  ;;  %v812_v6 = vadd.f32 %v811_v18, %v6216_v23  ;;  %v981_v48 = vadd.f32 %v980_v52, %v6218_v24 }
 0x1df   : > { %v1494_v9 = vpop.f32.mrf.mxu2  ;;  %v1663_v63 = vpop.f32.mrf.mxu3 }
 0x1e0   : > { %8609 = vst [vmem:[#allocation34_spill] sm:$0xff] %v6683_v37  ;;  %v1495_v34 = vadd.f32 %v1494_v9, %v6375_v2  ;;  %4618 = vmatmul.msk.bf16.gmra.mxu0 %vm598_vm1, %v4880_v39  ;;  %4650 = vmatmul.msk.bf16.gmra.mxu1 %vm598_vm1, %v4880_v39  ;;  %v1120_v38 = vmax.f32 %v812_v6, 0.0  ;;  %v1121_v37 = vmax.f32 %v981_v48, 0.0  ;;  %v4881_v6 = vld [vmem:[%s6060_s24 + $0xe8] sm:$0xff] }
 0x1e2   : > { %v6688_v62 = vadd.f32 %v1663_v63, %v1495_v34 }
 0x1e4   : > { %8610 = vst [vmem:[#allocation35_spill] sm:$0xff] %v6688_v62  ;;  %v2150_v34 = vmax.f32 %v6688_v62, 0.0 }
 0x1e5   : > { %v813_v12 = vpop.f32.mrf.mxu0  ;;  %v982_v22 = vpop.f32.mrf.mxu1 }
 0x1e6   : > { %v814_v13 = vadd.f32 %v813_v12, %v6216_v23  ;;  %v983_v46 = vadd.f32 %v982_v22, %v6218_v24 }
 0x1e7   : > { %v1496_v47 = vpop.f32.mrf.mxu2  ;;  %v1665_v9 = vpop.f32.mrf.mxu3 }
 0x1e8   : > { %v1122_v28 = vmax.f32 %v814_v13, 0.0  ;;  %v1123_v29 = vmax.f32 %v983_v46, 0.0  ;;  %v1497_v39 = vadd.f32 %v1496_v47, %v6375_v2 }
 0x1ea   : > { %v6695_v63 = vadd.f32 %v1665_v9, %v1497_v39  ;;  %v6697_v18 = vpack.c.bf16 %v1122_v28, %v1120_v38  ;;  %v6699_v52 = vpack.c.bf16 %v1123_v29, %v1121_v37 }
 0x1ec   : > { %8611 = vst [vmem:[#allocation36_spill] sm:$0xff] %v6695_v63  ;;  %v2152_v12 = vmax.f32 %v6695_v63, 0.0  ;;  %1538 = vmatmul.bf16.gmra.mxu2 %v6697_v18  ;;  %1707 = vmatmul.bf16.gmra.mxu3 %v6699_v52 }
 0x1ed   : > { %8612 = vst [vmem:[#allocation37_spill] sm:$0xff] %v6697_v18  ;;  %v816_v48 = vpop.f32.mrf.mxu0  ;;  %v985_v13 = vpop.f32.mrf.mxu1 }
 0x1ee   : > { %8613 = vst [vmem:[#allocation38_spill] sm:$0xff] %v6699_v52  ;;  %v6706_v22 = vpack.c.bf16 %v2152_v12, %v2150_v34  ;;  %v817_v37 = vadd.f32 %v816_v48, %v6216_v23  ;;  %v986_v38 = vadd.f32 %v985_v13, %v6218_v24 }
 0x1ef   : > { %v1499_v47 = vpop.f32.mrf.mxu2  ;;  %v1668_v46 = vpop.f32.mrf.mxu3 }
 0x1f0   : > { %8614 = vst [vmem:[#allocation39_spill] sm:$0xff] %v6706_v22  ;;  %v1500_v28 = vadd.f32 %v1499_v47, %v6375_v2  ;;  %4619 = vmatmul.msk.bf16.gmra.mxu0 %vm598_vm1, %v4881_v6  ;;  %4651 = vmatmul.msk.bf16.gmra.mxu1 %vm598_vm1, %v4881_v6  ;;  %v1124_v12 = vmax.f32 %v817_v37, 0.0  ;;  %v1125_v22 = vmax.f32 %v986_v38, 0.0  ;;  %v4882_v37 = vld [vmem:[%s6060_s24 + $0xf0] sm:$0xff] }
 0x1f2   : > { %v6711_v29 = vadd.f32 %v1668_v46, %v1500_v28 }
 0x1f4   : > { %8615 = vst [vmem:[#allocation40_spill] sm:$0xff] %v6711_v29  ;;  %v2154_v28 = vmax.f32 %v6711_v29, 0.0 }
 0x1f5   : > { %v818_v9 = vpop.f32.mrf.mxu0  ;;  %v987_v39 = vpop.f32.mrf.mxu1 }
 0x1f6   : > { %v819_v52 = vadd.f32 %v818_v9, %v6216_v23  ;;  %v988_v34 = vadd.f32 %v987_v39, %v6218_v24 }
 0x1f7   : > { %v1501_v18 = vpop.f32.mrf.mxu2  ;;  %v1670_v47 = vpop.f32.mrf.mxu3 }
 0x1f8   : > { %v1126_v63 = vmax.f32 %v819_v52, 0.0  ;;  %v1127_v62 = vmax.f32 %v988_v34, 0.0  ;;  %v1502_v6 = vadd.f32 %v1501_v18, %v6375_v2 }
 0x1fa   : > { %v6718_v46 = vadd.f32 %v1670_v47, %v1502_v6  ;;  %v6720_v48 = vpack.c.bf16 %v1126_v63, %v1124_v12  ;;  %v6722_v13 = vpack.c.bf16 %v1127_v62, %v1125_v22 }
 0x1fc   : > { %8616 = vst [vmem:[#allocation41_spill] sm:$0xff] %v6718_v46  ;;  %v2156_v9 = vmax.f32 %v6718_v46, 0.0  ;;  %1543 = vmatmul.bf16.gmra.mxu2 %v6720_v48  ;;  %1712 = vmatmul.bf16.gmra.mxu3 %v6722_v13 }
 0x1fd   : > { %8617 = vst [vmem:[#allocation42_spill] sm:$0xff] %v6720_v48  ;;  %v821_v38 = vpop.f32.mrf.mxu0  ;;  %v990_v52 = vpop.f32.mrf.mxu1 }
 0x1fe   : > { %8618 = vst [vmem:[#allocation43_spill] sm:$0xff] %v6722_v13  ;;  %v6729_v39 = vpack.c.bf16 %v2156_v9, %v2154_v28  ;;  %v822_v22 = vadd.f32 %v821_v38, %v6216_v23  ;;  %v991_v12 = vadd.f32 %v990_v52, %v6218_v24 }
 0x1ff   : > { %v1504_v18 = vpop.f32.mrf.mxu2  ;;  %v1673_v34 = vpop.f32.mrf.mxu3 }
 0x200   : > { %8619 = vst [vmem:[#allocation44_spill] sm:$0xff] %v6729_v39  ;;  %v1505_v63 = vadd.f32 %v1504_v18, %v6375_v2  ;;  %4620 = vmatmul.msk.bf16.gmra.mxu0 %vm598_vm1, %v4882_v37  ;;  %4652 = vmatmul.msk.bf16.gmra.mxu1 %vm598_vm1, %v4882_v37  ;;  %v1128_v9 = vmax.f32 %v822_v22, 0.0  ;;  %v1129_v39 = vmax.f32 %v991_v12, 0.0  ;;  %v4883_v22 = vld [vmem:[%s6060_s24 + $0xf8] sm:$0xff]  ;;  %s5888_s24 = sshra.s32 %s4335_s25, 4  ;;  %s5889_s24 = int_to_ptr.hbm [resolvable:$true] %s5888_s24 }
 0x201   : > { %s5890_s26 = scalar_lea.hbm %s5889_s24, 512  ;;  %p5895_p0 = scmp.lt.s32.totalorder %s5889_s24, %s8484_s8 }
 0x202   : > { %v6734_v62 = vadd.f32 %v1673_v34, %v1505_v63  ;;  %p5891_p11 = scmp.ne.s32.totalorder %s5889_s24, %s5890_s26 }
 0x204   : > { %8620 = vst [vmem:[#allocation45_spill] sm:$0xff] %v6734_v62  ;;  %v2158_v63 = vmax.f32 %v6734_v62, 0.0  ;;  %p5892_p12 = pnand %p5891_p11, %p6028_p5 }
 0x205   : > { %v823_v47 = vpop.f32.mrf.mxu0  ;;  %v992_v6 = vpop.f32.mrf.mxu1 }
 0x206   : > { %v824_v13 = vadd.f32 %v823_v47, %v6216_v23  ;;  %v993_v28 = vadd.f32 %v992_v6, %v6218_v24  ;;  %p5893_p13 = pneg %p5892_p12 }
 0x207   : > { %v1506_v48 = vpop.f32.mrf.mxu2  ;;  %v1675_v18 = vpop.f32.mrf.mxu3 }
 0x208   : > { %v1130_v46 = vmax.f32 %v824_v13, 0.0  ;;  %v1131_v29 = vmax.f32 %v993_v28, 0.0  ;;  %v1507_v37 = vadd.f32 %v1506_v48, %v6375_v2  ;;  %v4917_v13 = vld [vmem:[%s8481_s5 + $0x8] sm:$0xff] }
 0x209   : > { %2436 = vmatpush.bf16.msrb.mxu2 %v4917_v13  ;;  %v4925_v28 = vld [vmem:[%s8481_s5 + $0x48] sm:$0xff] }
 0x20a   : > { %v6741_v34 = vadd.f32 %v1675_v18, %v1507_v37  ;;  %v6743_v38 = vpack.c.bf16 %v1130_v46, %v1128_v9  ;;  %v6745_v52 = vpack.c.bf16 %v1131_v29, %v1129_v39  ;;  %2605 = vmatpush.bf16.msrb.mxu3 %v4925_v28 }
 0x20c   : > { %8621 = vst [vmem:[#allocation46_spill] sm:$0xff] %v6741_v34  ;;  %v2160_v47 = vmax.f32 %v6741_v34, 0.0  ;;  %1548 = vmatmul.bf16.gmra.mxu2 %v6743_v38  ;;  %1717 = vmatmul.bf16.gmra.mxu3 %v6745_v52 }
 0x20d   : > { %8622 = vst [vmem:[#allocation47_spill] sm:$0xff] %v6743_v38  ;;  %v826_v48 = vpop.f32.mrf.mxu0  ;;  %v995_v12 = vpop.f32.mrf.mxu1 }
 0x20e   : > { %8623 = vst [vmem:[#allocation48_spill] sm:$0xff] %v6745_v52  ;;  %v6755_v46 = vpack.c.bf16 %v2160_v47, %v2158_v63  ;;  %v827_v18 = vadd.f32 %v826_v48, %v6216_v23  ;;  %v996_v37 = vadd.f32 %v995_v12, %v6218_v24 }
 0x20f   : > { %v1509_v29 = vpop.f32.mrf.mxu2  ;;  %v1678_v39 = vpop.f32.mrf.mxu3 }
 0x210   : > { %8624 = vst [vmem:[#allocation49_spill] sm:$0xff] %v6755_v46  ;;  %v1510_v6 = vadd.f32 %v1509_v29, %v6375_v2  ;;  %4621 = vmatmul.msk.bf16.gmra.mxu0 %vm598_vm1, %v4883_v22  ;;  %4653 = vmatmul.msk.bf16.gmra.mxu1 %vm598_vm1, %v4883_v22  ;;  %v1132_v52 = vmax.f32 %v827_v18, 0.0  ;;  %v1133_v46 = vmax.f32 %v996_v37, 0.0 }
 0x212   : > { %v6763_v9 = vadd.f32 %v1678_v39, %v1510_v6 }
 0x214   : > { %v2162_v12 = vmax.f32 %v6763_v9, 0.0 }
 0x215   : > { %v828_v63 = vpop.f32.mrf.mxu0  ;;  %v997_v47 = vpop.f32.mrf.mxu1 }
 0x216   : > { %v829_v13 = vadd.f32 %v828_v63, %v6216_v23  ;;  %v998_v29 = vadd.f32 %v997_v47, %v6218_v24 }
 0x217   : > { %v1511_v38 = vpop.f32.mrf.mxu2  ;;  %v1680_v22 = vpop.f32.mrf.mxu3 }
 0x218   : > { %v1134_v34 = vmax.f32 %v829_v13, 0.0  ;;  %v1135_v62 = vmax.f32 %v998_v29, 0.0  ;;  %v1512_v39 = vadd.f32 %v1511_v38, %v6375_v2 }
 0x21a   : > { %v6770_v6 = vadd.f32 %v1680_v22, %v1512_v39  ;;  %v6772_v28 = vpack.c.bf16 %v1134_v34, %v1132_v52  ;;  %v6774_v48 = vpack.c.bf16 %v1135_v62, %v1133_v46 }
 0x21c   : > { %8625 = vst [vmem:[#allocation50_spill] sm:$0xff] %v6772_v28  ;;  %v2164_v63 = vmax.f32 %v6770_v6, 0.0  ;;  %1553 = vmatmul.bf16.gmra.mxu2 %v6772_v28  ;;  %1722 = vmatmul.bf16.gmra.mxu3 %v6774_v48 }
 0x21d   : > { %8626 = vst [vmem:[#allocation51_spill] sm:$0xff] %v6774_v48  ;;  %v831_v18 = vpop.f32.mrf.mxu0  ;;  %v1000_v37 = vpop.f32.mrf.mxu1 }
 0x21e   : > { %v6780_v47 = vpack.c.bf16 %v2164_v63, %v2162_v12  ;;  %v832_v34 = vadd.f32 %v831_v18, %v6216_v23  ;;  %v1001_v52 = vadd.f32 %v1000_v37, %v6218_v24 }
 0x21f   : > { %v1514_v13 = vpop.f32.mrf.mxu2  ;;  %v1683_v38 = vpop.f32.mrf.mxu3 }
 0x220   : > { %8627 = vst [vmem:[#allocation52_spill] sm:$0xff] %v6780_v47  ;;  %v1515_v29 = vadd.f32 %v1514_v13, %v6375_v2  ;;  %1776 = vmatmul.bf16.vlgmr.msrb.gmra.mxu0 %v6226_v35  ;;  %1945 = vmatmul.bf16.vlgmr.msrb.gmra.mxu1 %v6228_v36  ;;  %v1136_v63 = vmax.f32 %v832_v34, 0.0  ;;  %v1137_v13 = vmax.f32 %v1001_v52, 0.0 }
 0x222   : > { %v6785_v62 = vadd.f32 %v1683_v38, %v1515_v29 }
 0x224   : > { %v2166_v37 = vmax.f32 %v6785_v62, 0.0 }
 0x225   : > { %v833_v46 = vpop.f32.mrf.mxu0  ;;  %v1002_v22 = vpop.f32.mrf.mxu1 }
 0x226   : > { %v834_v39 = vadd.f32 %v833_v46, %v6216_v23  ;;  %v1003_v12 = vadd.f32 %v1002_v22, %v6218_v24 }
 0x227   : > { %v1516_v48 = vpop.f32.mrf.mxu2  ;;  %v1685_v28 = vpop.f32.mrf.mxu3 }
 0x228   : > { %v1138_v47 = vmax.f32 %v834_v39, 0.0  ;;  %v1139_v35 = vmax.f32 %v1003_v12, 0.0  ;;  %v1517_v36 = vadd.f32 %v1516_v48, %v6375_v2 }
 0x22a   : > { %v6792_v38 = vadd.f32 %v1685_v28, %v1517_v36  ;;  %v6794_v29 = vpack.c.bf16 %v1138_v47, %v1136_v63  ;;  %v6796_v18 = vpack.c.bf16 %v1139_v35, %v1137_v13 }
 0x22c   : > { %8628 = vst [vmem:[#allocation53_spill] sm:$0xff] %v6794_v29  ;;  %v2168_v46 = vmax.f32 %v6792_v38, 0.0  ;;  %1558 = vmatmul.bf16.gmra.mxu2 %v6794_v29  ;;  %1727 = vmatmul.bf16.gmra.mxu3 %v6796_v18 }
 0x22d   : > { %8629 = vst [vmem:[#allocation54_spill] sm:$0xff] %v6796_v18  ;;  %v836_v34 = vpop.f32.mrf.mxu0  ;;  %v1005_v52 = vpop.f32.mrf.mxu1 }
 0x22e   : > { %v6802_v22 = vpack.c.bf16 %v2168_v46, %v2166_v37  ;;  %v837_v12 = vadd.f32 %v836_v34, %v6216_v23  ;;  %v1006_v63 = vadd.f32 %v1005_v52, %v6218_v24 }
 0x22f   : > { %v1519_v39 = vpop.f32.mrf.mxu2  ;;  %v1688_v48 = vpop.f32.mrf.mxu3 }
 0x230   : > { %8630 = vst [vmem:[#allocation55_spill] sm:$0xff] %v6802_v22  ;;  %v1520_v28 = vadd.f32 %v1519_v39, %v6375_v2  ;;  %1781 = vmatmul.bf16.gmra.mxu0 %v6239_v50  ;;  %1950 = vmatmul.bf16.gmra.mxu1 %v6241_v51  ;;  %v1140_v46 = vmax.f32 %v837_v12, 0.0  ;;  %v1141_v39 = vmax.f32 %v1006_v63, 0.0 }
 0x232   : > { %v6807_v47 = vadd.f32 %v1688_v48, %v1520_v28 }
 0x234   : > { %v2170_v52 = vmax.f32 %v6807_v47, 0.0 }
 0x235   : > { %v838_v13 = vpop.f32.mrf.mxu0  ;;  %v1007_v35 = vpop.f32.mrf.mxu1 }
 0x236   : > { %v839_v36 = vadd.f32 %v838_v13, %v6216_v23  ;;  %v1008_v37 = vadd.f32 %v1007_v35, %v6218_v24 }
 0x237   : > { %v1521_v18 = vpop.f32.mrf.mxu2  ;;  %v1690_v29 = vpop.f32.mrf.mxu3 }
 0x238   : > { %v1142_v22 = vmax.f32 %v839_v36, 0.0  ;;  %v1143_v50 = vmax.f32 %v1008_v37, 0.0  ;;  %v1522_v51 = vadd.f32 %v1521_v18, %v6375_v2 }
 0x23a   : > { %v6814_v48 = vadd.f32 %v1690_v29, %v1522_v51  ;;  %v6816_v28 = vpack.c.bf16 %v1142_v22, %v1140_v46  ;;  %v6818_v34 = vpack.c.bf16 %v1143_v50, %v1141_v39 }
 0x23c   : > { %8631 = vst [vmem:[#allocation56_spill] sm:$0xff] %v6816_v28  ;;  %v2172_v13 = vmax.f32 %v6814_v48, 0.0  ;;  %1563 = vmatmul.bf16.gmra.mxu2 %v6816_v28  ;;  %1732 = vmatmul.bf16.gmra.mxu3 %v6818_v34 }
 0x23d   : > { %8632 = vst [vmem:[#allocation57_spill] sm:$0xff] %v6818_v34  ;;  %v841_v12 = vpop.f32.mrf.mxu0  ;;  %v1010_v63 = vpop.f32.mrf.mxu1 }
 0x23e   : > { %v6824_v35 = vpack.c.bf16 %v2172_v13, %v2170_v52  ;;  %v842_v37 = vadd.f32 %v841_v12, %v6216_v23  ;;  %v1011_v46 = vadd.f32 %v1010_v63, %v6218_v24 }
 0x23f   : > { %v1524_v36 = vpop.f32.mrf.mxu2  ;;  %v1693_v18 = vpop.f32.mrf.mxu3 }
 0x240   : > { %8633 = vst [vmem:[#allocation58_spill] sm:$0xff] %v6824_v35  ;;  %v1525_v29 = vadd.f32 %v1524_v36, %v6375_v2  ;;  %1786 = vmatmul.bf16.gmra.mxu0 %v6264_v7  ;;  %1955 = vmatmul.bf16.gmra.mxu1 %v6266_v8  ;;  %v1144_v13 = vmax.f32 %v842_v37, 0.0  ;;  %v1145_v36 = vmax.f32 %v1011_v46, 0.0  ;;  %v4916_v37 = vld [vmem:[%s8481_s5] sm:$0xff] }
 0x241   : > { %2437 = vmatpush.bf16.msrb.mxu2 %v4916_v37 }
 0x242   : > { %v6829_v22 = vadd.f32 %v1693_v18, %v1525_v29 }
 0x244   : > { %v2174_v63 = vmax.f32 %v6829_v22, 0.0 }
 0x245   : > { %v843_v39 = vpop.f32.mrf.mxu0  ;;  %v1012_v50 = vpop.f32.mrf.mxu1 }
 0x246   : > { %v844_v51 = vadd.f32 %v843_v39, %v6216_v23  ;;  %v1013_v52 = vadd.f32 %v1012_v50, %v6218_v24 }
 0x247   : > { %v1526_v34 = vpop.f32.mrf.mxu2  ;;  %v1695_v28 = vpop.f32.mrf.mxu3 }
 0x248   : > { %v1146_v35 = vmax.f32 %v844_v51, 0.0  ;;  %v1147_v7 = vmax.f32 %v1013_v52, 0.0  ;;  %v1527_v8 = vadd.f32 %v1526_v34, %v6375_v2  ;;  %v4924_v52 = vld [vmem:[%s8481_s5 + $0x40] sm:$0xff] }
 0x249   : > { %2606 = vmatpush.bf16.msrb.mxu3 %v4924_v52 }
 0x24a   : > { %v6836_v18 = vadd.f32 %v1695_v28, %v1527_v8  ;;  %v6838_v29 = vpack.c.bf16 %v1146_v35, %v1144_v13  ;;  %v6840_v12 = vpack.c.bf16 %v1147_v7, %v1145_v36 }
 0x24c   : > { %8634 = vst [vmem:[#allocation59_spill] sm:$0xff] %v6838_v29  ;;  %v2176_v39 = vmax.f32 %v6836_v18, 0.0  ;;  %1568 = vmatmul.bf16.gmra.mxu2 %v6838_v29  ;;  %1737 = vmatmul.bf16.gmra.mxu3 %v6840_v12 }
 0x24d   : > { %8635 = vst [vmem:[#allocation60_spill] sm:$0xff] %v6840_v12  ;;  %v846_v46 = vpop.f32.mrf.mxu0  ;;  %v1015_v34 = vpop.f32.mrf.mxu1 }
 0x24e   : > { %v6849_v28 = vpack.c.bf16 %v2176_v39, %v2174_v63  ;;  %v847_v36 = vadd.f32 %v846_v46, %v6216_v23  ;;  %v1016_v7 = vadd.f32 %v1015_v34, %v6218_v24 }
 0x24f   : > { %v1529_v35 = vpop.f32.mrf.mxu2  ;;  %v1698_v50 = vpop.f32.mrf.mxu3 }
 0x250   : > { %8636 = vst [vmem:[#allocation61_spill] sm:$0xff] %v6849_v28  ;;  %v1530_v51 = vadd.f32 %v1529_v35, %v6375_v2  ;;  %1791 = vmatmul.bf16.gmra.mxu0 %v6283_v26  ;;  %1960 = vmatmul.bf16.gmra.mxu1 %v6285_v27  ;;  %v1148_v26 = vmax.f32 %v847_v36, 0.0  ;;  %v1149_v12 = vmax.f32 %v1016_v7, 0.0 }
 0x252   : > { %v6857_v13 = vadd.f32 %v1698_v50, %v1530_v51 }
 0x254   : > { %v2178_v34 = vmax.f32 %v6857_v13, 0.0 }
 0x255   : > { %v848_v8 = vpop.f32.mrf.mxu0  ;;  %v1017_v63 = vpop.f32.mrf.mxu1 }
 0x256   : > { %v849_v39 = vadd.f32 %v848_v8, %v6216_v23  ;;  %v1018_v37 = vadd.f32 %v1017_v63, %v6218_v24 }
 0x257   : > { %v1531_v35 = vpop.f32.mrf.mxu2  ;;  %v1700_v27 = vpop.f32.mrf.mxu3 }
 0x258   : > { %v1150_v29 = vmax.f32 %v849_v39, 0.0  ;;  %v1151_v28 = vmax.f32 %v1018_v37, 0.0  ;;  %v1532_v50 = vadd.f32 %v1531_v35, %v6375_v2 }
 0x25a   : > { %v6864_v51 = vadd.f32 %v1700_v27, %v1532_v50  ;;  %v6866_v52 = vpack.c.bf16 %v1150_v29, %v1148_v26  ;;  %v6868_v46 = vpack.c.bf16 %v1151_v28, %v1149_v12 }
 0x25c   : > { %8637 = vst [vmem:[#allocation62_spill] sm:$0xff] %v6866_v52  ;;  %v2180_v8 = vmax.f32 %v6864_v51, 0.0  ;;  %1573 = vmatmul.bf16.gmra.mxu2 %v6866_v52  ;;  %1742 = vmatmul.bf16.gmra.mxu3 %v6868_v46 }
 0x25d   : > { %8638 = vst [vmem:[#allocation63_spill] sm:$0xff] %v6868_v46  ;;  %v851_v36 = vpop.f32.mrf.mxu0  ;;  %v1020_v7 = vpop.f32.mrf.mxu1 }
 0x25e   : > { %v6874_v63 = vpack.c.bf16 %v2180_v8, %v2178_v34  ;;  %v852_v12 = vadd.f32 %v851_v36, %v6216_v23  ;;  %v1021_v28 = vadd.f32 %v1020_v7, %v6218_v24 }
 0x25f   : > { %v1534_v39 = vpop.f32.mrf.mxu2  ;;  %v1703_v37 = vpop.f32.mrf.mxu3 }
 0x260   : > { %8639 = vst [vmem:[#allocation64_spill] sm:$0xff] %v6874_v63  ;;  %v1535_v35 = vadd.f32 %v1534_v39, %v6375_v2  ;;  %1796 = vmatmul.bf16.gmra.mxu0 %v6296_v43  ;;  %1965 = vmatmul.bf16.gmra.mxu1 %v6298_v44  ;;  %v1152_v8 = vmax.f32 %v852_v12, 0.0  ;;  %v1153_v39 = vmax.f32 %v1021_v28, 0.0 }
 0x262   : > { %v6879_v29 = vadd.f32 %v1703_v37, %v1535_v35 }
 0x264   : > { %v2182_v7 = vmax.f32 %v6879_v29, 0.0 }
 0x265   : > { %v853_v26 = vpop.f32.mrf.mxu0  ;;  %v1022_v27 = vpop.f32.mrf.mxu1 }
 0x266   : > { %v854_v50 = vadd.f32 %v853_v26, %v6216_v23  ;;  %v1023_v34 = vadd.f32 %v1022_v27, %v6218_v24 }
 0x267   : > { %v1536_v46 = vpop.f32.mrf.mxu2  ;;  %v1705_v52 = vpop.f32.mrf.mxu3 }
 0x268   : > { %v1154_v63 = vmax.f32 %v854_v50, 0.0  ;;  %v1155_v43 = vmax.f32 %v1023_v34, 0.0  ;;  %v1537_v44 = vadd.f32 %v1536_v46, %v6375_v2 }
 0x26a   : > { %v6886_v37 = vadd.f32 %v1705_v52, %v1537_v44  ;;  %v6888_v35 = vpack.c.bf16 %v1154_v63, %v1152_v8  ;;  %v6890_v36 = vpack.c.bf16 %v1155_v43, %v1153_v39 }
 0x26c   : > { %8640 = vst [vmem:[#allocation65_spill] sm:$0xff] %v6888_v35  ;;  %v2184_v26 = vmax.f32 %v6886_v37, 0.0  ;;  %1578 = vmatmul.bf16.gmra.mxu2 %v6888_v35  ;;  %1747 = vmatmul.bf16.gmra.mxu3 %v6890_v36 }
 0x26d   : > { %8641 = vst [vmem:[#allocation66_spill] sm:$0xff] %v6890_v36  ;;  %v856_v12 = vpop.f32.mrf.mxu0  ;;  %v1025_v28 = vpop.f32.mrf.mxu1 }
 0x26e   : > { %v6896_v27 = vpack.c.bf16 %v2184_v26, %v2182_v7  ;;  %v857_v34 = vadd.f32 %v856_v12, %v6216_v23  ;;  %v1026_v8 = vadd.f32 %v1025_v28, %v6218_v24 }
 0x26f   : > { %v1539_v50 = vpop.f32.mrf.mxu2  ;;  %v1708_v46 = vpop.f32.mrf.mxu3 }
 0x270   : > { %8642 = vst [vmem:[#allocation67_spill] sm:$0xff] %v6896_v27  ;;  %v1540_v52 = vadd.f32 %v1539_v50, %v6375_v2  ;;  %1801 = vmatmul.bf16.gmra.mxu0 %v6309_v60  ;;  %1970 = vmatmul.bf16.gmra.mxu1 %v6311_v61  ;;  %v1156_v26 = vmax.f32 %v857_v34, 0.0  ;;  %v1157_v50 = vmax.f32 %v1026_v8, 0.0 }
 0x272   : > { %v6901_v63 = vadd.f32 %v1708_v46, %v1540_v52 }
 0x274   : > { %v2186_v28 = vmax.f32 %v6901_v63, 0.0 }
 0x275   : > { %v858_v39 = vpop.f32.mrf.mxu0  ;;  %v1027_v43 = vpop.f32.mrf.mxu1 }
 0x276   : > { %v859_v44 = vadd.f32 %v858_v39, %v6216_v23  ;;  %v1028_v7 = vadd.f32 %v1027_v43, %v6218_v24 }
 0x277   : > { %v1541_v36 = vpop.f32.mrf.mxu2  ;;  %v1710_v35 = vpop.f32.mrf.mxu3 }
 0x278   : > { %v1158_v27 = vmax.f32 %v859_v44, 0.0  ;;  %v1159_v60 = vmax.f32 %v1028_v7, 0.0  ;;  %v1542_v61 = vadd.f32 %v1541_v36, %v6375_v2 }
 0x27a   : > { %v6908_v46 = vadd.f32 %v1710_v35, %v1542_v61  ;;  %v6910_v52 = vpack.c.bf16 %v1158_v27, %v1156_v26  ;;  %v6912_v12 = vpack.c.bf16 %v1159_v60, %v1157_v50 }
 0x27c   : > { %8643 = vst [vmem:[#allocation68_spill] sm:$0xff] %v6910_v52  ;;  %v2188_v39 = vmax.f32 %v6908_v46, 0.0  ;;  %1583 = vmatmul.bf16.gmra.mxu2 %v6910_v52  ;;  %1752 = vmatmul.bf16.gmra.mxu3 %v6912_v12 }
 0x27d   : > { %8644 = vst [vmem:[#allocation69_spill] sm:$0xff] %v6912_v12  ;;  %v861_v34 = vpop.f32.mrf.mxu0  ;;  %v1030_v8 = vpop.f32.mrf.mxu1 }
 0x27e   : > { %v6918_v43 = vpack.c.bf16 %v2188_v39, %v2186_v28  ;;  %v862_v7 = vadd.f32 %v861_v34, %v6216_v23  ;;  %v1031_v26 = vadd.f32 %v1030_v8, %v6218_v24 }
 0x27f   : > { %v1544_v44 = vpop.f32.mrf.mxu2  ;;  %v1713_v36 = vpop.f32.mrf.mxu3 }
 0x280   : > { %8645 = vst [vmem:[#allocation70_spill] sm:$0xff] %v6918_v43  ;;  %v1545_v35 = vadd.f32 %v1544_v44, %v6375_v2  ;;  %1806 = vmatmul.bf16.gmra.mxu0 %v6334_v19  ;;  %1975 = vmatmul.bf16.gmra.mxu1 %v6336_v20  ;;  %v1160_v39 = vmax.f32 %v862_v7, 0.0  ;;  %v1161_v44 = vmax.f32 %v1031_v26, 0.0 }
 0x282   : > { %v6923_v27 = vadd.f32 %v1713_v36, %v1545_v35 }
 0x284   : > { %v2190_v8 = vmax.f32 %v6923_v27, 0.0 }
 0x285   : > { %v863_v50 = vpop.f32.mrf.mxu0  ;;  %v1032_v60 = vpop.f32.mrf.mxu1 }
 0x286   : > { %v864_v61 = vadd.f32 %v863_v50, %v6216_v23  ;;  %v1033_v28 = vadd.f32 %v1032_v60, %v6218_v24 }
 0x287   : > { %v1546_v12 = vpop.f32.mrf.mxu2  ;;  %v1715_v52 = vpop.f32.mrf.mxu3 }
 0x288   : > { %v1162_v43 = vmax.f32 %v864_v61, 0.0  ;;  %v1163_v19 = vmax.f32 %v1033_v28, 0.0  ;;  %v1547_v20 = vadd.f32 %v1546_v12, %v6375_v2 }
 0x28a   : > { %v6930_v36 = vadd.f32 %v1715_v52, %v1547_v20  ;;  %v6932_v35 = vpack.c.bf16 %v1162_v43, %v1160_v39  ;;  %v6934_v34 = vpack.c.bf16 %v1163_v19, %v1161_v44 }
 0x28c   : > { %8646 = vst [vmem:[#allocation71_spill] sm:$0xff] %v6932_v35  ;;  %v2192_v50 = vmax.f32 %v6930_v36, 0.0  ;;  %1588 = vmatmul.bf16.gmra.mxu2 %v6932_v35  ;;  %1757 = vmatmul.bf16.gmra.mxu3 %v6934_v34 }
 0x28d   : > { %8647 = vst [vmem:[#allocation72_spill] sm:$0xff] %v6934_v34  ;;  %v866_v7 = vpop.f32.mrf.mxu0  ;;  %v1035_v26 = vpop.f32.mrf.mxu1 }
 0x28e   : > { %v6940_v60 = vpack.c.bf16 %v2192_v50, %v2190_v8  ;;  %v867_v28 = vadd.f32 %v866_v7, %v6216_v23  ;;  %v1036_v39 = vadd.f32 %v1035_v26, %v6218_v24 }
 0x28f   : > { %v1549_v61 = vpop.f32.mrf.mxu2  ;;  %v1718_v12 = vpop.f32.mrf.mxu3 }
 0x290   : > { %v1550_v52 = vadd.f32 %v1549_v61, %v6375_v2  ;;  %1811 = vmatmul.bf16.gmra.mxu0 %v6353_v42  ;;  %1980 = vmatmul.bf16.gmra.mxu1 %v6355_v45  ;;  %v1164_v50 = vmax.f32 %v867_v28, 0.0  ;;  %v1165_v35 = vmax.f32 %v1036_v39, 0.0 }
 0x292   : > { %v6945_v43 = vadd.f32 %v1718_v12, %v1550_v52 }
 0x294   : > { %v2194_v28 = vmax.f32 %v6945_v43, 0.0 }
 0x295   : > { %v868_v44 = vpop.f32.mrf.mxu0  ;;  %v1037_v19 = vpop.f32.mrf.mxu1 }
 0x296   : > { %v869_v20 = vadd.f32 %v868_v44, %v6216_v23  ;;  %v1038_v8 = vadd.f32 %v1037_v19, %v6218_v24  ;;  %v5870_v23 = vld [vmem:[%s8480_s4] sm:$0x3] }
 0x297   : > { %v1551_v34 = vpop.f32.mrf.mxu2  ;;  %v1720_v61 = vpop.f32.mrf.mxu3  ;;  %v6961_v24 = vperm.slane %v5870_v23, 1 }
 0x298   : > { %v1166_v42 = vmax.f32 %v869_v20, 0.0  ;;  %v1167_v45 = vmax.f32 %v1038_v8, 0.0  ;;  %v1552_v12 = vadd.f32 %v1551_v34, %v6375_v2 }
 0x29a   : > { %v6952_v52 = vadd.f32 %v1720_v61, %v1552_v12  ;;  %v6954_v7 = vpack.c.bf16 %v1166_v42, %v1164_v50  ;;  %v6956_v26 = vpack.c.bf16 %v1167_v45, %v1165_v35 }
 0x29c   : > { %8648 = vst [vmem:[#allocation73_spill] sm:$0xff] %v6956_v26  ;;  %v2196_v39 = vmax.f32 %v6952_v52, 0.0  ;;  %1593 = vmatmul.bf16.gmra.mxu2 %v6954_v7  ;;  %1762 = vmatmul.bf16.gmra.mxu3 %v6956_v26 }
 0x29d   : > { %v1777_v34 = vpop.f32.mrf.mxu0  ;;  %v1946_v44 = vpop.f32.mrf.mxu1 }
 0x29e   : > { %v1778_v35 = vadd.f32 %v1777_v34, %v6961_v24  ;;  %v6971_v19 = vpack.c.bf16 %v2196_v39, %v2194_v28 }
 0x29f   : > { %v1554_v20 = vpop.f32.mrf.mxu2  ;;  %v1723_v8 = vpop.f32.mrf.mxu3 }
 0x2a0   : > { %v1947_v50 = vadd.f32 %v1946_v44, %v1778_v35  ;;  %v1555_v61 = vadd.f32 %v1554_v20, %v6375_v2  ;;  %1816 = vmatmul.bf16.gmra.mxu0 %v6369_v0  ;;  %1985 = vmatmul.bf16.gmra.mxu1 %v6371_v1 }
 0x2a2   : > { %v4176_v42 = vpack.c.bf16 %v1947_v50, %v6381_v11  ;;  %v6977_v45 = vadd.f32 %v1723_v8, %v1555_v61  ;;  %v2107_v35 = vmax.f32 %v1947_v50, 0.0 }
 0x2a4   : > { %4240 = vst [vmem:[%s6979_s22] sm:$0xff] %v4176_v42  ;;  %v2198_v8 = vmax.f32 %v6977_v45, 0.0 }
 0x2a5   : > { %v1779_v12 = vpop.f32.mrf.mxu0  ;;  %v1948_v23 = vpop.f32.mrf.mxu1 }
 0x2a6   : > { %v1780_v28 = vadd.f32 %v1779_v12, %v6961_v24 }
 0x2a7   : > { %v1556_v39 = vpop.f32.mrf.mxu2  ;;  %v1725_v34 = vpop.f32.mrf.mxu3 }
 0x2a8   : > { %v1949_v44 = vadd.f32 %v1948_v23, %v1780_v28  ;;  %v1557_v0 = vadd.f32 %v1556_v39, %v6375_v2 }
 0x2aa   : > { %v2109_v1 = vmax.f32 %v1949_v44, 0.0  ;;  %v4177_v11 = vpack.c.bf16 %v1949_v44, %v6388_v31  ;;  %v6985_v20 = vadd.f32 %v1725_v34, %v1557_v0 }
 0x2ac   : > { %v2235_v61 = vpack.c.bf16 %v2109_v1, %v2107_v35  ;;  %4241 = vst [vmem:[%s6979_s22 + $0x8] sm:$0xff] %v4177_v11  ;;  %v2200_v42 = vmax.f32 %v6985_v20, 0.0  ;;  %2438 = vmatmul.bf16.vlgmr.msrb.gmra.mxu2 %v6399_v41 }
 0x2ad   : > { %v1782_v12 = vpop.f32.mrf.mxu0  ;;  %v1951_v26 = vpop.f32.mrf.mxu1 }
 0x2ae   : > { %v1783_v23 = vadd.f32 %v1782_v12, %v6961_v24  ;;  %2607 = vmatmul.bf16.vlgmr.msrb.gmra.mxu3 %v2235_v61  ;;  %v6992_v50 = vpack.c.bf16 %v2200_v42, %v2198_v8 }
 0x2af   : > { %v1559_v28 = vpop.f32.mrf.mxu2  ;;  %v1728_v31 = vpop.f32.mrf.mxu3 }
 0x2b0   : > { %v1952_v39 = vadd.f32 %v1951_v26, %v1783_v23  ;;  %v1560_v34 = vadd.f32 %v1559_v28, %v6375_v2  ;;  %1821 = vmatmul.bf16.gmra.mxu0 %v6390_v32  ;;  %1990 = vmatmul.bf16.gmra.mxu1 %v6392_v33 }
 0x2b2   : > { %v4178_v44 = vpack.c.bf16 %v1952_v39, %v6404_v49  ;;  %v6998_v41 = vadd.f32 %v1728_v31, %v1560_v34  ;;  %v2111_v42 = vmax.f32 %v1952_v39, 0.0 }
 0x2b4   : > { %4242 = vst [vmem:[%s6979_s22 + $0x10] sm:$0xff] %v4178_v44  ;;  %v2202_v49 = vmax.f32 %v6998_v41, 0.0 }
 0x2b5   : > { %v1784_v0 = vpop.f32.mrf.mxu0  ;;  %v1953_v35 = vpop.f32.mrf.mxu1 }
 0x2b6   : > { %v1785_v1 = vadd.f32 %v1784_v0, %v6961_v24 }
 0x2b7   : > { %v1561_v11 = vpop.f32.mrf.mxu2  ;;  %v1730_v8 = vpop.f32.mrf.mxu3 }
 0x2b8   : > { %v1954_v61 = vadd.f32 %v1953_v35, %v1785_v1  ;;  %v1562_v26 = vadd.f32 %v1561_v11, %v6375_v2 }
 0x2ba   : > { %v2113_v12 = vmax.f32 %v1954_v61, 0.0  ;;  %v4179_v32 = vpack.c.bf16 %v1954_v61, %v6423_v15  ;;  %v7004_v33 = vadd.f32 %v1730_v8, %v1562_v26 }
 0x2bc   : > { %4243 = vst [vmem:[%s6979_s22 + $0x18] sm:$0xff] %v4179_v32  ;;  %v2204_v23 = vmax.f32 %v7004_v33, 0.0  ;;  %2443 = vmatmul.bf16.gmra.mxu2 %v6437_v30  ;;  %v2237_v28 = vpack.c.bf16 %v2113_v12, %v2111_v42 }
 0x2bd   : > { %v1787_v31 = vpop.f32.mrf.mxu0  ;;  %v1956_v34 = vpop.f32.mrf.mxu1 }
 0x2be   : > { %v1788_v44 = vadd.f32 %v1787_v31, %v6961_v24  ;;  %2612 = vmatmul.bf16.gmra.mxu3 %v2237_v28  ;;  %v7011_v39 = vpack.c.bf16 %v2204_v23, %v2202_v49 }
 0x2bf   : > { %v1564_v0 = vpop.f32.mrf.mxu2  ;;  %v1733_v15 = vpop.f32.mrf.mxu3 }
 0x2c0   : > { %v1957_v35 = vadd.f32 %v1956_v34, %v1788_v44  ;;  %v1565_v1 = vadd.f32 %v1564_v0, %v6375_v2  ;;  %1826 = vmatmul.bf16.gmra.mxu0 %v6425_v16  ;;  %1995 = vmatmul.bf16.gmra.mxu1 %v6427_v17 }
 0x2c2   : > { %v4180_v30 = vpack.c.bf16 %v1957_v35, %v6445_v40  ;;  %v7017_v11 = vadd.f32 %v1733_v15, %v1565_v1  ;;  %v2115_v23 = vmax.f32 %v1957_v35, 0.0 }
 0x2c4   : > { %4244 = vst [vmem:[%s6979_s22 + $0x20] sm:$0xff] %v4180_v30  ;;  %v2206_v40 = vmax.f32 %v7017_v11, 0.0 }
 0x2c5   : > { %v1789_v8 = vpop.f32.mrf.mxu0  ;;  %v1958_v61 = vpop.f32.mrf.mxu1 }
 0x2c6   : > { %v1790_v26 = vadd.f32 %v1789_v8, %v6961_v24 }
 0x2c7   : > { %v1566_v42 = vpop.f32.mrf.mxu2  ;;  %v1735_v12 = vpop.f32.mrf.mxu3 }
 0x2c8   : > { %v1959_v32 = vadd.f32 %v1958_v61, %v1790_v26  ;;  %v1567_v49 = vadd.f32 %v1566_v42, %v6375_v2 }
 0x2ca   : > { %v2117_v28 = vmax.f32 %v1959_v32, 0.0  ;;  %v4181_v16 = vpack.c.bf16 %v1959_v32, %v6452_v3  ;;  %v7023_v17 = vadd.f32 %v1735_v12, %v1567_v49 }
 0x2cc   : > { %4245 = vst [vmem:[%s6979_s22 + $0x28] sm:$0xff] %v4181_v16  ;;  %v2208_v31 = vmax.f32 %v7023_v17, 0.0  ;;  %2448 = vmatmul.bf16.gmra.mxu2 %v6463_v14  ;;  %v2239_v34 = vpack.c.bf16 %v2117_v28, %v2115_v23 }
 0x2cd   : > { %v1792_v44 = vpop.f32.mrf.mxu0  ;;  %v1961_v0 = vpop.f32.mrf.mxu1 }
 0x2ce   : > { %v1793_v15 = vadd.f32 %v1792_v44, %v6961_v24  ;;  %2617 = vmatmul.bf16.gmra.mxu3 %v2239_v34  ;;  %v7030_v35 = vpack.c.bf16 %v2208_v31, %v2206_v40 }
 0x2cf   : > { %v1569_v1 = vpop.f32.mrf.mxu2  ;;  %v1738_v3 = vpop.f32.mrf.mxu3 }
 0x2d0   : > { %v1962_v30 = vadd.f32 %v1961_v0, %v1793_v15  ;;  %v1570_v8 = vadd.f32 %v1569_v1, %v6375_v2  ;;  %1831 = vmatmul.bf16.gmra.mxu0 %v6454_v4  ;;  %2000 = vmatmul.bf16.gmra.mxu1 %v6456_v5 }
 0x2d2   : > { %v4182_v14 = vpack.c.bf16 %v1962_v30, %v6468_v25  ;;  %v7036_v61 = vadd.f32 %v1738_v3, %v1570_v8  ;;  %v2119_v16 = vmax.f32 %v1962_v30, 0.0 }
 0x2d4   : > { %4246 = vst [vmem:[%s6979_s22 + $0x30] sm:$0xff] %v4182_v14  ;;  %v2210_v25 = vmax.f32 %v7036_v61, 0.0 }
 0x2d5   : > { %v1794_v26 = vpop.f32.mrf.mxu0  ;;  %v1963_v42 = vpop.f32.mrf.mxu1 }
 0x2d6   : > { %v1795_v12 = vadd.f32 %v1794_v26, %v6961_v24 }
 0x2d7   : > { %v1571_v32 = vpop.f32.mrf.mxu2  ;;  %v1740_v49 = vpop.f32.mrf.mxu3 }
 0x2d8   : > { %v1964_v23 = vadd.f32 %v1963_v42, %v1795_v12  ;;  %v1572_v28 = vadd.f32 %v1571_v32, %v6375_v2 }
 0x2da   : > { %v2121_v40 = vmax.f32 %v1964_v23, 0.0  ;;  %v4183_v4 = vpack.c.bf16 %v1964_v23, %v6475_v56  ;;  %v7042_v5 = vadd.f32 %v1740_v49, %v1572_v28 }
 0x2dc   : > { %4247 = vst [vmem:[%s6979_s22 + $0x38] sm:$0xff] %v4183_v4  ;;  %v2212_v31 = vmax.f32 %v7042_v5, 0.0  ;;  %2453 = vmatmul.bf16.gmra.mxu2 %v6486_v10  ;;  %v2241_v34 = vpack.c.bf16 %v2121_v40, %v2119_v16 }
 0x2dd   : > { %v1797_v44 = vpop.f32.mrf.mxu0  ;;  %v1966_v0 = vpop.f32.mrf.mxu1 }
 0x2de   : > { %v1798_v15 = vadd.f32 %v1797_v44, %v6961_v24  ;;  %2622 = vmatmul.bf16.gmra.mxu3 %v2241_v34  ;;  %v7049_v1 = vpack.c.bf16 %v2212_v31, %v2210_v25  ;;  %v8652_v25 = vld [vmem:[#allocation7_spill] sm:$0xff] }
 0x2df   : > { %v1574_v3 = vpop.f32.mrf.mxu2  ;;  %v1743_v56 = vpop.f32.mrf.mxu3 }
 0x2e0   : > { %8649 = vst [vmem:[#allocation74_spill] sm:$0xff] %v7049_v1  ;;  %v1967_v30 = vadd.f32 %v1966_v0, %v1798_v15  ;;  %v1575_v8 = vadd.f32 %v1574_v3, %v6375_v2  ;;  %1836 = vmatmul.bf16.gmra.mxu0 %v6477_v57  ;;  %2005 = vmatmul.bf16.gmra.mxu1 %v6479_v58 }
 0x2e2   : > { %v4184_v10 = vpack.c.bf16 %v1967_v30, %v6491_v21  ;;  %v7055_v14 = vadd.f32 %v1743_v56, %v1575_v8  ;;  %v2123_v16 = vmax.f32 %v1967_v30, 0.0  ;;  %v8654_v8 = vld [vmem:[#allocation5_spill] sm:$0xff] }
 0x2e4   : > { %8650 = vst [vmem:[#allocation75_spill] sm:$0xff] %v7055_v14  ;;  %v2214_v21 = vmax.f32 %v7055_v14, 0.0 }
 0x2e5   : > { %4248 = vst [vmem:[%s6979_s22 + $0x40] sm:$0xff] %v4184_v10  ;;  %v1799_v26 = vpop.f32.mrf.mxu0  ;;  %v1968_v42 = vpop.f32.mrf.mxu1  ;;  %v8655_v10 = vld [vmem:[#allocation6_spill] sm:$0xff] }
 0x2e6   : > { %v1800_v12 = vadd.f32 %v1799_v26, %v6961_v24  ;;  %v8656_v26 = vld [vmem:[#allocation8_spill] sm:$0xff] }
 0x2e7   : > { %v1576_v32 = vpop.f32.mrf.mxu2  ;;  %v1745_v49 = vpop.f32.mrf.mxu3 }
 0x2e8   : > { %v1969_v23 = vadd.f32 %v1968_v42, %v1800_v12  ;;  %v1577_v28 = vadd.f32 %v1576_v32, %v6375_v2 }
 0x2ea   : > { %v2125_v40 = vmax.f32 %v1969_v23, 0.0  ;;  %v4185_v57 = vpack.c.bf16 %v1969_v23, %v6498_v55  ;;  %v7061_v58 = vadd.f32 %v1745_v49, %v1577_v28 }
 0x2ec   : > { %8651 = vst [vmem:[#allocation76_spill] sm:$0xff] %v7061_v58  ;;  %v2216_v4 = vmax.f32 %v7061_v58, 0.0  ;;  %2458 = vmatmul.bf16.gmra.mxu2 %v8652_v25  ;;  %v2243_v31 = vpack.c.bf16 %v2125_v40, %v2123_v16  ;;  %v8658_v25 = vld [vmem:[#allocation9_spill] sm:$0xff] }
 0x2ed   : > { %4249 = vst [vmem:[%s6979_s22 + $0x48] sm:$0xff] %v4185_v57  ;;  %v1802_v34 = vpop.f32.mrf.mxu0  ;;  %v1971_v44 = vpop.f32.mrf.mxu1 }
 0x2ee   : > { %v1803_v0 = vadd.f32 %v1802_v34, %v6961_v24  ;;  %2627 = vmatmul.bf16.gmra.mxu3 %v2243_v31  ;;  %v7068_v15 = vpack.c.bf16 %v2216_v4, %v2214_v21 }
 0x2ef   : > { %v1579_v3 = vpop.f32.mrf.mxu2  ;;  %v1748_v55 = vpop.f32.mrf.mxu3 }
 0x2f0   : > { %8653 = vst [vmem:[#allocation7_spill] sm:$0xff] %v7068_v15  ;;  %v1972_v56 = vadd.f32 %v1971_v44, %v1803_v0  ;;  %v1580_v30 = vadd.f32 %v1579_v3, %v6375_v2  ;;  %1841 = vmatmul.bf16.gmra.mxu0 %v8654_v8  ;;  %2010 = vmatmul.bf16.gmra.mxu1 %v8655_v10  ;;  %v8660_v3 = vld [vmem:[#allocation12_spill] sm:$0xff] }
 0x2f2   : > { %v4186_v42 = vpack.c.bf16 %v1972_v56, %v8656_v26  ;;  %v7074_v12 = vadd.f32 %v1748_v55, %v1580_v30  ;;  %v2127_v21 = vmax.f32 %v1972_v56, 0.0 }
 0x2f4   : > { %8657 = vst [vmem:[#allocation5_spill] sm:$0xff] %v7074_v12  ;;  %v2218_v44 = vmax.f32 %v7074_v12, 0.0 }
 0x2f5   : > { %4250 = vst [vmem:[%s6979_s22 + $0x50] sm:$0xff] %v4186_v42  ;;  %v1804_v32 = vpop.f32.mrf.mxu0  ;;  %v1973_v49 = vpop.f32.mrf.mxu1 }
 0x2f6   : > { %v1805_v23 = vadd.f32 %v1804_v32, %v6961_v24 }
 0x2f7   : > { %v1581_v28 = vpop.f32.mrf.mxu2  ;;  %v1750_v16 = vpop.f32.mrf.mxu3 }
 0x2f8   : > { %v1974_v40 = vadd.f32 %v1973_v49, %v1805_v23  ;;  %v1582_v57 = vadd.f32 %v1581_v28, %v6375_v2  ;;  %v8662_v23 = vld [vmem:[#allocation10_spill] sm:$0xff]  ;;  %v8663_v28 = vld [vmem:[#allocation11_spill] sm:$0xff] }
 0x2fa   : > { %v2129_v4 = vmax.f32 %v1974_v40, 0.0  ;;  %v4187_v31 = vpack.c.bf16 %v1974_v40, %v8658_v25  ;;  %v7080_v34 = vadd.f32 %v1750_v16, %v1582_v57  ;;  %v8664_v16 = vld [vmem:[#allocation13_spill] sm:$0xff] }
 0x2fc   : > { %8659 = vst [vmem:[#allocation6_spill] sm:$0xff] %v7080_v34  ;;  %v2220_v0 = vmax.f32 %v7080_v34, 0.0  ;;  %2463 = vmatmul.bf16.gmra.mxu2 %v8660_v3  ;;  %v2245_v55 = vpack.c.bf16 %v2129_v4, %v2127_v21 }
 0x2fd   : > { %4251 = vst [vmem:[%s6979_s22 + $0x58] sm:$0xff] %v4187_v31  ;;  %v1807_v30 = vpop.f32.mrf.mxu0  ;;  %v1976_v8 = vpop.f32.mrf.mxu1 }
 0x2fe   : > { %v1808_v10 = vadd.f32 %v1807_v30, %v6961_v24  ;;  %2632 = vmatmul.bf16.gmra.mxu3 %v2245_v55  ;;  %v7087_v56 = vpack.c.bf16 %v2220_v0, %v2218_v44 }
 0x2ff   : > { %v1584_v26 = vpop.f32.mrf.mxu2  ;;  %v1753_v42 = vpop.f32.mrf.mxu3 }
 0x300   : > { %8661 = vst [vmem:[#allocation8_spill] sm:$0xff] %v7087_v56  ;;  %v1977_v32 = vadd.f32 %v1976_v8, %v1808_v10  ;;  %v1585_v49 = vadd.f32 %v1584_v26, %v6375_v2  ;;  %1846 = vmatmul.bf16.gmra.mxu0 %v8662_v23  ;;  %2015 = vmatmul.bf16.gmra.mxu1 %v8663_v28  ;;  %v8666_v8 = vld [vmem:[#allocation14_spill] sm:$0xff] }
 0x302   : > { %v4188_v40 = vpack.c.bf16 %v1977_v32, %v8664_v16  ;;  %v7093_v57 = vadd.f32 %v1753_v42, %v1585_v49  ;;  %v2131_v55 = vmax.f32 %v1977_v32, 0.0  ;;  %v8668_v49 = vld [vmem:[#allocation17_spill] sm:$0xff] }
 0x304   : > { %8665 = vst [vmem:[#allocation9_spill] sm:$0xff] %v7093_v57  ;;  %v2222_v23 = vmax.f32 %v7093_v57, 0.0 }
 0x305   : > { %4252 = vst [vmem:[%s6979_s22 + $0x60] sm:$0xff] %v4188_v40  ;;  %v1809_v21 = vpop.f32.mrf.mxu0  ;;  %v1978_v4 = vpop.f32.mrf.mxu1 }
 0x306   : > { %v1810_v25 = vadd.f32 %v1809_v21, %v6961_v24 }
 0x307   : > { %v1586_v31 = vpop.f32.mrf.mxu2  ;;  %v1755_v44 = vpop.f32.mrf.mxu3 }
 0x308   : > { %v1979_v0 = vadd.f32 %v1978_v4, %v1810_v25  ;;  %v1587_v3 = vadd.f32 %v1586_v31, %v6375_v2 }
 0x30a   : > { %v2133_v30 = vmax.f32 %v1979_v0, 0.0  ;;  %v4189_v10 = vpack.c.bf16 %v1979_v0, %v8666_v8  ;;  %v7099_v26 = vadd.f32 %v1755_v44, %v1587_v3  ;;  %v8670_v0 = vld [vmem:[#allocation15_spill] sm:$0xff]  ;;  %v8671_v3 = vld [vmem:[#allocation16_spill] sm:$0xff]  ;;  %v8672_v8 = vld [vmem:[#allocation18_spill] sm:$0xff] }
 0x30c   : > { %8667 = vst [vmem:[#allocation12_spill] sm:$0xff] %v7099_v26  ;;  %v2224_v42 = vmax.f32 %v7099_v26, 0.0  ;;  %2468 = vmatmul.bf16.gmra.mxu2 %v8668_v49  ;;  %v2247_v28 = vpack.c.bf16 %v2133_v30, %v2131_v55 }
 0x30d   : > { %4253 = vst [vmem:[%s6979_s22 + $0x68] sm:$0xff] %v4189_v10  ;;  %v1812_v16 = vpop.f32.mrf.mxu0  ;;  %v1981_v40 = vpop.f32.mrf.mxu1 }
 0x30e   : > { %v1813_v21 = vadd.f32 %v1812_v16, %v6961_v24  ;;  %2637 = vmatmul.bf16.gmra.mxu3 %v2247_v28  ;;  %v7106_v32 = vpack.c.bf16 %v2224_v42, %v2222_v23 }
 0x30f   : > { %v1589_v4 = vpop.f32.mrf.mxu2  ;;  %v1758_v25 = vpop.f32.mrf.mxu3 }
 0x310   : > { %8669 = vst [vmem:[#allocation10_spill] sm:$0xff] %v7106_v32  ;;  %v1982_v31 = vadd.f32 %v1981_v40, %v1813_v21  ;;  %v1590_v44 = vadd.f32 %v1589_v4, %v6375_v2  ;;  %1851 = vmatmul.bf16.gmra.mxu0 %v8670_v0  ;;  %2020 = vmatmul.bf16.gmra.mxu1 %v8671_v3  ;;  %v8674_v0 = vld [vmem:[#allocation19_spill] sm:$0xff] }
 0x312   : > { %v4190_v10 = vpack.c.bf16 %v1982_v31, %v8672_v8  ;;  %v7112_v55 = vadd.f32 %v1758_v25, %v1590_v44  ;;  %v2135_v21 = vmax.f32 %v1982_v31, 0.0  ;;  %v8676_v44 = vld [vmem:[#allocation22_spill] sm:$0xff] }
 0x314   : > { %8673 = vst [vmem:[#allocation11_spill] sm:$0xff] %v7112_v55  ;;  %v2226_v8 = vmax.f32 %v7112_v55, 0.0 }
 0x315   : > { %4254 = vst [vmem:[%s6979_s22 + $0x70] sm:$0xff] %v4190_v10  ;;  %v1814_v30 = vpop.f32.mrf.mxu0  ;;  %v1983_v49 = vpop.f32.mrf.mxu1 }
 0x316   : > { %v1815_v23 = vadd.f32 %v1814_v30, %v6961_v24 }
 0x317   : > { %v1591_v42 = vpop.f32.mrf.mxu2  ;;  %v1760_v28 = vpop.f32.mrf.mxu3 }
 0x318   : > { %v1984_v16 = vadd.f32 %v1983_v49, %v1815_v23  ;;  %v1592_v40 = vadd.f32 %v1591_v42, %v6375_v2 }
 0x31a   : > { %v2137_v4 = vmax.f32 %v1984_v16, 0.0  ;;  %v4191_v32 = vpack.c.bf16 %v1984_v16, %v8674_v0  ;;  %v7118_v3 = vadd.f32 %v1760_v28, %v1592_v40  ;;  %v8678_v40 = vld [vmem:[#allocation20_spill] sm:$0xff]  ;;  %v8680_v0 = vld [vmem:[#allocation23_spill] sm:$0xff] }
 0x31c   : > { %8675 = vst [vmem:[#allocation13_spill] sm:$0xff] %v7118_v3  ;;  %v2228_v25 = vmax.f32 %v7118_v3, 0.0  ;;  %2473 = vmatmul.bf16.gmra.mxu2 %v8676_v44  ;;  %v2249_v10 = vpack.c.bf16 %v2137_v4, %v2135_v21 }
 0x31d   : > { %4255 = vst [vmem:[%s6979_s22 + $0x78] sm:$0xff] %v4191_v32  ;;  %v1817_v30 = vpop.f32.mrf.mxu0  ;;  %v1986_v26 = vpop.f32.mrf.mxu1  ;;  %v8679_v32 = vld [vmem:[#allocation21_spill] sm:$0xff] }
 0x31e   : > { %v1818_v49 = vadd.f32 %v1817_v30, %v6961_v24  ;;  %2642 = vmatmul.bf16.gmra.mxu3 %v2249_v10  ;;  %v7125_v31 = vpack.c.bf16 %v2228_v25, %v2226_v8 }
 0x31f   : > { %v1594_v23 = vpop.f32.mrf.mxu2  ;;  %v1763_v42 = vpop.f32.mrf.mxu3 }
 0x320   : > { %8677 = vst [vmem:[#allocation14_spill] sm:$0xff] %v7125_v31  ;;  %v1987_v28 = vadd.f32 %v1986_v26, %v1818_v49  ;;  %v1595_v16 = vadd.f32 %v1594_v23, %v6375_v2  ;;  %1856 = vmatmul.bf16.gmra.mxu0 %v8678_v40  ;;  %2025 = vmatmul.bf16.gmra.mxu1 %v8679_v32  ;;  %v8682_v40 = vld [vmem:[#allocation24_spill] sm:$0xff] }
 0x322   : > { %v4192_v44 = vpack.c.bf16 %v1987_v28, %v8680_v0  ;;  %v7131_v21 = vadd.f32 %v1763_v42, %v1595_v16  ;;  %v2139_v23 = vmax.f32 %v1987_v28, 0.0  ;;  %v8684_v16 = vld [vmem:[#allocation27_spill] sm:$0xff] }
 0x324   : > { %8681 = vst [vmem:[#allocation17_spill] sm:$0xff] %v7131_v21  ;;  %v2230_v0 = vmax.f32 %v7131_v21, 0.0 }
 0x325   : > { %4256 = vst [vmem:[%s6979_s22 + $0x80] sm:$0xff] %v4192_v44  ;;  %v1819_v4 = vpop.f32.mrf.mxu0  ;;  %v1988_v30 = vpop.f32.mrf.mxu1 }
 0x326   : > { %v1820_v8 = vadd.f32 %v1819_v4, %v6961_v24 }
 0x327   : > { %v1596_v25 = vpop.f32.mrf.mxu2  ;;  %v1765_v49 = vpop.f32.mrf.mxu3 }
 0x328   : > { %v1989_v10 = vadd.f32 %v1988_v30, %v1820_v8  ;;  %v1597_v26 = vadd.f32 %v1596_v25, %v6375_v2  ;;  %v7146_v2 = vld [vmem:[%s8482_s6] ss:$0 sm:$0xff] }
 0x32a   : > { %v2141_v31 = vmax.f32 %v1989_v10, 0.0  ;;  %v4193_v3 = vpack.c.bf16 %v1989_v10, %v8682_v40  ;;  %v7137_v32 = vadd.f32 %v1765_v49, %v1597_v26  ;;  %v8686_v26 = vld [vmem:[#allocation25_spill] sm:$0xff]  ;;  %v8687_v49 = vld [vmem:[#allocation26_spill] sm:$0xff] }
 0x32c   : > { %8683 = vst [vmem:[#allocation15_spill] sm:$0xff] %v7137_v32  ;;  %v2232_v42 = vmax.f32 %v7137_v32, 0.0  ;;  %2478 = vmatmul.bf16.gmra.mxu2 %v8684_v16  ;;  %v2251_v44 = vpack.c.bf16 %v2141_v31, %v2139_v23 }
 0x32d   : > { %4257 = vst [vmem:[%s6979_s22 + $0x88] sm:$0xff] %v4193_v3  ;;  %v1822_v28 = vpop.f32.mrf.mxu0  ;;  %v1991_v4 = vpop.f32.mrf.mxu1 }
 0x32e   : > { %v1823_v30 = vadd.f32 %v1822_v28, %v6961_v24  ;;  %2647 = vmatmul.bf16.gmra.mxu3 %v2251_v44  ;;  %v7149_v8 = vpack.c.bf16 %v2232_v42, %v2230_v0 }
 0x32f   : > { %v2439_v25 = vpop.f32.mrf.mxu2 }
 0x330   : > { %8685 = vst [vmem:[#allocation16_spill] sm:$0xff] %v7149_v8  ;;  %v1992_v3 = vadd.f32 %v1991_v4, %v1823_v30  ;;  %v2440_v10 = vadd.f32 %v7146_v2, %v2439_v25  ;;  %1861 = vmatmul.bf16.gmra.mxu0 %v8686_v26  ;;  %2030 = vmatmul.bf16.gmra.mxu1 %v8687_v49 }
 0x331   : > { %v2608_v31 = vpop.f32.mrf.mxu3 }
 0x332   : > { %v4194_v23 = vpack.c.bf16 %v1992_v3, %v6624_v59  ;;  %v7155_v40 = vadd.f32 %v2608_v31, %v2440_v10  ;;  %v2143_v25 = vmax.f32 %v1992_v3, 0.0 }
 0x334   : > { %4258 = vst [vmem:[%s6979_s22 + $0x90] sm:$0xff] %v4194_v23  ;;  %2768 = vmax.xlane.f32.xlu0 %v7155_v40 }
 0x335   : > { %v1824_v16 = vpop.f32.mrf.mxu0  ;;  %v1993_v0 = vpop.f32.mrf.mxu1 }
 0x336   : > { %v1825_v42 = vadd.f32 %v1824_v16, %v6961_v24 }
 0x337   : > { %v2441_v44 = vpop.f32.mrf.mxu2 }
 0x338   : > { %v1994_v28 = vadd.f32 %v1993_v0, %v1825_v42  ;;  %v2442_v4 = vadd.f32 %v7146_v2, %v2441_v44  ;;  %v8688_v42 = vld [vmem:[#allocation28_spill] sm:$0xff] }
 0x339   : > { %v2610_v30 = vpop.f32.mrf.mxu3 }
 0x33a   : > { %v2145_v26 = vmax.f32 %v1994_v28, 0.0  ;;  %v4195_v49 = vpack.c.bf16 %v1994_v28, %v6643_v54  ;;  %v7162_v8 = vadd.f32 %v2610_v30, %v2442_v4  ;;  %v8689_v54 = vld [vmem:[#allocation29_spill] sm:$0xff]  ;;  %v8690_v28 = vld [vmem:[#allocation30_spill] sm:$0xff] }
 0x33c   : > { %4259 = vst [vmem:[%s6979_s22 + $0x98] sm:$0xff] %v4195_v49  ;;  %2483 = vmatmul.bf16.gmra.mxu2 %v6657_v53  ;;  %2770 = vmax.xlane.f32.xlu0 %v7162_v8  ;;  %v2253_v59 = vpack.c.bf16 %v2145_v26, %v2143_v25 }
 0x33d   : > { %v1827_v10 = vpop.f32.mrf.mxu0  ;;  %v1996_v31 = vpop.f32.mrf.mxu1 }
 0x33e   : > { %v1828_v23 = vadd.f32 %v1827_v10, %v6961_v24  ;;  %2652 = vmatmul.bf16.gmra.mxu3 %v2253_v59 }
 0x33f   : > { %v2444_v16 = vpop.f32.mrf.mxu2 }
 0x340   : > { %v1997_v0 = vadd.f32 %v1996_v31, %v1828_v23  ;;  %v2445_v3 = vadd.f32 %v7146_v2, %v2444_v16  ;;  %1866 = vmatmul.bf16.gmra.mxu0 %v8688_v42  ;;  %2035 = vmatmul.bf16.gmra.mxu1 %v8689_v54  ;;  %v8691_v42 = vld [vmem:[#allocation31_spill] sm:$0xff] }
 0x341   : > { %v2613_v44 = vpop.f32.mrf.mxu3 }
 0x342   : > { %v4196_v53 = vpack.c.bf16 %v1997_v0, %v8690_v28  ;;  %v7172_v4 = vadd.f32 %v2613_v44, %v2445_v3  ;;  %v2147_v23 = vmax.f32 %v1997_v0, 0.0  ;;  %v8692_v3 = vld [vmem:[#allocation34_spill] sm:$0xff] }
 0x344   : > { %4260 = vst [vmem:[%s6979_s22 + $0xa0] sm:$0xff] %v4196_v53  ;;  %2772 = vmax.xlane.f32.xlu1 %v7172_v4 }
 0x345   : > { %v1829_v30 = vpop.f32.mrf.mxu0  ;;  %v1998_v25 = vpop.f32.mrf.mxu1 }
 0x346   : > { %v1830_v26 = vadd.f32 %v1829_v30, %v6961_v24 }
 0x347   : > { %v2446_v49 = vpop.f32.mrf.mxu2 }
 0x348   : > { %v1999_v59 = vadd.f32 %v1998_v25, %v1830_v26  ;;  %v2447_v10 = vadd.f32 %v7146_v2, %v2446_v49  ;;  %v8693_v49 = vld [vmem:[#allocation32_spill] sm:$0xff] }
 0x349   : > { %v2615_v31 = vpop.f32.mrf.mxu3 }
 0x34a   : > { %v2149_v16 = vmax.f32 %v1999_v59, 0.0  ;;  %v4197_v54 = vpack.c.bf16 %v1999_v59, %v8691_v42  ;;  %v7179_v32 = vadd.f32 %v2615_v31, %v2447_v10  ;;  %v8694_v59 = vld [vmem:[#allocation33_spill] sm:$0xff]  ;;  %v8695_v31 = vld [vmem:[#allocation35_spill] sm:$0xff] }
 0x34c   : > { %4261 = vst [vmem:[%s6979_s22 + $0xa8] sm:$0xff] %v4197_v54  ;;  %2488 = vmatmul.bf16.gmra.mxu2 %v8692_v3  ;;  %2774 = vmax.xlane.f32.xlu1 %v7179_v32  ;;  %v2255_v44 = vpack.c.bf16 %v2149_v16, %v2147_v23 }
 0x34d   : > { %v1832_v28 = vpop.f32.mrf.mxu0  ;;  %v2001_v53 = vpop.f32.mrf.mxu1 }
 0x34e   : > { %v1833_v30 = vadd.f32 %v1832_v28, %v6961_v24  ;;  %2657 = vmatmul.bf16.gmra.mxu3 %v2255_v44 }
 0x34f   : > { %v2449_v25 = vpop.f32.mrf.mxu2 }
 0x350   : > { %v2002_v26 = vadd.f32 %v2001_v53, %v1833_v30  ;;  %v2450_v0 = vadd.f32 %v7146_v2, %v2449_v25  ;;  %1871 = vmatmul.bf16.gmra.mxu0 %v8693_v49  ;;  %2040 = vmatmul.bf16.gmra.mxu1 %v8694_v59  ;;  %v8696_v59 = vld [vmem:[#allocation36_spill] sm:$0xff] }
 0x351   : > { %v2618_v10 = vpop.f32.mrf.mxu3 }
 0x352   : > { %v4198_v42 = vpack.c.bf16 %v2002_v26, %v8695_v31  ;;  %v7189_v54 = vadd.f32 %v2618_v10, %v2450_v0  ;;  %v2151_v25 = vmax.f32 %v2002_v26, 0.0  ;;  %v8697_v0 = vld [vmem:[#allocation39_spill] sm:$0xff] }
 0x354   : > { %4262 = vst [vmem:[%s6979_s22 + $0xb0] sm:$0xff] %v4198_v42  ;;  %2776 = vmax.xlane.f32.xlu2 %v7189_v54 }
 0x355   : > { %v1834_v23 = vpop.f32.mrf.mxu0  ;;  %v2003_v16 = vpop.f32.mrf.mxu1 }
 0x356   : > { %v1835_v3 = vadd.f32 %v1834_v23, %v6961_v24 }
 0x357   : > { %v2451_v44 = vpop.f32.mrf.mxu2 }
 0x358   : > { %v2004_v28 = vadd.f32 %v2003_v16, %v1835_v3  ;;  %v2452_v53 = vadd.f32 %v7146_v2, %v2451_v44  ;;  %v8698_v44 = vld [vmem:[#allocation37_spill] sm:$0xff] }
 0x359   : > { %v2620_v30 = vpop.f32.mrf.mxu3 }
 0x35a   : > { %v2153_v49 = vmax.f32 %v2004_v28, 0.0  ;;  %v4199_v21 = vpack.c.bf16 %v2004_v28, %v8696_v59  ;;  %v7196_v55 = vadd.f32 %v2620_v30, %v2452_v53  ;;  %v8699_v28 = vld [vmem:[#allocation38_spill] sm:$0xff]  ;;  %v8700_v53 = vld [vmem:[#allocation40_spill] sm:$0xff] }
 0x35c   : > { %4263 = vst [vmem:[%s6979_s22 + $0xb8] sm:$0xff] %v4199_v21  ;;  %2493 = vmatmul.bf16.gmra.mxu2 %v8697_v0  ;;  %2778 = vmax.xlane.f32.xlu2 %v7196_v55  ;;  %v2257_v10 = vpack.c.bf16 %v2153_v49, %v2151_v25 }
 0x35d   : > { %v1837_v31 = vpop.f32.mrf.mxu0  ;;  %v2006_v42 = vpop.f32.mrf.mxu1 }
 0x35e   : > { %v1838_v23 = vadd.f32 %v1837_v31, %v6961_v24  ;;  %2662 = vmatmul.bf16.gmra.mxu3 %v2257_v10 }
 0x35f   : > { %v2454_v16 = vpop.f32.mrf.mxu2 }
 0x360   : > { %v2007_v3 = vadd.f32 %v2006_v42, %v1838_v23  ;;  %v2455_v26 = vadd.f32 %v7146_v2, %v2454_v16  ;;  %1876 = vmatmul.bf16.gmra.mxu0 %v8698_v44  ;;  %2045 = vmatmul.bf16.gmra.mxu1 %v8699_v28  ;;  %v8701_v28 = vld [vmem:[#allocation41_spill] sm:$0xff] }
 0x361   : > { %v2623_v21 = vpop.f32.mrf.mxu3 }
 0x362   : > { %v4200_v30 = vpack.c.bf16 %v2007_v3, %v8700_v53  ;;  %v7206_v59 = vadd.f32 %v2623_v21, %v2455_v26  ;;  %v2155_v16 = vmax.f32 %v2007_v3, 0.0  ;;  %v8702_v26 = vld [vmem:[#allocation44_spill] sm:$0xff] }
 0x364   : > { %4264 = vst [vmem:[%s6979_s22 + $0xc0] sm:$0xff] %v4200_v30  ;;  %2780 = vmax.xlane.f32.xlu0 %v7206_v59 }
 0x365   : > { %v1839_v25 = vpop.f32.mrf.mxu0  ;;  %v2008_v49 = vpop.f32.mrf.mxu1 }
 0x366   : > { %v1840_v0 = vadd.f32 %v1839_v25, %v6961_v24 }
 0x367   : > { %v2456_v10 = vpop.f32.mrf.mxu2 }
 0x368   : > { %v2009_v31 = vadd.f32 %v2008_v49, %v1840_v0  ;;  %v2457_v42 = vadd.f32 %v7146_v2, %v2456_v10  ;;  %v8703_v10 = vld [vmem:[#allocation42_spill] sm:$0xff] }
 0x369   : > { %v2625_v23 = vpop.f32.mrf.mxu3 }
 0x36a   : > { %v2157_v44 = vmax.f32 %v2009_v31, 0.0  ;;  %v4201_v57 = vpack.c.bf16 %v2009_v31, %v8701_v28  ;;  %v7213_v56 = vadd.f32 %v2625_v23, %v2457_v42  ;;  %v8704_v31 = vld [vmem:[#allocation43_spill] sm:$0xff]  ;;  %v8705_v42 = vld [vmem:[#allocation45_spill] sm:$0xff] }
 0x36c   : > { %4265 = vst [vmem:[%s6979_s22 + $0xc8] sm:$0xff] %v4201_v57  ;;  %2498 = vmatmul.bf16.gmra.mxu2 %v8702_v26  ;;  %2782 = vmax.xlane.f32.xlu1 %v7213_v56  ;;  %v2259_v21 = vpack.c.bf16 %v2157_v44, %v2155_v16 }
 0x36d   : > { %v1842_v53 = vpop.f32.mrf.mxu0  ;;  %v2011_v30 = vpop.f32.mrf.mxu1 }
 0x36e   : > { %v1843_v25 = vadd.f32 %v1842_v53, %v6961_v24  ;;  %2667 = vmatmul.bf16.gmra.mxu3 %v2259_v21 }
 0x36f   : > { %v2459_v49 = vpop.f32.mrf.mxu2 }
 0x370   : > { %v2012_v0 = vadd.f32 %v2011_v30, %v1843_v25  ;;  %v2460_v3 = vadd.f32 %v7146_v2, %v2459_v49  ;;  %1881 = vmatmul.bf16.gmra.mxu0 %v8703_v10  ;;  %2050 = vmatmul.bf16.gmra.mxu1 %v8704_v31  ;;  %v8706_v31 = vld [vmem:[#allocation46_spill] sm:$0xff] }
 0x371   : > { %v2628_v57 = vpop.f32.mrf.mxu3 }
 0x372   : > { %v4202_v23 = vpack.c.bf16 %v2012_v0, %v8705_v42  ;;  %v7223_v28 = vadd.f32 %v2628_v57, %v2460_v3  ;;  %v2159_v49 = vmax.f32 %v2012_v0, 0.0  ;;  %v8707_v3 = vld [vmem:[#allocation49_spill] sm:$0xff] }
 0x374   : > { %4266 = vst [vmem:[%s6979_s22 + $0xd0] sm:$0xff] %v4202_v23  ;;  %2784 = vmax.xlane.f32.xlu2 %v7223_v28 }
 0x375   : > { %v1844_v16 = vpop.f32.mrf.mxu0  ;;  %v2013_v44 = vpop.f32.mrf.mxu1 }
 0x376   : > { %v1845_v26 = vadd.f32 %v1844_v16, %v6961_v24 }
 0x377   : > { %v2461_v21 = vpop.f32.mrf.mxu2 }
 0x378   : > { %v2014_v53 = vadd.f32 %v2013_v44, %v1845_v26  ;;  %v2462_v30 = vadd.f32 %v7146_v2, %v2461_v21  ;;  %v8708_v21 = vld [vmem:[#allocation47_spill] sm:$0xff] }
 0x379   : > { %v2630_v25 = vpop.f32.mrf.mxu3 }
 0x37a   : > { %v2161_v10 = vmax.f32 %v2014_v53, 0.0  ;;  %v4203_v34 = vpack.c.bf16 %v2014_v53, %v8706_v31  ;;  %v7230_v12 = vadd.f32 %v2630_v25, %v2462_v30  ;;  %v8709_v53 = vld [vmem:[#allocation48_spill] sm:$0xff] }
 0x37c   : > { %4267 = vst [vmem:[%s6979_s22 + $0xd8] sm:$0xff] %v4203_v34  ;;  %2503 = vmatmul.bf16.gmra.mxu2 %v8707_v3  ;;  %2786 = vmax.xlane.f32.xlu0 %v7230_v12  ;;  %v2261_v57 = vpack.c.bf16 %v2161_v10, %v2159_v49 }
 0x37d   : > { %v1847_v42 = vpop.f32.mrf.mxu0  ;;  %v2016_v23 = vpop.f32.mrf.mxu1 }
 0x37e   : > { %v1848_v16 = vadd.f32 %v1847_v42, %v6961_v24  ;;  %2672 = vmatmul.bf16.gmra.mxu3 %v2261_v57 }
 0x37f   : > { %v2464_v44 = vpop.f32.mrf.mxu2 }
 0x380   : > { %v2017_v26 = vadd.f32 %v2016_v23, %v1848_v16  ;;  %v2465_v0 = vadd.f32 %v7146_v2, %v2464_v44  ;;  %1886 = vmatmul.bf16.gmra.mxu0 %v8708_v21  ;;  %2055 = vmatmul.bf16.gmra.mxu1 %v8709_v53 }
 0x381   : > { %v2633_v34 = vpop.f32.mrf.mxu3 }
 0x382   : > { %v4204_v30 = vpack.c.bf16 %v2017_v26, %v6763_v9  ;;  %v7240_v25 = vadd.f32 %v2633_v34, %v2465_v0  ;;  %v2163_v16 = vmax.f32 %v2017_v26, 0.0  ;;  %v8710_v9 = vld [vmem:[#allocation52_spill] sm:$0xff] }
 0x384   : > { %4268 = vst [vmem:[%s6979_s22 + $0xe0] sm:$0xff] %v4204_v30  ;;  %2788 = vmax.xlane.f32.xlu1 %v7240_v25 }
 0x385   : > { %v1849_v49 = vpop.f32.mrf.mxu0  ;;  %v2018_v10 = vpop.f32.mrf.mxu1 }
 0x386   : > { %v1850_v31 = vadd.f32 %v1849_v49, %v6961_v24 }
 0x387   : > { %v2466_v3 = vpop.f32.mrf.mxu2 }
 0x388   : > { %v2019_v57 = vadd.f32 %v2018_v10, %v1850_v31  ;;  %v2467_v42 = vadd.f32 %v7146_v2, %v2466_v3  ;;  %v8711_v3 = vld [vmem:[#allocation50_spill] sm:$0xff] }
 0x389   : > { %v2635_v23 = vpop.f32.mrf.mxu3 }
 0x38a   : > { %v2165_v44 = vmax.f32 %v2019_v57, 0.0  ;;  %v4205_v21 = vpack.c.bf16 %v2019_v57, %v6770_v6  ;;  %v7247_v53 = vadd.f32 %v2635_v23, %v2467_v42  ;;  %v8712_v6 = vld [vmem:[#allocation51_spill] sm:$0xff] }
 0x38c   : > { %4269 = vst [vmem:[%s6979_s22 + $0xe8] sm:$0xff] %v4205_v21  ;;  %2508 = vmatmul.bf16.gmra.mxu2 %v8710_v9  ;;  %2790 = vmax.xlane.f32.xlu2 %v7247_v53  ;;  %v2263_v0 = vpack.c.bf16 %v2165_v44, %v2163_v16 }
 0x38d   : > { %v1852_v34 = vpop.f32.mrf.mxu0  ;;  %v2021_v30 = vpop.f32.mrf.mxu1 }
 0x38e   : > { %v1853_v49 = vadd.f32 %v1852_v34, %v6961_v24  ;;  %2677 = vmatmul.bf16.gmra.mxu3 %v2263_v0 }
 0x38f   : > { %v2469_v10 = vpop.f32.mrf.mxu2 }
 0x390   : > { %v2022_v31 = vadd.f32 %v2021_v30, %v1853_v49  ;;  %v2470_v26 = vadd.f32 %v7146_v2, %v2469_v10  ;;  %1891 = vmatmul.bf16.gmra.mxu0 %v8711_v3  ;;  %2060 = vmatmul.bf16.gmra.mxu1 %v8712_v6 }
 0x391   : > { %v2638_v57 = vpop.f32.mrf.mxu3 }
 0x392   : > { %v4206_v42 = vpack.c.bf16 %v2022_v31, %v6785_v62  ;;  %v7257_v23 = vadd.f32 %v2638_v57, %v2470_v26  ;;  %v2167_v49 = vmax.f32 %v2022_v31, 0.0  ;;  %v8713_v62 = vld [vmem:[#allocation55_spill] sm:$0xff] }
 0x394   : > { %4270 = vst [vmem:[%s6979_s22 + $0xf0] sm:$0xff] %v4206_v42  ;;  %2792 = vmax.xlane.f32.xlu0 %v7257_v23 }
 0x395   : > { %v1854_v16 = vpop.f32.mrf.mxu0  ;;  %v2023_v44 = vpop.f32.mrf.mxu1 }
 0x396   : > { %v1855_v21 = vadd.f32 %v1854_v16, %v6961_v24 }
 0x397   : > { %v2471_v9 = vpop.f32.mrf.mxu2 }
 0x398   : > { %v2024_v0 = vadd.f32 %v2023_v44, %v1855_v21  ;;  %v2472_v34 = vadd.f32 %v7146_v2, %v2471_v9  ;;  %v8714_v9 = vld [vmem:[#allocation53_spill] sm:$0xff] }
 0x399   : > { %v2640_v30 = vpop.f32.mrf.mxu3 }
 0x39a   : > { %v2169_v10 = vmax.f32 %v2024_v0, 0.0  ;;  %v4207_v3 = vpack.c.bf16 %v2024_v0, %v6792_v38  ;;  %v7264_v6 = vadd.f32 %v2640_v30, %v2472_v34  ;;  %v8715_v38 = vld [vmem:[#allocation54_spill] sm:$0xff] }
 0x39c   : > { %4271 = vst [vmem:[%s6979_s22 + $0xf8] sm:$0xff] %v4207_v3  ;;  %2513 = vmatmul.bf16.gmra.mxu2 %v8713_v62  ;;  %2794 = vmax.xlane.f32.xlu1 %v7264_v6  ;;  %v2265_v26 = vpack.c.bf16 %v2169_v10, %v2167_v49 }
 0x39d   : > { %v1857_v57 = vpop.f32.mrf.mxu0  ;;  %v2026_v42 = vpop.f32.mrf.mxu1 }
 0x39e   : > { %v1858_v16 = vadd.f32 %v1857_v57, %v6961_v24  ;;  %2682 = vmatmul.bf16.gmra.mxu3 %v2265_v26 }
 0x39f   : > { %v2474_v44 = vpop.f32.mrf.mxu2 }
 0x3a0   : > { %v2027_v21 = vadd.f32 %v2026_v42, %v1858_v16  ;;  %v2475_v31 = vadd.f32 %v7146_v2, %v2474_v44  ;;  %1896 = vmatmul.bf16.gmra.mxu0 %v8714_v9  ;;  %2065 = vmatmul.bf16.gmra.mxu1 %v8715_v38 }
 0x3a1   : > { %v2643_v0 = vpop.f32.mrf.mxu3 }
 0x3a2   : > { %v4208_v34 = vpack.c.bf16 %v2027_v21, %v6807_v47  ;;  %v7274_v30 = vadd.f32 %v2643_v0, %v2475_v31  ;;  %v2171_v44 = vmax.f32 %v2027_v21, 0.0 }
 0x3a4   : > { %4272 = vst [vmem:[%s6979_s22 + $0x100] sm:$0xff] %v4208_v34  ;;  %2796 = vmax.xlane.f32.xlu2 %v7274_v30 }
 0x3a5   : > { %v1859_v49 = vpop.f32.mrf.mxu0  ;;  %v2028_v10 = vpop.f32.mrf.mxu1 }
 0x3a6   : > { %v1860_v3 = vadd.f32 %v1859_v49, %v6961_v24  ;;  %v8716_v49 = vld [vmem:[#allocation58_spill] sm:$0xff] }
 0x3a7   : > { %v2476_v62 = vpop.f32.mrf.mxu2  ;;  %v2769_v26 = vpop.xlane.xlu0 %2768 }
 0x3a8   : > { %v2029_v57 = vadd.f32 %v2028_v10, %v1860_v3  ;;  %v2477_v42 = vadd.f32 %v7146_v2, %v2476_v62  ;;  %v7281_v16 = vsub.f32 %v7155_v40, %v2769_v26 }
 0x3a9   : > { %v2645_v47 = vpop.f32.mrf.mxu3 }
 0x3aa   : > { %v2173_v31 = vmax.f32 %v2029_v57, 0.0  ;;  %v4209_v9 = vpack.c.bf16 %v2029_v57, %v6814_v48  ;;  %v2960_v38 = vmul.f32 1.442695, %v7281_v16  ;;  %v7286_v0 = vmul.f32 0.1, %v7281_v16 }
 0x3ab   : > { %v7288_v34 = vadd.f32 %v2645_v47, %v2477_v42  ;;  %v8717_v47 = vld [vmem:[#allocation56_spill] sm:$0xff] }
 0x3ac   : > { %4273 = vst [vmem:[%s6979_s22 + $0x108] sm:$0xff] %v4209_v9  ;;  %2518 = vmatmul.bf16.gmra.mxu2 %v8716_v49  ;;  %v2267_v10 = vpack.c.bf16 %v2173_v31, %v2171_v44  ;;  %5358 = vpow2.f32 %v2960_v38  ;;  %v3472_v40 = vmul.f32 1.442695, %v7286_v0  ;;  %v8718_v44 = vld [vmem:[#allocation57_spill] sm:$0xff] }
 0x3ad   : > { %2798 = vmax.xlane.f32.xlu0 %v7288_v34  ;;  %v1862_v21 = vpop.f32.mrf.mxu0  ;;  %v2031_v3 = vpop.f32.mrf.mxu1 }
 0x3ae   : > { %v1863_v48 = vadd.f32 %v1862_v21, %v6961_v24  ;;  %2687 = vmatmul.bf16.gmra.mxu3 %v2267_v10  ;;  %5360 = vpow2.f32 %v3472_v40 }
 0x3af   : > { %v2479_v62 = vpop.f32.mrf.mxu2  ;;  %v2771_v26 = vpop.xlane.xlu0 %2770 }
 0x3b0   : > { %v2032_v57 = vadd.f32 %v2031_v3, %v1863_v48  ;;  %v7296_v42 = vsub.f32 %v7162_v8, %v2771_v26  ;;  %1901 = vmatmul.bf16.gmra.mxu0 %v8717_v47  ;;  %2070 = vmatmul.bf16.gmra.mxu1 %v8718_v44  ;;  %v2480_v8 = vadd.f32 %v7146_v2, %v2479_v62 }
 0x3b1   : > { %v2648_v31 = vpop.f32.mrf.mxu3 }
 0x3b2   : > { %v5359_v9 = vpop.eup %5358  ;;  %v4210_v38 = vpack.c.bf16 %v2032_v57, %v6829_v22  ;;  %v2962_v49 = vmul.f32 1.442695, %v7296_v42  ;;  %v7303_v21 = vmul.f32 0.1, %v7296_v42 }
 0x3b3   : > { %3088 = vadd.xlane.f32.xlu1 %v5359_v9  ;;  %v2175_v9 = vmax.f32 %v2032_v57, 0.0 }
 0x3b4   : > { %v5361_v10 = vpop.eup %5360  ;;  %4274 = vst [vmem:[%s6979_s22 + $0x110] sm:$0xff] %v4210_v38  ;;  %v3474_v40 = vmul.f32 1.442695, %v7303_v21  ;;  %5362 = vpow2.f32 %v2962_v49  ;;  %v7312_v38 = vadd.f32 %v2648_v31, %v2480_v8 }
 0x3b5   : > { %v1864_v3 = vpop.f32.mrf.mxu0  ;;  %v2033_v48 = vpop.f32.mrf.mxu1  ;;  %3600 = vadd.xlane.f32.xlu2 %v5361_v10 }
 0x3b6   : > { %v1865_v26 = vadd.f32 %v1864_v3, %v6961_v24  ;;  %5364 = vpow2.f32 %v3474_v40 }
 0x3b7   : > { %v2481_v22 = vpop.f32.mrf.mxu2  ;;  %v2773_v47 = vpop.xlane.xlu1 %2772 }
 0x3b8   : > { %v2034_v44 = vadd.f32 %v2033_v48, %v1865_v26  ;;  %v7310_v15 = vsub.f32 %v7172_v4, %v2773_v47  ;;  %v8720_v48 = vld [vmem:[#allocation61_spill] sm:$0xff] }
 0x3b9   : > { %v2650_v58 = vpop.f32.mrf.mxu3 }
 0x3ba   : > { %v2177_v14 = vmax.f32 %v2034_v44, 0.0  ;;  %v4211_v62 = vpack.c.bf16 %v2034_v44, %v6836_v18  ;;  %v2964_v10 = vmul.f32 1.442695, %v7310_v15  ;;  %v7317_v49 = vmul.f32 0.1, %v7310_v15  ;;  %v5363_v3 = vpop.eup %5362 }
 0x3bb   : > { %2800 = vmax.xlane.f32.xlu1 %v7312_v38  ;;  %v2482_v44 = vadd.f32 %v7146_v2, %v2481_v22 }
 0x3bc   : > { %8719 = vst [vmem:[#allocation18_spill] sm:$0xff] %v7317_v49  ;;  %v5365_v40 = vpop.eup %5364  ;;  %2523 = vmatmul.bf16.gmra.mxu2 %v8720_v48  ;;  %v2269_v4 = vpack.c.bf16 %v2177_v14, %v2175_v9  ;;  %v3476_v57 = vmul.f32 1.442695, %v7317_v49  ;;  %5366 = vpow2.f32 %v2964_v10  ;;  %v8721_v14 = vld [vmem:[#allocation59_spill] sm:$0xff]  ;;  %v8722_v9 = vld [vmem:[#allocation60_spill] sm:$0xff] }
 0x3bd   : > { %4275 = vst [vmem:[%s6979_s22 + $0x118] sm:$0xff] %v4211_v62  ;;  %v1867_v31 = vpop.f32.mrf.mxu0  ;;  %v2036_v8 = vpop.f32.mrf.mxu1  ;;  %3602 = vadd.xlane.f32.xlu0 %v5365_v40  ;;  %3090 = vadd.xlane.f32.xlu2 %v5363_v3  ;;  %v7336_v22 = vadd.f32 %v2650_v58, %v2482_v44  ;;  %v8725_v49 = vld [vmem:[#allocation64_spill] sm:$0xff] }
 0x3be   : > { %v1868_v18 = vadd.f32 %v1867_v31, %v6961_v24  ;;  %2692 = vmatmul.bf16.gmra.mxu3 %v2269_v4  ;;  %5368 = vpow2.f32 %v3476_v57 }
 0x3bf   : > { %v2484_v26 = vpop.f32.mrf.mxu2  ;;  %v2775_v47 = vpop.xlane.xlu1 %2774 }
 0x3c0   : > { %v2037_v62 = vadd.f32 %v2036_v8, %v1868_v18  ;;  %v7326_v48 = vsub.f32 %v7179_v32, %v2775_v47  ;;  %1906 = vmatmul.bf16.gmra.mxu0 %v8721_v14  ;;  %2075 = vmatmul.bf16.gmra.mxu1 %v8722_v9 }
 0x3c1   : > { %v2653_v40 = vpop.f32.mrf.mxu3 }
 0x3c2   : > { %v4212_v10 = vpack.c.bf16 %v2037_v62, %v6857_v13  ;;  %v2966_v3 = vmul.f32 1.442695, %v7326_v48  ;;  %v7333_v4 = vmul.f32 0.1, %v7326_v48  ;;  %v5367_v57 = vpop.eup %5366  ;;  %v2485_v13 = vadd.f32 %v7146_v2, %v2484_v26 }
 0x3c3   : > { %v2179_v1 = vmax.f32 %v2037_v62, 0.0 }
 0x3c4   : > { %8723 = vst [vmem:[#allocation19_spill] sm:$0xff] %v7333_v4  ;;  %v5369_v31 = vpop.eup %5368  ;;  %v3478_v32 = vmul.f32 1.442695, %v7333_v4  ;;  %5370 = vpow2.f32 %v2966_v3 }
 0x3c5   : > { %4276 = vst [vmem:[%s6979_s22 + $0x120] sm:$0xff] %v4212_v10  ;;  %v1869_v8 = vpop.f32.mrf.mxu0  ;;  %v2038_v18 = vpop.f32.mrf.mxu1  ;;  %3604 = vadd.xlane.f32.xlu1 %v5369_v31  ;;  %3092 = vadd.xlane.f32.xlu0 %v5367_v57 }
 0x3c6   : > { %v1870_v47 = vadd.f32 %v1869_v8, %v6961_v24  ;;  %2802 = vmax.xlane.f32.xlu2 %v7336_v22  ;;  %5372 = vpow2.f32 %v3478_v32  ;;  %v7349_v8 = vadd.f32 %v2653_v40, %v2485_v13 }
 0x3c7   : > { %v2486_v14 = vpop.f32.mrf.mxu2  ;;  %v2777_v9 = vpop.xlane.xlu2 %2776 }
 0x3c8   : > { %v2039_v10 = vadd.f32 %v2038_v18, %v1870_v47  ;;  %v7343_v58 = vsub.f32 %v7189_v54, %v2777_v9  ;;  %v2487_v40 = vadd.f32 %v7146_v2, %v2486_v14 }
 0x3c9   : > { %v2655_v44 = vpop.f32.mrf.mxu3 }
 0x3ca   : > { %8724 = vst [vmem:[#allocation22_spill] sm:$0xff] %v7343_v58  ;;  %v2181_v4 = vmax.f32 %v2039_v10, 0.0  ;;  %v4213_v57 = vpack.c.bf16 %v2039_v10, %v6864_v51  ;;  %v7347_v3 = vmul.f32 0.1, %v7343_v58  ;;  %v5371_v31 = vpop.eup %5370  ;;  %v2968_v32 = vmul.f32 1.442695, %v7343_v58 }
 0x3cb   : > { %v8728_v10 = vld [vmem:[#allocation63_spill] sm:$0xff]  ;;  %v7368_v14 = vadd.f32 %v2655_v44, %v2487_v40 }
 0x3cc   : > { %v5373_v26 = vpop.eup %5372  ;;  %4277 = vst [vmem:[%s6979_s22 + $0x128] sm:$0xff] %v4213_v57  ;;  %2528 = vmatmul.bf16.gmra.mxu2 %v8725_v49  ;;  %v2271_v18 = vpack.c.bf16 %v2181_v4, %v2179_v1  ;;  %v3480_v54 = vmul.f32 1.442695, %v7347_v3  ;;  %v8727_v4 = vld [vmem:[#allocation62_spill] sm:$0xff] }
 0x3cd   : > { %v1872_v47 = vpop.f32.mrf.mxu0  ;;  %v2041_v62 = vpop.f32.mrf.mxu1  ;;  %3094 = vadd.xlane.f32.xlu1 %v5371_v31  ;;  %2804 = vmax.xlane.f32.xlu0 %v7349_v8 }
 0x3ce   : > { %v1873_v51 = vadd.f32 %v1872_v47, %v6961_v24  ;;  %3606 = vadd.xlane.f32.xlu2 %v5373_v26  ;;  %2697 = vmatmul.bf16.gmra.mxu3 %v2271_v18  ;;  %5374 = vpow2.f32 %v3480_v54 }
 0x3cf   : > { %v2489_v13 = vpop.f32.mrf.mxu2  ;;  %v2779_v9 = vpop.xlane.xlu2 %2778  ;;  %5376 = vpow2.f32 %v2968_v32 }
 0x3d0   : > { %v2042_v49 = vadd.f32 %v2041_v62, %v1873_v51  ;;  %v7359_v1 = vsub.f32 %v7196_v55, %v2779_v9  ;;  %1911 = vmatmul.bf16.gmra.mxu0 %v8727_v4  ;;  %2080 = vmatmul.bf16.gmra.mxu1 %v8728_v10  ;;  %v2490_v44 = vadd.f32 %v7146_v2, %v2489_v13  ;;  %v8730_v13 = vld [vmem:[#allocation67_spill] sm:$0xff] }
 0x3d1   : > { %v2658_v57 = vpop.f32.mrf.mxu3 }
 0x3d2   : > { %8726 = vst [vmem:[#allocation20_spill] sm:$0xff] %v7359_v1  ;;  %v4214_v31 = vpack.c.bf16 %v2042_v49, %v6879_v29  ;;  %v2970_v26 = vmul.f32 1.442695, %v7359_v1  ;;  %v7366_v18 = vmul.f32 0.1, %v7359_v1  ;;  %v2183_v10 = vmax.f32 %v2042_v49, 0.0 }
 0x3d4   : > { %v5375_v54 = vpop.eup %5374  ;;  %4278 = vst [vmem:[%s6979_s22 + $0x130] sm:$0xff] %v4214_v31  ;;  %v3482_v32 = vmul.f32 1.442695, %v7366_v18  ;;  %5378 = vpow2.f32 %v2970_v26 }
 0x3d5   : > { %v5377_v55 = vpop.eup %5376  ;;  %v1874_v47 = vpop.f32.mrf.mxu0  ;;  %2806 = vmax.xlane.f32.xlu1 %v7368_v14  ;;  %3608 = vadd.xlane.f32.xlu0 %v5375_v54 }
 0x3d6   : > { %v2043_v62 = vpop.f32.mrf.mxu1  ;;  %v1875_v29 = vadd.f32 %v1874_v47, %v6961_v24  ;;  %3096 = vadd.xlane.f32.xlu2 %v5377_v55  ;;  %5380 = vpow2.f32 %v3482_v32  ;;  %v7383_v47 = vadd.f32 %v2658_v57, %v2490_v44 }
 0x3d7   : > { %v2491_v51 = vpop.f32.mrf.mxu2  ;;  %v2781_v9 = vpop.xlane.xlu0 %2780 }
 0x3d8   : > { %v2044_v40 = vadd.f32 %v2043_v62, %v1875_v29  ;;  %v7376_v4 = vsub.f32 %v7206_v59, %v2781_v9  ;;  %v2492_v57 = vadd.f32 %v7146_v2, %v2491_v51 }
 0x3d9   : > { %v2660_v31 = vpop.f32.mrf.mxu3 }
 0x3da   : > { %8729 = vst [vmem:[#allocation21_spill] sm:$0xff] %v7376_v4  ;;  %v2185_v1 = vmax.f32 %v2044_v40, 0.0  ;;  %v4215_v58 = vpack.c.bf16 %v2044_v40, %v6886_v37  ;;  %v2972_v26 = vmul.f32 1.442695, %v7376_v4  ;;  %v7381_v54 = vmul.f32 0.1, %v7376_v4  ;;  %v5379_v55 = vpop.eup %5378 }
 0x3db   : > { %v8732_v40 = vld [vmem:[#allocation65_spill] sm:$0xff]  ;;  %v7401_v51 = vadd.f32 %v2660_v31, %v2492_v57 }
 0x3dc   : > { %v5381_v32 = vpop.eup %5380  ;;  %4279 = vst [vmem:[%s6979_s22 + $0x138] sm:$0xff] %v4215_v58  ;;  %2533 = vmatmul.bf16.gmra.mxu2 %v8730_v13  ;;  %v2273_v62 = vpack.c.bf16 %v2185_v1, %v2183_v10  ;;  %v3484_v59 = vmul.f32 1.442695, %v7381_v54  ;;  %5382 = vpow2.f32 %v2972_v26  ;;  %v8733_v10 = vld [vmem:[#allocation66_spill] sm:$0xff] }
 0x3dd   : > { %v1877_v49 = vpop.f32.mrf.mxu0  ;;  %3610 = vadd.xlane.f32.xlu1 %v5381_v32  ;;  %3098 = vadd.xlane.f32.xlu0 %v5379_v55 }
 0x3de   : > { %v2046_v29 = vpop.f32.mrf.mxu1  ;;  %v1878_v37 = vadd.f32 %v1877_v49, %v6961_v24  ;;  %2808 = vmax.xlane.f32.xlu2 %v7383_v47  ;;  %2702 = vmatmul.bf16.gmra.mxu3 %v2273_v62  ;;  %5384 = vpow2.f32 %v3484_v59 }
 0x3df   : > { %v2494_v58 = vpop.f32.mrf.mxu2  ;;  %v2783_v9 = vpop.xlane.xlu1 %2782 }
 0x3e0   : > { %v2047_v44 = vadd.f32 %v2046_v29, %v1878_v37  ;;  %v7392_v1 = vsub.f32 %v7213_v56, %v2783_v9  ;;  %1916 = vmatmul.bf16.gmra.mxu0 %v8732_v40  ;;  %2085 = vmatmul.bf16.gmra.mxu1 %v8733_v10 }
 0x3e1   : > { %v2663_v26 = vpop.f32.mrf.mxu3 }
 0x3e2   : > { %8731 = vst [vmem:[#allocation23_spill] sm:$0xff] %v7392_v1  ;;  %v4216_v55 = vpack.c.bf16 %v2047_v44, %v6901_v63  ;;  %v7398_v32 = vmul.f32 0.1, %v7392_v1  ;;  %v5383_v13 = vpop.eup %5382  ;;  %v2974_v62 = vmul.f32 1.442695, %v7392_v1  ;;  %v2495_v63 = vadd.f32 %v7146_v2, %v2494_v58 }
 0x3e3   : > { %v2187_v10 = vmax.f32 %v2047_v44, 0.0 }
 0x3e4   : > { %v5385_v59 = vpop.eup %5384  ;;  %4280 = vst [vmem:[%s6979_s22 + $0x140] sm:$0xff] %v4216_v55  ;;  %v3486_v56 = vmul.f32 1.442695, %v7398_v32 }
 0x3e5   : > { %v1879_v49 = vpop.f32.mrf.mxu0  ;;  %2810 = vmax.xlane.f32.xlu0 %v7401_v51  ;;  %3100 = vadd.xlane.f32.xlu1 %v5383_v13 }
 0x3e6   : > { %v2048_v29 = vpop.f32.mrf.mxu1  ;;  %v1880_v37 = vadd.f32 %v1879_v49, %v6961_v24  ;;  %3612 = vadd.xlane.f32.xlu2 %v5385_v59  ;;  %5386 = vpow2.f32 %v3486_v56  ;;  %v7416_v56 = vadd.f32 %v2663_v26, %v2495_v63  ;;  %v8734_v49 = vld [vmem:[#allocation70_spill] sm:$0xff] }
 0x3e7   : > { %v2496_v9 = vpop.f32.mrf.mxu2  ;;  %v2785_v40 = vpop.xlane.xlu2 %2784  ;;  %5388 = vpow2.f32 %v2974_v62 }
 0x3e8   : > { %v2049_v31 = vadd.f32 %v2048_v29, %v1880_v37  ;;  %v7409_v57 = vsub.f32 %v7223_v28, %v2785_v40  ;;  %v2497_v63 = vadd.f32 %v7146_v2, %v2496_v9 }
 0x3e9   : > { %v2665_v55 = vpop.f32.mrf.mxu3 }
 0x3ea   : > { %v2189_v1 = vmax.f32 %v2049_v31, 0.0  ;;  %v4217_v4 = vpack.c.bf16 %v2049_v31, %v6908_v46  ;;  %v2976_v13 = vmul.f32 1.442695, %v7409_v57  ;;  %v7414_v59 = vmul.f32 0.1, %v7409_v57  ;;  %v8735_v31 = vld [vmem:[#allocation68_spill] sm:$0xff] }
 0x3eb   : > { %v7435_v9 = vadd.f32 %v2665_v55, %v2497_v63 }
 0x3ec   : > { %v5387_v58 = vpop.eup %5386  ;;  %4281 = vst [vmem:[%s6979_s22 + $0x148] sm:$0xff] %v4217_v4  ;;  %2538 = vmatmul.bf16.gmra.mxu2 %v8734_v49  ;;  %v2275_v62 = vpack.c.bf16 %v2189_v1, %v2187_v10  ;;  %v3488_v28 = vmul.f32 1.442695, %v7414_v59  ;;  %5390 = vpow2.f32 %v2976_v13  ;;  %v8736_v10 = vld [vmem:[#allocation69_spill] sm:$0xff] }
 0x3ed   : > { %v5389_v29 = vpop.eup %5388  ;;  %v1882_v44 = vpop.f32.mrf.mxu0  ;;  %3614 = vadd.xlane.f32.xlu0 %v5387_v58  ;;  %2812 = vmax.xlane.f32.xlu1 %v7416_v56 }
 0x3ee   : > { %v2051_v37 = vpop.f32.mrf.mxu1  ;;  %v1883_v46 = vadd.f32 %v1882_v44, %v6961_v24  ;;  %3102 = vadd.xlane.f32.xlu2 %v5389_v29  ;;  %2707 = vmatmul.bf16.gmra.mxu3 %v2275_v62  ;;  %5392 = vpow2.f32 %v3488_v28 }
 0x3ef   : > { %v2499_v26 = vpop.f32.mrf.mxu2  ;;  %v2787_v4 = vpop.xlane.xlu0 %2786 }
 0x3f0   : > { %v2052_v1 = vadd.f32 %v2051_v37, %v1883_v46  ;;  %v7425_v40 = vsub.f32 %v7230_v12, %v2787_v4  ;;  %1921 = vmatmul.bf16.gmra.mxu0 %v8735_v31  ;;  %2090 = vmatmul.bf16.gmra.mxu1 %v8736_v10 }
 0x3f1   : > { %v2668_v58 = vpop.f32.mrf.mxu3 }
 0x3f2   : > { %v4218_v13 = vpack.c.bf16 %v2052_v1, %v6923_v27  ;;  %v2978_v49 = vmul.f32 1.442695, %v7425_v40  ;;  %v7432_v62 = vmul.f32 0.1, %v7425_v40  ;;  %v5391_v28 = vpop.eup %5390  ;;  %v2500_v27 = vadd.f32 %v7146_v2, %v2499_v26 }
 0x3f4   : > { %8737 = vst [vmem:[#allocation24_spill] sm:$0xff] %v7432_v62  ;;  %v5393_v29 = vpop.eup %5392  ;;  %v3490_v12 = vmul.f32 1.442695, %v7432_v62  ;;  %5394 = vpow2.f32 %v2978_v49 }
 0x3f5   : > { %4282 = vst [vmem:[%s6979_s22 + $0x150] sm:$0xff] %v4218_v13  ;;  %v1884_v44 = vpop.f32.mrf.mxu0  ;;  %3104 = vadd.xlane.f32.xlu0 %v5391_v28  ;;  %3616 = vadd.xlane.f32.xlu1 %v5393_v29  ;;  %v2191_v13 = vmax.f32 %v2052_v1, 0.0 }
 0x3f6   : > { %v2053_v37 = vpop.f32.mrf.mxu1  ;;  %v1885_v46 = vadd.f32 %v1884_v44, %v6961_v24  ;;  %2814 = vmax.xlane.f32.xlu2 %v7435_v9  ;;  %5396 = vpow2.f32 %v3490_v12  ;;  %v7448_v44 = vadd.f32 %v2668_v58, %v2500_v27 }
 0x3f7   : > { %v2501_v4 = vpop.f32.mrf.mxu2  ;;  %v2789_v31 = vpop.xlane.xlu1 %2788 }
 0x3f8   : > { %v2054_v10 = vadd.f32 %v2053_v37, %v1885_v46  ;;  %v7442_v55 = vsub.f32 %v7240_v25, %v2789_v31  ;;  %v2502_v58 = vadd.f32 %v7146_v2, %v2501_v4 }
 0x3f9   : > { %v2670_v63 = vpop.f32.mrf.mxu3 }
 0x3fa   : > { %8738 = vst [vmem:[#allocation27_spill] sm:$0xff] %v7442_v55  ;;  %v2193_v62 = vmax.f32 %v2054_v10, 0.0  ;;  %v4219_v28 = vpack.c.bf16 %v2054_v10, %v6930_v36  ;;  %v7446_v49 = vmul.f32 0.1, %v7442_v55  ;;  %v5395_v29 = vpop.eup %5394  ;;  %v2980_v12 = vmul.f32 1.442695, %v7442_v55 }
 0x3fb   : > { %v8740_v10 = vld [vmem:[#allocation71_spill] sm:$0xff]  ;;  %v7467_v2 = vadd.f32 %v2670_v63, %v2502_v58  ;;  %v7476_v63 = vld [vmem:[%s8482_s6] ss:$0 sm:$0xff] }
 0x3fc   : > { %v5397_v26 = vpop.eup %5396  ;;  %4283 = vst [vmem:[%s6979_s22 + $0x158] sm:$0xff] %v4219_v28  ;;  %2543 = vmatmul.bf16.gmra.mxu2 %v6940_v60  ;;  %v2277_v37 = vpack.c.bf16 %v2193_v62, %v2191_v13  ;;  %v3492_v25 = vmul.f32 1.442695, %v7446_v49  ;;  %v8741_v13 = vld [vmem:[#allocation72_spill] sm:$0xff] }
 0x3fd   : > { %v1887_v46 = vpop.f32.mrf.mxu0  ;;  %2816 = vmax.xlane.f32.xlu0 %v7448_v44  ;;  %3106 = vadd.xlane.f32.xlu1 %v5395_v29 }
 0x3fe   : > { %v2056_v1 = vpop.f32.mrf.mxu1  ;;  %v1888_v36 = vadd.f32 %v1887_v46, %v6961_v24  ;;  %3618 = vadd.xlane.f32.xlu2 %v5397_v26  ;;  %2712 = vmatmul.bf16.gmra.mxu3 %v2277_v37  ;;  %5398 = vpow2.f32 %v3492_v25 }
 0x3ff   : > { %v2504_v27 = vpop.f32.mrf.mxu2  ;;  %v2791_v31 = vpop.xlane.xlu2 %2790  ;;  %5400 = vpow2.f32 %v2980_v12 }
 0x400   : > { %v2057_v60 = vadd.f32 %v2056_v1, %v1888_v36  ;;  %v7458_v62 = vsub.f32 %v7247_v53, %v2791_v31  ;;  %1926 = vmatmul.bf16.gmra.mxu0 %v8740_v10  ;;  %2095 = vmatmul.bf16.gmra.mxu1 %v8741_v13  ;;  %v2505_v58 = vadd.f32 %v7476_v63, %v2504_v27 }
 0x401   : > { %v2673_v28 = vpop.f32.mrf.mxu3 }
 0x402   : > { %8739 = vst [vmem:[#allocation25_spill] sm:$0xff] %v7458_v62  ;;  %v4220_v29 = vpack.c.bf16 %v2057_v60, %v6945_v43  ;;  %v2982_v26 = vmul.f32 1.442695, %v7458_v62  ;;  %v7465_v37 = vmul.f32 0.1, %v7458_v62  ;;  %v2195_v13 = vmax.f32 %v2057_v60, 0.0 }
 0x403   : > { %v7487_v55 = vadd.f32 %v2673_v28, %v2505_v58 }
 0x404   : > { %v5399_v4 = vpop.eup %5398  ;;  %4284 = vst [vmem:[%s6979_s22 + $0x160] sm:$0xff] %v4220_v29  ;;  %v3494_v12 = vmul.f32 1.442695, %v7465_v37  ;;  %5402 = vpow2.f32 %v2982_v26 }
 0x405   : > { %v5401_v53 = vpop.eup %5400  ;;  %v1889_v25 = vpop.f32.mrf.mxu0  ;;  %3620 = vadd.xlane.f32.xlu0 %v5399_v4  ;;  %2818 = vmax.xlane.f32.xlu1 %v7467_v2 }
 0x406   : > { %v2058_v46 = vpop.f32.mrf.mxu1  ;;  %v1890_v43 = vadd.f32 %v1889_v25, %v6961_v24  ;;  %3108 = vadd.xlane.f32.xlu2 %v5401_v53  ;;  %5404 = vpow2.f32 %v3494_v12 }
 0x407   : > { %v2506_v1 = vpop.f32.mrf.mxu2  ;;  %v2793_v36 = vpop.xlane.xlu0 %2792 }
 0x408   : > { %v2059_v31 = vadd.f32 %v2058_v46, %v1890_v43  ;;  %v7480_v10 = vsub.f32 %v7257_v23, %v2793_v36  ;;  %v2507_v28 = vadd.f32 %v7476_v63, %v2506_v1 }
 0x409   : > { %v2675_v29 = vpop.f32.mrf.mxu3 }
 0x40a   : > { %v2197_v26 = vmax.f32 %v2059_v31, 0.0  ;;  %v4221_v4 = vpack.c.bf16 %v2059_v31, %v6952_v52  ;;  %v2984_v12 = vmul.f32 1.442695, %v7480_v10  ;;  %v7485_v53 = vmul.f32 0.1, %v7480_v10  ;;  %v5403_v25 = vpop.eup %5402  ;;  %v8742_v31 = vld [vmem:[#allocation73_spill] sm:$0xff] }
 0x40b   : > { %v7505_v1 = vadd.f32 %v2675_v29, %v2507_v28 }
 0x40c   : > { %v5405_v62 = vpop.eup %5404  ;;  %4285 = vst [vmem:[%s6979_s22 + $0x168] sm:$0xff] %v4221_v4  ;;  %2548 = vmatmul.bf16.gmra.mxu2 %v6971_v19  ;;  %v2279_v27 = vpack.c.bf16 %v2197_v26, %v2195_v13  ;;  %v3496_v23 = vmul.f32 1.442695, %v7485_v53  ;;  %5406 = vpow2.f32 %v2984_v12 }
 0x40d   : > { %v1892_v60 = vpop.f32.mrf.mxu0  ;;  %3110 = vadd.xlane.f32.xlu0 %v5403_v25  ;;  %3622 = vadd.xlane.f32.xlu1 %v5405_v62 }
 0x40e   : > { %v2061_v46 = vpop.f32.mrf.mxu1  ;;  %v1893_v52 = vadd.f32 %v1892_v60, %v6961_v24  ;;  %2820 = vmax.xlane.f32.xlu2 %v7487_v55  ;;  %2717 = vmatmul.bf16.gmra.mxu3 %v2279_v27  ;;  %5408 = vpow2.f32 %v3496_v23 }
 0x40f   : > { %v2509_v43 = vpop.f32.mrf.mxu2  ;;  %v2795_v36 = vpop.xlane.xlu1 %2794 }
 0x410   : > { %v2062_v19 = vadd.f32 %v2061_v46, %v1893_v52  ;;  %v7496_v58 = vsub.f32 %v7264_v6, %v2795_v36  ;;  %1931 = vmatmul.bf16.gmra.mxu0 %v6954_v7  ;;  %2100 = vmatmul.bf16.gmra.mxu1 %v8742_v31 }
 0x411   : > { %v2678_v62 = vpop.f32.mrf.mxu3 }
 0x412   : > { %v4222_v13 = vpack.c.bf16 %v2062_v19, %v6977_v45  ;;  %v7502_v26 = vmul.f32 0.1, %v7496_v58  ;;  %v5407_v4 = vpop.eup %5406  ;;  %v2986_v12 = vmul.f32 1.442695, %v7496_v58  ;;  %v2510_v45 = vadd.f32 %v7476_v63, %v2509_v43 }
 0x413   : > { %v2199_v28 = vmax.f32 %v2062_v19, 0.0 }
 0x414   : > { %v5409_v25 = vpop.eup %5408  ;;  %4286 = vst [vmem:[%s6979_s22 + $0x170] sm:$0xff] %v4222_v13  ;;  %v3498_v6 = vmul.f32 1.442695, %v7502_v26 }
 0x415   : > { %v1894_v27 = vpop.f32.mrf.mxu0  ;;  %2822 = vmax.xlane.f32.xlu0 %v7505_v1  ;;  %3112 = vadd.xlane.f32.xlu1 %v5407_v4 }
 0x416   : > { %v2063_v23 = vpop.f32.mrf.mxu1  ;;  %v1895_v7 = vadd.f32 %v1894_v27, %v6961_v24  ;;  %3624 = vadd.xlane.f32.xlu2 %v5409_v25  ;;  %5410 = vpow2.f32 %v3498_v6  ;;  %v7520_v6 = vadd.f32 %v2678_v62, %v2510_v45 }
 0x417   : > { %v2511_v60 = vpop.f32.mrf.mxu2  ;;  %v2797_v46 = vpop.xlane.xlu2 %2796  ;;  %5412 = vpow2.f32 %v2986_v12 }
 0x418   : > { %v2064_v29 = vadd.f32 %v2063_v23, %v1895_v7  ;;  %v7513_v52 = vsub.f32 %v7274_v30, %v2797_v46  ;;  %v2512_v7 = vadd.f32 %v7476_v63, %v2511_v60 }
 0x419   : > { %v2680_v36 = vpop.f32.mrf.mxu3 }
 0x41a   : > { %v2201_v31 = vmax.f32 %v2064_v29, 0.0  ;;  %v4223_v13 = vpack.c.bf16 %v2064_v29, %v6985_v20  ;;  %v2988_v4 = vmul.f32 1.442695, %v7513_v52  ;;  %v7518_v25 = vmul.f32 0.1, %v7513_v52 }
 0x41c   : > { %8743 = vst [vmem:[#allocation26_spill] sm:$0xff] %v7518_v25  ;;  %v5411_v43 = vpop.eup %5410  ;;  %2553 = vmatmul.bf16.gmra.mxu2 %v6992_v50  ;;  %v2281_v12 = vpack.c.bf16 %v2201_v31, %v2199_v28  ;;  %v3500_v30 = vmul.f32 1.442695, %v7518_v25  ;;  %5414 = vpow2.f32 %v2988_v4 }
 0x41d   : > { %4287 = vst [vmem:[%s6979_s22 + $0x178] sm:$0xff] %v4223_v13  ;;  %v5413_v27 = vpop.eup %5412  ;;  %v1897_v19 = vpop.f32.mrf.mxu0  ;;  %3626 = vadd.xlane.f32.xlu0 %v5411_v43  ;;  %2824 = vmax.xlane.f32.xlu1 %v7520_v6 }
 0x41e   : > { %v2066_v23 = vpop.f32.mrf.mxu1  ;;  %v1898_v20 = vadd.f32 %v1897_v19, %v6961_v24  ;;  %3114 = vadd.xlane.f32.xlu2 %v5413_v27  ;;  %2722 = vmatmul.bf16.gmra.mxu3 %v2281_v12  ;;  %5416 = vpow2.f32 %v3500_v30  ;;  %v7537_v12 = vadd.f32 %v2680_v36, %v2512_v7 }
 0x41f   : > { %v2514_v62 = vpop.f32.mrf.mxu2 }
 0x420   : > { %v2067_v50 = vadd.f32 %v2066_v23, %v1898_v20  ;;  %v2799_v45 = vpop.xlane.xlu0 %2798  ;;  %v2515_v19 = vadd.f32 %v7476_v63, %v2514_v62 }
 0x421   : > { %v7529_v46 = vsub.f32 %v7288_v34, %v2799_v45  ;;  %v2683_v29 = vpop.f32.mrf.mxu3 }
 0x422   : > { %v4224_v28 = vpack.c.bf16 %v2067_v50, %v6998_v41  ;;  %v5415_v31 = vpop.eup %5414  ;;  %v2203_v7 = vmax.f32 %v2067_v50, 0.0 }
 0x423   : > { %8744 = vst [vmem:[#allocation28_spill] sm:$0xff] %v7529_v46  ;;  %v2990_v13 = vmul.f32 1.442695, %v7529_v46  ;;  %v7534_v4 = vmul.f32 0.1, %v7529_v46 }
 0x424   : > { %v5417_v43 = vpop.eup %5416  ;;  %4288 = vst [vmem:[%s6979_s22 + $0x180] sm:$0xff] %v4224_v28 }
 0x425   : > { %8745 = vst [vmem:[#allocation29_spill] sm:$0xff] %v7534_v4  ;;  %v1899_v30 = vpop.f32.mrf.mxu0  ;;  %3116 = vadd.xlane.f32.xlu0 %v5415_v31  ;;  %3628 = vadd.xlane.f32.xlu1 %v5417_v43  ;;  %v3502_v34 = vmul.f32 1.442695, %v7534_v4  ;;  %5418 = vpow2.f32 %v2990_v13  ;;  %v7544_v43 = vadd.f32 %v2683_v29, %v2515_v19 }
 0x426   : > { %v2068_v60 = vpop.f32.mrf.mxu1  ;;  %v1900_v27 = vadd.f32 %v1899_v30, %v6961_v24  ;;  %2826 = vmax.xlane.f32.xlu2 %v7537_v12  ;;  %v3089_v41 = vpop.xlane.xlu1 %3088 }
 0x427   : > { %v2516_v23 = vpop.f32.mrf.mxu2  ;;  %5420 = vpow2.f32 %v3502_v34 }
 0x428   : > { %v2069_v20 = vadd.f32 %v2068_v60, %v1900_v27  ;;  %v3601_v45 = vpop.xlane.xlu2 %3600  ;;  %5422 = vlog2.f32 %v3089_v41 }
 0x429   : > { %v2685_v36 = vpop.f32.mrf.mxu3  ;;  %5424 = vlog2.f32 %v3601_v45 }
 0x42a   : > { %v2205_v28 = vmax.f32 %v2069_v20, 0.0  ;;  %v4225_v31 = vpack.c.bf16 %v2069_v20, %v7004_v33  ;;  %v2517_v33 = vadd.f32 %v7476_v63, %v2516_v23 }
 0x42b   : > { %v5419_v4 = vpop.eup %5418 }
 0x42c   : > { %4289 = vst [vmem:[%s6979_s22 + $0x188] sm:$0xff] %v4225_v31  ;;  %2558 = vmatmul.bf16.gmra.mxu2 %v7011_v39  ;;  %v2283_v30 = vpack.c.bf16 %v2205_v28, %v2203_v7  ;;  %v7559_v23 = vadd.f32 %v2685_v36, %v2517_v33 }
 0x42d   : > { %v1902_v13 = vpop.f32.mrf.mxu0  ;;  %2828 = vmax.xlane.f32.xlu0 %v7544_v43  ;;  %3118 = vadd.xlane.f32.xlu1 %v5419_v4  ;;  %v5421_v62 = vpop.eup %5420 }
 0x42e   : > { %v2071_v25 = vpop.f32.mrf.mxu1  ;;  %v1903_v50 = vadd.f32 %v1902_v13, %v6961_v24  ;;  %2727 = vmatmul.bf16.gmra.mxu3 %v2283_v30  ;;  %v2801_v60 = vpop.xlane.xlu1 %2800  ;;  %3630 = vadd.xlane.f32.xlu2 %v5421_v62 }
 0x42f   : > { %v7552_v29 = vsub.f32 %v7312_v38, %v2801_v60  ;;  %v2519_v39 = vpop.f32.mrf.mxu2  ;;  %v5423_v45 = vpop.eup %5422 }
 0x430   : > { %v2072_v34 = vadd.f32 %v2071_v25, %v1903_v50  ;;  %v3091_v27 = vpop.xlane.xlu2 %3090  ;;  %v3603_v41 = vpop.xlane.xlu0 %3602  ;;  %v3217_v25 = vmul.f32 0.6931472, %v5423_v45 }
 0x431   : > { %8746 = vst [vmem:[#allocation30_spill] sm:$0xff] %v7552_v29  ;;  %v2992_v19 = vmul.f32 1.442695, %v7552_v29  ;;  %v7556_v4 = vmul.f32 0.1, %v7552_v29  ;;  %5426 = vlog2.f32 %v3091_v27  ;;  %v2688_v20 = vpop.f32.mrf.mxu3  ;;  %v5425_v28 = vpop.eup %5424 }
 0x432   : > { %v4226_v7 = vpack.c.bf16 %v2072_v34, %v7017_v11  ;;  %5428 = vlog2.f32 %v3603_v41  ;;  %v3729_v50 = vmul.f32 0.6931472, %v5425_v28  ;;  %v3344_v45 = vsub.f32 %v7281_v16, %v3217_v25 }
 0x433   : > { %8747 = vst [vmem:[#allocation31_spill] sm:$0xff] %v7556_v4  ;;  %5430 = vpow2.f32 %v2992_v19  ;;  %v3504_v38 = vmul.f32 1.442695, %v7556_v4  ;;  %v2520_v16 = vadd.f32 %v7476_v63, %v2519_v39 }
 0x434   : > { %4290 = vst [vmem:[%s6979_s22 + $0x190] sm:$0xff] %v4226_v7  ;;  %v2207_v7 = vmax.f32 %v2072_v34, 0.0 }
 0x435   : > { %v1904_v31 = vpop.f32.mrf.mxu0  ;;  %2830 = vmax.xlane.f32.xlu1 %v7559_v23  ;;  %5432 = vpow2.f32 %v3504_v38 }
 0x436   : > { %v2073_v30 = vpop.f32.mrf.mxu1  ;;  %v1905_v13 = vadd.f32 %v1904_v31, %v6961_v24 }
 0x437   : > { %v5427_v62 = vpop.eup %5426  ;;  %v7565_v60 = vpop.f32.mrf.mxu2 }
 0x438   : > { %v5429_v11 = vpop.eup %5428  ;;  %v3219_v36 = vmul.f32 0.6931472, %v5427_v62  ;;  %v2074_v33 = vadd.f32 %v2073_v30, %v1905_v13  ;;  %v3605_v27 = vpop.xlane.xlu1 %3604  ;;  %v3856_v62 = vsub.f32 %v7286_v0, %v3729_v50 }
 0x439   : > { %v3093_v41 = vpop.xlane.xlu0 %3092  ;;  %v5431_v19 = vpop.eup %5430  ;;  %v3731_v4 = vmul.f32 0.6931472, %v5429_v11  ;;  %v7602_v11 = vadd.f32 %v2688_v20, %v2520_v16 }
 0x43a   : > { %v2803_v38 = vpop.xlane.xlu2 %2802  ;;  %v7568_v29 = vpop.f32.mrf.mxu3  ;;  %v3345_v28 = vsub.f32 %v7296_v42, %v3219_v36  ;;  %v2209_v31 = vmax.f32 %v2074_v33, 0.0  ;;  %v4227_v46 = vpack.c.bf16 %v2074_v33, %v7023_v17  ;;  %3120 = vadd.xlane.f32.xlu2 %v5431_v19  ;;  %5434 = vlog2.f32 %v3093_v41 }
 0x43b   : > { %v7573_v30 = vsub.f32 %v7336_v22, %v2803_v38  ;;  %v5433_v13 = vpop.eup %5432  ;;  %v3857_v42 = vsub.f32 %v7303_v21, %v3731_v4  ;;  %5436 = vlog2.f32 %v3605_v27 }
 0x43c   : > { %v4937_v34 = vpack.c.bf16 %v3345_v28, %v3344_v45  ;;  %4291 = vst [vmem:[%s6979_s22 + $0x198] sm:$0xff] %v4227_v46  ;;  %2563 = vmatmul.bf16.gmra.mxu2 %v7030_v35  ;;  %3632 = vadd.xlane.f32.xlu0 %v5433_v13  ;;  %v2285_v22 = vpack.c.bf16 %v2209_v31, %v2207_v7 }
 0x43d   : > { %v2994_v17 = vmul.f32 1.442695, %v7573_v30  ;;  %v7593_v0 = vmul.f32 0.1, %v7573_v30  ;;  %v5097_v39 = vpack.c.bf16 %v3857_v42, %v3856_v62  ;;  %v1907_v21 = vpop.f32.mrf.mxu0 }
 0x43e   : > { %v2076_v4 = vpop.f32.mrf.mxu1  ;;  %4938 = vst [vmem:[%s7581_s29] sm:$0xff] %v4937_v34   ;;  %v1908_v25 = vadd.f32 %v1907_v21, %v6961_v24  ;;  %2732 = vmatmul.bf16.gmra.mxu3 %v2285_v22 }
 0x43f   : > { %5438 = vpow2.f32 %v2994_v17  ;;  %v3506_v46 = vmul.f32 1.442695, %v7593_v0  ;;  %5098 = vst [vmem:[%s7588_s23] sm:$0xff] %v5097_v39   ;;  %v7600_v50 = vpop.f32.mrf.mxu2  ;;  %v2522_v17 = vadd.f32 %v7476_v63, %v7565_v60 }
 0x440   : > { %v2077_v35 = vadd.f32 %v2076_v4, %v1908_v25  ;;  %v3095_v36 = vpop.xlane.xlu1 %3094  ;;  %v5435_v27 = vpop.eup %5434 }
 0x441   : > { %v2805_v33 = vpop.xlane.xlu0 %2804  ;;  %5440 = vpow2.f32 %v3506_v46  ;;  %v5437_v38 = vpop.eup %5436  ;;  %v3221_v13 = vmul.f32 0.6931472, %v5435_v27 }
 0x442   : > { %5442 = vlog2.f32 %v3095_v36  ;;  %v3607_v41 = vpop.xlane.xlu2 %3606  ;;  %v7605_v19 = vsub.f32 %v7349_v8, %v2805_v33  ;;  %v7607_v45 = vpop.f32.mrf.mxu3  ;;  %v4228_v7 = vpack.c.bf16 %v2077_v35, %v7036_v61  ;;  %2832 = vmax.xlane.f32.xlu2 %v7602_v11  ;;  %v3733_v22 = vmul.f32 0.6931472, %v5437_v38 }
 0x443   : > { %5444 = vlog2.f32 %v3607_v41  ;;  %v3346_v33 = vsub.f32 %v7310_v15, %v3221_v13  ;;  %v2211_v27 = vmax.f32 %v2077_v35, 0.0  ;;  %v8749_v13 = vld [vmem:[#allocation19_spill] sm:$0xff] }
 0x444   : > { %v7612_v20 = vmul.f32 0.1, %v7605_v19  ;;  %4292 = vst [vmem:[%s6979_s22 + $0x1a0] sm:$0xff] %v4228_v7  ;;  %v2996_v31 = vmul.f32 1.442695, %v7605_v19 }
 0x445   : > { %v5439_v28 = vpop.eup %5438  ;;  %v1909_v62 = vpop.f32.mrf.mxu0 }
 0x446   : > { %3122 = vadd.xlane.f32.xlu0 %v5439_v28  ;;  %v2078_v8 = vpop.f32.mrf.mxu1  ;;  %v3508_v16 = vmul.f32 1.442695, %v7612_v20  ;;  %v1910_v61 = vadd.f32 %v1909_v62, %v6961_v24 }
 0x447   : > { %v5441_v42 = vpop.eup %5440  ;;  %v7620_v39 = vpop.f32.mrf.mxu2 }
 0x448   : > { %v5443_v34 = vpop.eup %5442  ;;  %3634 = vadd.xlane.f32.xlu1 %v5441_v42  ;;  %5446 = vpow2.f32 %v3508_v16  ;;  %v2079_v4 = vadd.f32 %v2078_v8, %v1910_v61  ;;  %v2807_v25 = vpop.xlane.xlu1 %2806  ;;  %v8748_v16 = vld [vmem:[#allocation18_spill] sm:$0xff] }
 0x449   : > { %v3223_v21 = vmul.f32 0.6931472, %v5443_v34  ;;  %v3609_v46 = vpop.xlane.xlu0 %3608  ;;  %5448 = vpow2.f32 %v2996_v31  ;;  %v5445_v36 = vpop.eup %5444  ;;  %v7624_v41 = vsub.f32 %v7368_v14, %v2807_v25  ;;  %v3858_v42 = vsub.f32 %v8748_v16, %v3733_v22 }
 0x44a   : > { %v3097_v7 = vpop.xlane.xlu2 %3096  ;;  %v7626_v60 = vpop.f32.mrf.mxu3  ;;  %v3735_v28 = vmul.f32 0.6931472, %v5445_v36  ;;  %v2213_v62 = vmax.f32 %v2079_v4, 0.0  ;;  %v4229_v8 = vpack.c.bf16 %v2079_v4, %v7042_v5  ;;  %v7636_v14 = vadd.f32 %v7568_v29, %v2522_v17 }
 0x44b   : > { %v3347_v38 = vsub.f32 %v7326_v48, %v3223_v21  ;;  %v2998_v31 = vmul.f32 1.442695, %v7624_v41  ;;  %v7633_v15 = vmul.f32 0.1, %v7624_v41  ;;  %5450 = vlog2.f32 %v3609_v46  ;;  %v8750_v48 = vld [vmem:[#allocation74_spill] sm:$0xff] }
 0x44c   : > { %v3859_v61 = vsub.f32 %v8749_v13, %v3735_v28  ;;  %4293 = vst [vmem:[%s6979_s22 + $0x1a8] sm:$0xff] %v4229_v8  ;;  %2568 = vmatmul.bf16.gmra.mxu2 %v8750_v48  ;;  %v2287_v34 = vpack.c.bf16 %v2213_v62, %v2211_v27  ;;  %5452 = vlog2.f32 %v3097_v7  ;;  %v2525_v7 = vadd.f32 %v7476_v63, %v7600_v50  ;;  %v8751_v8 = vld [vmem:[#allocation75_spill] sm:$0xff] }
 0x44d   : > { %v4942_v35 = vpack.c.bf16 %v3347_v38, %v3346_v33  ;;  %v1912_v22 = vpop.f32.mrf.mxu0  ;;  %v3510_v4 = vmul.f32 1.442695, %v7633_v15  ;;  %5454 = vpow2.f32 %v2998_v31 }
 0x44e   : > { %v5447_v5 = vpop.eup %5446  ;;  %2834 = vmax.xlane.f32.xlu0 %v7636_v14  ;;  %v2081_v21 = vpop.f32.mrf.mxu1  ;;  %v5102_v29 = vpack.c.bf16 %v3859_v61, %v3858_v42  ;;  %v1913_v17 = vadd.f32 %v1912_v22, %v6961_v24  ;;  %2737 = vmatmul.bf16.gmra.mxu3 %v2287_v34  ;;  %v7658_v61 = vadd.f32 %v7607_v45, %v2525_v7 }
 0x44f   : > { %v5449_v25 = vpop.eup %5448  ;;  %5254 = vst [vmem:[%s7581_s29 + $0x8] sm:$0xff] %v4942_v35   ;;  %3636 = vadd.xlane.f32.xlu2 %v5447_v5  ;;  %v7645_v46 = vpop.f32.mrf.mxu2  ;;  %5456 = vpow2.f32 %v3510_v4 }
 0x450   : > { %3124 = vadd.xlane.f32.xlu1 %v5449_v25  ;;  %5285 = vst [vmem:[%s7588_s23 + $0x8] sm:$0xff] %v5102_v29   ;;  %v2082_v36 = vadd.f32 %v2081_v21, %v1913_v17  ;;  %v3611_v33 = vpop.xlane.xlu1 %3610 }
 0x451   : > { %v3099_v27 = vpop.xlane.xlu0 %3098  ;;  %5458 = vlog2.f32 %v3611_v33  ;;  %v5451_v62 = vpop.eup %5450 }
 0x452   : > { %v2809_v38 = vpop.xlane.xlu2 %2808  ;;  %v7650_v28 = vpop.f32.mrf.mxu3  ;;  %v4230_v16 = vpack.c.bf16 %v2082_v36, %v8751_v8  ;;  %5460 = vlog2.f32 %v3099_v27  ;;  %v3737_v48 = vmul.f32 0.6931472, %v5451_v62  ;;  %v2215_v8 = vmax.f32 %v2082_v36, 0.0  ;;  %v8756_v36 = vld [vmem:[#allocation20_spill] sm:$0xff] }
 0x453   : > { %v5453_v42 = vpop.eup %5452  ;;  %v7654_v31 = vsub.f32 %v7383_v47, %v2809_v38  ;;  %v2527_v38 = vadd.f32 %v7476_v63, %v7620_v39 }
 0x454   : > { %v5455_v35 = vpop.eup %5454  ;;  %4294 = vst [vmem:[%s6979_s22 + $0x1b0] sm:$0xff] %v4230_v16  ;;  %v3225_v4 = vmul.f32 0.6931472, %v5453_v42  ;;  %v3860_v62 = vsub.f32 %v7347_v3, %v3737_v48 }
 0x455   : > { %8752 = vst [vmem:[#allocation34_spill] sm:$0xff] %v7654_v31  ;;  %v5457_v13 = vpop.eup %5456  ;;  %v3000_v50 = vmul.f32 1.442695, %v7654_v31  ;;  %v7662_v34 = vmul.f32 0.1, %v7654_v31  ;;  %v1914_v5 = vpop.f32.mrf.mxu0 }
 0x456   : > { %v2083_v22 = vpop.f32.mrf.mxu1  ;;  %v1915_v21 = vadd.f32 %v1914_v5, %v6961_v24  ;;  %3638 = vadd.xlane.f32.xlu0 %v5457_v13 }
 0x457   : > { %3126 = vadd.xlane.f32.xlu2 %v5455_v35  ;;  %v5459_v47 = vpop.eup %5458  ;;  %v7666_v25 = vpop.f32.mrf.mxu2  ;;  %5462 = vpow2.f32 %v3000_v50  ;;  %v3512_v27 = vmul.f32 1.442695, %v7662_v34 }
 0x458   : > { %2836 = vmax.xlane.f32.xlu1 %v7658_v61  ;;  %v3739_v45 = vmul.f32 0.6931472, %v5459_v47  ;;  %v2084_v29 = vadd.f32 %v2083_v22, %v1915_v21  ;;  %v3101_v17 = vpop.xlane.xlu1 %3100  ;;  %v5461_v7 = vpop.eup %5460  ;;  %v8754_v22 = vld [vmem:[#allocation76_spill] sm:$0xff]  ;;  %v8755_v47 = vld [vmem:[#allocation22_spill] sm:$0xff] }
 0x459   : > { %v2811_v33 = vpop.xlane.xlu0 %2810  ;;  %v3227_v50 = vmul.f32 0.6931472, %v5461_v7  ;;  %v3348_v31 = vsub.f32 %v8755_v47, %v3225_v4  ;;  %v8759_v47 = vld [vmem:[#allocation5_spill] sm:$0xff] }
 0x45a   : > { %v3613_v16 = vpop.xlane.xlu2 %3612  ;;  %v7673_v42 = vsub.f32 %v7401_v51, %v2811_v33  ;;  %v7675_v35 = vpop.f32.mrf.mxu3  ;;  %v3861_v13 = vsub.f32 %v7366_v18, %v3739_v45  ;;  %v2217_v5 = vmax.f32 %v2084_v29, 0.0  ;;  %v4231_v21 = vpack.c.bf16 %v2084_v29, %v8754_v22  ;;  %v8757_v51 = vld [vmem:[#allocation7_spill] sm:$0xff] }
 0x45b   : > { %5464 = vlog2.f32 %v3613_v16  ;;  %v3349_v48 = vsub.f32 %v8756_v36, %v3227_v50  ;;  %v7687_v29 = vadd.f32 %v7626_v60, %v2527_v38 }
 0x45c   : > { %8753 = vst [vmem:[#allocation32_spill] sm:$0xff] %v7673_v42  ;;  %v7681_v39 = vmul.f32 0.1, %v7673_v42  ;;  %v5107_v3 = vpack.c.bf16 %v3861_v13, %v3860_v62  ;;  %2573 = vmatmul.bf16.gmra.mxu2 %v8757_v51  ;;  %v2289_v33 = vpack.c.bf16 %v2217_v5, %v2215_v8  ;;  %5466 = vpow2.f32 %v3512_v27 }
 0x45d   : > { %4295 = vst [vmem:[%s6979_s22 + $0x1b8] sm:$0xff] %v4231_v21  ;;  %v5463_v18 = vpop.eup %5462  ;;  %v1917_v45 = vpop.f32.mrf.mxu0  ;;  %v4947_v16 = vpack.c.bf16 %v3349_v48, %v3348_v31  ;;  %5468 = vlog2.f32 %v3101_v17  ;;  %v2530_v27 = vadd.f32 %v7476_v63, %v7645_v46  ;;  %v3002_v60 = vmul.f32 1.442695, %v7673_v42 }
 0x45e   : > { %v2086_v7 = vpop.f32.mrf.mxu1  ;;  %v3514_v4 = vmul.f32 1.442695, %v7681_v39  ;;  %5286 = vst [vmem:[%s7588_s23 + $0x10] sm:$0xff] %v5107_v3   ;;  %v1918_v62 = vadd.f32 %v1917_v45, %v6961_v24  ;;  %2742 = vmatmul.bf16.gmra.mxu3 %v2289_v33  ;;  %3128 = vadd.xlane.f32.xlu0 %v5463_v18 }
 0x45f   : > { %2838 = vmax.xlane.f32.xlu2 %v7687_v29  ;;  %v7693_v8 = vpop.f32.mrf.mxu2  ;;  %5255 = vst [vmem:[%s7581_s29 + $0x10] sm:$0xff] %v4947_v16   ;;  %v7709_v48 = vadd.f32 %v7650_v28, %v2530_v27 }
 0x460   : > { %5470 = vpow2.f32 %v3514_v4  ;;  %v2087_v38 = vadd.f32 %v2086_v7, %v1918_v62  ;;  %v2813_v13 = vpop.xlane.xlu1 %2812 }
 0x461   : > { %v3615_v31 = vpop.xlane.xlu0 %3614  ;;  %v5465_v17 = vpop.eup %5464  ;;  %v7700_v5 = vsub.f32 %v7416_v56, %v2813_v13 }
 0x462   : > { %v3103_v50 = vpop.xlane.xlu2 %3102  ;;  %5472 = vlog2.f32 %v3615_v31  ;;  %v7702_v22 = vpop.f32.mrf.mxu3  ;;  %v4232_v3 = vpack.c.bf16 %v2087_v38, %v8759_v47  ;;  %v3741_v33 = vmul.f32 0.6931472, %v5465_v17 }
 0x463   : > { %8758 = vst [vmem:[#allocation33_spill] sm:$0xff] %v7700_v5  ;;  %v5467_v21 = vpop.eup %5466  ;;  %5474 = vlog2.f32 %v3103_v50  ;;  %v7706_v46 = vmul.f32 0.1, %v7700_v5  ;;  %v3004_v51 = vmul.f32 1.442695, %v7700_v5  ;;  %v8761_v5 = vld [vmem:[#allocation6_spill] sm:$0xff] }
 0x464   : > { %3640 = vadd.xlane.f32.xlu1 %v5467_v21  ;;  %v5469_v36 = vpop.eup %5468  ;;  %4296 = vst [vmem:[%s6979_s22 + $0x1c0] sm:$0xff] %v4232_v3  ;;  %5476 = vpow2.f32 %v3002_v60  ;;  %v3862_v50 = vsub.f32 %v7381_v54, %v3741_v33  ;;  %v2219_v21 = vmax.f32 %v2087_v38, 0.0  ;;  %v8764_v33 = vld [vmem:[#allocation8_spill] sm:$0xff] }
 0x465   : > { %8760 = vst [vmem:[#allocation35_spill] sm:$0xff] %v7706_v46  ;;  %v1919_v18 = vpop.f32.mrf.mxu0  ;;  %v3516_v7 = vmul.f32 1.442695, %v7706_v46  ;;  %v3229_v62 = vmul.f32 0.6931472, %v5469_v36 }
 0x466   : > { %v5471_v56 = vpop.eup %5470  ;;  %v2088_v45 = vpop.f32.mrf.mxu1  ;;  %v1920_v4 = vadd.f32 %v1919_v18, %v6961_v24  ;;  %2840 = vmax.xlane.f32.xlu0 %v7709_v48 }
 0x467   : > { %3642 = vadd.xlane.f32.xlu2 %v5471_v56  ;;  %v7716_v13 = vpop.f32.mrf.mxu2  ;;  %5478 = vpow2.f32 %v3516_v7 }
 0x468   : > { %v5473_v16 = vpop.eup %5472  ;;  %v2089_v27 = vadd.f32 %v2088_v45, %v1920_v4  ;;  %v3617_v31 = vpop.xlane.xlu1 %3616  ;;  %5480 = vpow2.f32 %v3004_v51  ;;  %v8763_v4 = vld [vmem:[#allocation23_spill] sm:$0xff] }
 0x469   : > { %v3743_v28 = vmul.f32 0.6931472, %v5473_v16  ;;  %v3105_v60 = vpop.xlane.xlu0 %3104  ;;  %v5475_v17 = vpop.eup %5474  ;;  %v8762_v16 = vld [vmem:[#allocation21_spill] sm:$0xff] }
 0x46a   : > { %v2815_v47 = vpop.xlane.xlu2 %2814  ;;  %v7719_v3 = vpop.f32.mrf.mxu3  ;;  %v3231_v46 = vmul.f32 0.6931472, %v5475_v17  ;;  %v2221_v56 = vmax.f32 %v2089_v27, 0.0  ;;  %v4233_v7 = vpack.c.bf16 %v2089_v27, %v8761_v5  ;;  %v3350_v45 = vsub.f32 %v8762_v16, %v3229_v62 }
 0x46b   : > { %v5477_v18 = vpop.eup %5476  ;;  %v3863_v36 = vsub.f32 %v7398_v32, %v3743_v28  ;;  %v7725_v51 = vsub.f32 %v7435_v9, %v2815_v47  ;;  %5482 = vlog2.f32 %v3105_v60  ;;  %v2532_v32 = vadd.f32 %v7476_v63, %v7666_v25 }
 0x46c   : > { %3130 = vadd.xlane.f32.xlu1 %v5477_v18  ;;  %v3351_v54 = vsub.f32 %v8763_v4, %v3231_v46  ;;  %4297 = vst [vmem:[%s6979_s22 + $0x1c8] sm:$0xff] %v4233_v7  ;;  %2578 = vmatmul.bf16.gmra.mxu2 %v8764_v33  ;;  %v2291_v17 = vpack.c.bf16 %v2221_v56, %v2219_v21  ;;  %5484 = vlog2.f32 %v3617_v31 }
 0x46d   : > { %v5112_v38 = vpack.c.bf16 %v3863_v36, %v3862_v50  ;;  %v5479_v42 = vpop.eup %5478  ;;  %v3006_v5 = vmul.f32 1.442695, %v7725_v51  ;;  %v7734_v62 = vmul.f32 0.1, %v7725_v51  ;;  %v1922_v9 = vpop.f32.mrf.mxu0  ;;  %v2535_v36 = vadd.f32 %v7476_v63, %v7693_v8 }
 0x46e   : > { %v2091_v28 = vpop.f32.mrf.mxu1  ;;  %v5481_v27 = vpop.eup %5480  ;;  %v4952_v46 = vpack.c.bf16 %v3351_v54, %v3350_v45  ;;  %v1923_v60 = vadd.f32 %v1922_v9, %v6961_v24  ;;  %2747 = vmatmul.bf16.gmra.mxu3 %v2291_v17  ;;  %3644 = vadd.xlane.f32.xlu0 %v5479_v42  ;;  %v7745_v31 = vadd.f32 %v7675_v35, %v2532_v32  ;;  %v8765_v45 = vld [vmem:[#allocation9_spill] sm:$0xff] }
 0x46f   : > { %5287 = vst [vmem:[%s7588_s23 + $0x18] sm:$0xff] %v5112_v38   ;;  %3132 = vadd.xlane.f32.xlu2 %v5481_v27  ;;  %v7738_v50 = vpop.f32.mrf.mxu2  ;;  %5486 = vpow2.f32 %v3006_v5  ;;  %v3518_v18 = vmul.f32 1.442695, %v7734_v62  ;;  %v7759_v38 = vadd.f32 %v7702_v22, %v2535_v36  ;;  %v2537_v27 = vadd.f32 %v7476_v63, %v7716_v13 }
 0x470   : > { %5256 = vst [vmem:[%s7581_s29 + $0x18] sm:$0xff] %v4952_v46   ;;  %v2092_v25 = vadd.f32 %v2091_v28, %v1923_v60  ;;  %v3107_v21 = vpop.xlane.xlu1 %3106 }
 0x471   : > { %v2817_v47 = vpop.xlane.xlu0 %2816  ;;  %5488 = vlog2.f32 %v3107_v21  ;;  %v5483_v16 = vpop.eup %5482 }
 0x472   : > { %v3619_v56 = vpop.xlane.xlu2 %3618  ;;  %v7748_v42 = vsub.f32 %v7448_v44, %v2817_v47  ;;  %v7750_v7 = vpop.f32.mrf.mxu3  ;;  %v4234_v4 = vpack.c.bf16 %v2092_v25, %v8765_v45  ;;  %v3233_v44 = vmul.f32 0.6931472, %v5483_v16  ;;  %v2223_v16 = vmax.f32 %v2092_v25, 0.0  ;;  %v8767_v25 = vld [vmem:[#allocation24_spill] sm:$0xff] }
 0x473   : > { %5490 = vlog2.f32 %v3619_v56  ;;  %v5485_v8 = vpop.eup %5484 }
 0x474   : > { %2842 = vmax.xlane.f32.xlu1 %v7745_v31  ;;  %v7755_v54 = vmul.f32 0.1, %v7748_v42  ;;  %4298 = vst [vmem:[%s6979_s22 + $0x1d0] sm:$0xff] %v4234_v4  ;;  %5492 = vpow2.f32 %v3518_v18  ;;  %v3008_v33 = vmul.f32 1.442695, %v7748_v42  ;;  %v3352_v56 = vsub.f32 %v7409_v57, %v3233_v44 }
 0x475   : > { %v5487_v35 = vpop.eup %5486  ;;  %v1924_v17 = vpop.f32.mrf.mxu0  ;;  %v3745_v46 = vmul.f32 0.6931472, %v5485_v8 }
 0x476   : > { %v2093_v32 = vpop.f32.mrf.mxu1  ;;  %v3520_v5 = vmul.f32 1.442695, %v7755_v54  ;;  %v1925_v9 = vadd.f32 %v1924_v17, %v6961_v24  ;;  %3134 = vadd.xlane.f32.xlu0 %v5487_v35 }
 0x477   : > { %v5489_v28 = vpop.eup %5488  ;;  %2844 = vmax.xlane.f32.xlu2 %v7759_v38  ;;  %v7767_v60 = vpop.f32.mrf.mxu2 }
 0x478   : > { %5494 = vpow2.f32 %v3520_v5  ;;  %v3235_v22 = vmul.f32 0.6931472, %v5489_v28  ;;  %v2094_v21 = vadd.f32 %v2093_v32, %v1925_v9  ;;  %v2819_v47 = vpop.xlane.xlu1 %2818  ;;  %v8766_v32 = vld [vmem:[#allocation12_spill] sm:$0xff]  ;;  %v3864_v28 = vsub.f32 %v7414_v59, %v3745_v46 }
 0x479   : > { %v3621_v18 = vpop.xlane.xlu0 %3620  ;;  %v5491_v36 = vpop.eup %5490  ;;  %v7771_v4 = vsub.f32 %v7467_v2, %v2819_v47  ;;  %5496 = vpow2.f32 %v3008_v33  ;;  %v7782_v2 = vadd.f32 %v7719_v3, %v2537_v27 }
 0x47a   : > { %v3109_v45 = vpop.xlane.xlu2 %3108  ;;  %v7773_v13 = vpop.f32.mrf.mxu3  ;;  %v3747_v35 = vmul.f32 0.6931472, %v5491_v36  ;;  %v3353_v17 = vsub.f32 %v7425_v40, %v3235_v22  ;;  %v2225_v5 = vmax.f32 %v2094_v21, 0.0  ;;  %v4235_v9 = vpack.c.bf16 %v2094_v21, %v8766_v32  ;;  %v8768_v22 = vld [vmem:[#allocation10_spill] sm:$0xff]  ;;  %v8769_v32 = vld [vmem:[#allocation11_spill] sm:$0xff] }
 0x47b   : > { %v5493_v8 = vpop.eup %5492  ;;  %v7779_v57 = vmul.f32 0.1, %v7771_v4  ;;  %5498 = vlog2.f32 %v3621_v18  ;;  %v3010_v40 = vmul.f32 1.442695, %v7771_v4 }
 0x47c   : > { %3646 = vadd.xlane.f32.xlu1 %v5493_v8  ;;  %v3865_v44 = vsub.f32 %v8767_v25, %v3747_v35  ;;  %v4957_v33 = vpack.c.bf16 %v3353_v17, %v3352_v56  ;;  %4299 = vst [vmem:[%s6979_s22 + $0x1d8] sm:$0xff] %v4235_v9  ;;  %2583 = vmatmul.bf16.gmra.mxu2 %v8768_v22  ;;  %5500 = vlog2.f32 %v3109_v45 }
 0x47d   : > { %v2293_v21 = vpack.c.bf16 %v2225_v5, %v2223_v16  ;;  %v1927_v46 = vpop.f32.mrf.mxu0  ;;  %v3522_v36 = vmul.f32 1.442695, %v7779_v57 }
 0x47e   : > { %v5495_v59 = vpop.eup %5494  ;;  %v2096_v47 = vpop.f32.mrf.mxu1  ;;  %v5117_v8 = vpack.c.bf16 %v3865_v44, %v3864_v28  ;;  %5257 = vst [vmem:[%s7581_s29 + $0x20] sm:$0xff] %v4957_v33   ;;  %v1928_v3 = vadd.f32 %v1927_v46, %v6961_v24  ;;  %2846 = vmax.xlane.f32.xlu0 %v7782_v2  ;;  %v2540_v44 = vadd.f32 %v7476_v63, %v7738_v50 }
 0x47f   : > { %2752 = vmatmul.bf16.gmra.mxu3 %v2293_v21  ;;  %v5497_v27 = vpop.eup %5496  ;;  %3648 = vadd.xlane.f32.xlu2 %v5495_v59  ;;  %v7792_v18 = vpop.f32.mrf.mxu2  ;;  %5502 = vpow2.f32 %v3522_v36 }
 0x480   : > { %5288 = vst [vmem:[%s7588_s23 + $0x20] sm:$0xff] %v5117_v8   ;;  %5504 = vpow2.f32 %v3010_v40  ;;  %v2097_v56 = vadd.f32 %v2096_v47, %v1928_v3  ;;  %v3623_v16 = vpop.xlane.xlu1 %3622  ;;  %v7812_v63 = vadd.f32 %v7750_v7, %v2540_v44 }
 0x481   : > { %v3111_v35 = vpop.xlane.xlu0 %3110  ;;  %v5499_v17 = vpop.eup %5498  ;;  %5506 = vlog2.f32 %v3623_v16 }
 0x482   : > { %v2821_v5 = vpop.xlane.xlu2 %2820  ;;  %v7795_v45 = vpop.f32.mrf.mxu3  ;;  %v4236_v9 = vpack.c.bf16 %v2097_v56, %v8769_v32  ;;  %5508 = vlog2.f32 %v3111_v35  ;;  %v3749_v40 = vmul.f32 0.6931472, %v5499_v17  ;;  %v7818_v32 = vld [vmem:[%s8482_s6] ss:$0 sm:$0xff]  ;;  %v2227_v7 = vmax.f32 %v2097_v56, 0.0 }
 0x483   : > { %v7799_v28 = vsub.f32 %v7487_v55, %v2821_v5  ;;  %v5501_v25 = vpop.eup %5500 }
 0x484   : > { %3136 = vadd.xlane.f32.xlu1 %v5497_v27  ;;  %4300 = vst [vmem:[%s6979_s22 + $0x1e0] sm:$0xff] %v4236_v9  ;;  %v3237_v8 = vmul.f32 0.6931472, %v5501_v25  ;;  %v2542_v9 = vadd.f32 %v7818_v32, %v7767_v60  ;;  %v3866_v25 = vsub.f32 %v7446_v49, %v3749_v40  ;;  %v8775_v40 = vld [vmem:[#allocation14_spill] sm:$0xff] }
 0x485   : > { %8770 = vst [vmem:[#allocation36_spill] sm:$0xff] %v7799_v28  ;;  %v5503_v33 = vpop.eup %5502  ;;  %v3012_v22 = vmul.f32 1.442695, %v7799_v28  ;;  %v7806_v21 = vmul.f32 0.1, %v7799_v28  ;;  %v1929_v59 = vpop.f32.mrf.mxu0  ;;  %v8773_v28 = vld [vmem:[#allocation27_spill] sm:$0xff] }
 0x486   : > { %v2098_v46 = vpop.f32.mrf.mxu1  ;;  %v5505_v47 = vpop.eup %5504  ;;  %v1930_v36 = vadd.f32 %v1929_v59, %v6961_v24  ;;  %3650 = vadd.xlane.f32.xlu0 %v5503_v33 }
 0x487   : > { %8771 = vst [vmem:[#allocation39_spill] sm:$0xff] %v7806_v21  ;;  %v5507_v55 = vpop.eup %5506  ;;  %5510 = vpow2.f32 %v3012_v22  ;;  %3138 = vadd.xlane.f32.xlu2 %v5505_v47  ;;  %v7809_v3 = vpop.f32.mrf.mxu2  ;;  %v3524_v17 = vmul.f32 1.442695, %v7806_v21  ;;  %v3354_v21 = vsub.f32 %v8773_v28, %v3237_v8 }
 0x488   : > { %v3751_v50 = vmul.f32 0.6931472, %v5507_v55  ;;  %v2099_v27 = vadd.f32 %v2098_v46, %v1930_v36  ;;  %v3113_v16 = vpop.xlane.xlu1 %3112  ;;  %v5509_v5 = vpop.eup %5508  ;;  %v8772_v36 = vld [vmem:[#allocation13_spill] sm:$0xff] }
 0x489   : > { %v2823_v35 = vpop.xlane.xlu0 %2822  ;;  %v3239_v46 = vmul.f32 0.6931472, %v5509_v5 }
 0x48a   : > { %v3625_v44 = vpop.xlane.xlu2 %3624  ;;  %v7824_v33 = vsub.f32 %v7505_v1, %v2823_v35  ;;  %v7826_v22 = vpop.f32.mrf.mxu3  ;;  %v3867_v59 = vsub.f32 %v7465_v37, %v3751_v50  ;;  %v2229_v47 = vmax.f32 %v2099_v27, 0.0  ;;  %v4237_v55 = vpack.c.bf16 %v2099_v27, %v8772_v36  ;;  %v8774_v1 = vld [vmem:[#allocation25_spill] sm:$0xff] }
 0x48b   : > { %5512 = vlog2.f32 %v3625_v44  ;;  %v3355_v56 = vsub.f32 %v8774_v1, %v3239_v46  ;;  %v7839_v27 = vadd.f32 %v7773_v13, %v2542_v9  ;;  %v2545_v13 = vadd.f32 %v7818_v32, %v7792_v18 }
 0x48c   : > { %2848 = vmax.xlane.f32.xlu1 %v7812_v63  ;;  %v7833_v49 = vmul.f32 0.1, %v7824_v33  ;;  %v5122_v60 = vpack.c.bf16 %v3867_v59, %v3866_v25  ;;  %4301 = vst [vmem:[%s6979_s22 + $0x1e8] sm:$0xff] %v4237_v55  ;;  %2588 = vmatmul.bf16.gmra.mxu2 %v8775_v40  ;;  %v2295_v37 = vpack.c.bf16 %v2229_v47, %v2227_v7  ;;  %5514 = vpow2.f32 %v3524_v17  ;;  %v8776_v55 = vld [vmem:[#allocation17_spill] sm:$0xff] }
 0x48d   : > { %v5511_v50 = vpop.eup %5510  ;;  %v1932_v28 = vpop.f32.mrf.mxu0  ;;  %v4962_v5 = vpack.c.bf16 %v3355_v56, %v3354_v21  ;;  %5516 = vlog2.f32 %v3113_v16  ;;  %v3014_v17 = vmul.f32 1.442695, %v7824_v33  ;;  %v7861_v56 = vadd.f32 %v7795_v45, %v2545_v13 }
 0x48e   : > { %v2101_v8 = vpop.f32.mrf.mxu1  ;;  %v3526_v35 = vmul.f32 1.442695, %v7833_v49  ;;  %5289 = vst [vmem:[%s7588_s23 + $0x28] sm:$0xff] %v5122_v60   ;;  %v1933_v25 = vadd.f32 %v1932_v28, %v6961_v24  ;;  %3140 = vadd.xlane.f32.xlu0 %v5511_v50 }
 0x48f   : > { %2757 = vmatmul.bf16.gmra.mxu3 %v2295_v37  ;;  %2850 = vmax.xlane.f32.xlu2 %v7839_v27  ;;  %v7845_v7 = vpop.f32.mrf.mxu2  ;;  %5258 = vst [vmem:[%s7581_s29 + $0x28] sm:$0xff] %v4962_v5  }
 0x490   : > { %5518 = vpow2.f32 %v3526_v35  ;;  %v2102_v9 = vadd.f32 %v2101_v8, %v1933_v25  ;;  %v2825_v44 = vpop.xlane.xlu1 %2824 }
 0x491   : > { %v3627_v21 = vpop.xlane.xlu0 %3626  ;;  %v5513_v16 = vpop.eup %5512  ;;  %v7852_v46 = vsub.f32 %v7520_v6, %v2825_v44 }
 0x492   : > { %v3115_v59 = vpop.xlane.xlu2 %3114  ;;  %5520 = vlog2.f32 %v3627_v21  ;;  %v7854_v47 = vpop.f32.mrf.mxu3  ;;  %v4238_v60 = vpack.c.bf16 %v2102_v9, %v8776_v55  ;;  %v3753_v37 = vmul.f32 0.6931472, %v5513_v16 }
 0x493   : > { %v5515_v36 = vpop.eup %5514  ;;  %5522 = vlog2.f32 %v3115_v59  ;;  %v7858_v18 = vmul.f32 0.1, %v7852_v46  ;;  %v3016_v6 = vmul.f32 1.442695, %v7852_v46 }
 0x494   : > { %3652 = vadd.xlane.f32.xlu1 %v5515_v36  ;;  %v5517_v1 = vpop.eup %5516  ;;  %5524 = vpow2.f32 %v3014_v17  ;;  %4302 = vst [vmem:[%s6979_s22 + $0x1f0] sm:$0xff] %v4238_v60  ;;  %v3868_v59 = vsub.f32 %v7485_v53, %v3753_v37  ;;  %v2231_v36 = vmax.f32 %v2102_v9, 0.0  ;;  %v8779_v37 = vld [vmem:[#allocation16_spill] sm:$0xff] }
 0x495   : > { %8777 = vst [vmem:[#allocation37_spill] sm:$0xff] %v7858_v18  ;;  %v1934_v50 = vpop.f32.mrf.mxu0  ;;  %v3528_v28 = vmul.f32 1.442695, %v7858_v18  ;;  %v3241_v5 = vmul.f32 0.6931472, %v5517_v1  ;;  %v8778_v18 = vld [vmem:[#allocation15_spill] sm:$0xff] }
 0x496   : > { %v5519_v40 = vpop.eup %5518  ;;  %v1935_v8 = vadd.f32 %v1934_v50, %v6961_v24  ;;  %2852 = vmax.xlane.f32.xlu0 %v7861_v56  ;;  %v2103_v25 = vpop.f32.mrf.mxu1 }
 0x497   : > { %3654 = vadd.xlane.f32.xlu2 %v5519_v40  ;;  %v2551_v44 = vpop.f32.mrf.mxu2  ;;  %5526 = vpow2.f32 %v3528_v28 }
 0x498   : > { %v5521_v35 = vpop.eup %5520  ;;  %5528 = vpow2.f32 %v3016_v6  ;;  %v2104_v13 = vadd.f32 %v2103_v25, %v1935_v8  ;;  %v3629_v17 = vpop.xlane.xlu1 %3628  ;;  %v3356_v6 = vsub.f32 %v7480_v10, %v3241_v5 }
 0x499   : > { %v3755_v45 = vmul.f32 0.6931472, %v5521_v35  ;;  %v3117_v21 = vpop.xlane.xlu0 %3116  ;;  %v5523_v16 = vpop.eup %5522 }
 0x49a   : > { %v2827_v55 = vpop.xlane.xlu2 %2826  ;;  %v7869_v24 = vpop.f32.mrf.mxu3  ;;  %v3243_v50 = vmul.f32 0.6931472, %v5523_v16  ;;  %v2233_v40 = vmax.f32 %v2104_v13, 0.0  ;;  %v4239_v28 = vpack.c.bf16 %v2104_v13, %v8778_v18  ;;  %5530 = vlog2.f32 %v3117_v21 }
 0x49b   : > { %v5525_v60 = vpop.eup %5524  ;;  %v3869_v1 = vsub.f32 %v7502_v26, %v3755_v45  ;;  %v7875_v8 = vsub.f32 %v7537_v12, %v2827_v55  ;;  %v2547_v26 = vadd.f32 %v7818_v32, %v7809_v3  ;;  %5532 = vlog2.f32 %v3629_v17 }
 0x49c   : > { %3142 = vadd.xlane.f32.xlu1 %v5525_v60  ;;  %v3357_v53 = vsub.f32 %v7496_v58, %v3243_v50  ;;  %4303 = vst [vmem:[%s6979_s22 + $0x1f8] sm:$0xff] %v4239_v28  ;;  %2593 = vmatmul.bf16.gmra.mxu2 %v8779_v37  ;;  %v2297_v35 = vpack.c.bf16 %v2233_v40, %v2231_v36  ;;  %s5894_s22 = scalar_lea.hbm %s8484_s8, 1024 }
 0x49d   : > { %v5127_v9 = vpack.c.bf16 %v3869_v1, %v3868_v59  ;;  %v5527_v25 = vpop.eup %5526  ;;  %v3018_v18 = vmul.f32 1.442695, %v7875_v8  ;;  %v7884_v10 = vmul.f32 0.1, %v7875_v8  ;;  %v7890_v16 = vadd.f32 %v7826_v22, %v2547_v26  ;;  %p5896_p1 = scmp.lt.s32.totalorder %s5894_s22, %s5890_s26 }
 0x49e   : > { %v5529_v12 = vpop.eup %5528  ;;  %v4967_v5 = vpack.c.bf16 %v3357_v53, %v3356_v6  ;;  %3656 = vadd.xlane.f32.xlu0 %v5527_v25  ;;  %v2550_v21 = vadd.f32 %v7818_v32, %v7845_v7  ;;  %v2552_v28 = vadd.f32 %v7818_v32, %v2551_v44  ;;  %v8780_v44 = vld [vmem:[#allocation28_spill] sm:$0xff] }
 0x49f   : > { %5290 = vst [vmem:[%s7588_s23 + $0x30] sm:$0xff] %v5127_v9   ;;  %2762 = vmatmul.bf16.gmra.mxu3 %v2297_v35  ;;  %5534 = vpow2.f32 %v3018_v18  ;;  %3144 = vadd.xlane.f32.xlu2 %v5529_v12  ;;  %v2554_v58 = vpop.f32.mrf.mxu2  ;;  %v3530_v45 = vmul.f32 1.442695, %v7884_v10  ;;  %p5897_p2 = por %p5896_p1, %p5895_p0 }
 0x4a0   : > { %5259 = vst [vmem:[%s7581_s29 + $0x30] sm:$0xff] %v4967_v5   ;;  %v3119_v13 = vpop.xlane.xlu1 %3118  ;;  %v5531_v55 = vpop.eup %5530  ;;  %v7904_v1 = vadd.f32 %v7854_v47, %v2550_v21  ;;  %v7917_v21 = vadd.f32 %v7869_v24, %v2552_v28 }
 0x4a1   : > { %v2829_v3 = vpop.xlane.xlu0 %2828  ;;  %5536 = vlog2.f32 %v3119_v13  ;;  %v5533_v22 = vpop.eup %5532  ;;  %v8781_v13 = vld [vmem:[#allocation26_spill] sm:$0xff]  ;;  %p5898_p3 = pnand %p5897_p2, %p5893_p13 }
 0x4a2   : > { %v7895_v59 = vsub.f32 %v7544_v43, %v2829_v3  ;;  %v7897_v17 = vpop.f32.mrf.mxu3  ;;  %v3631_v36 = vpop.xlane.xlu2 %3630  ;;  %5538 = vpow2.f32 %v3530_v45  ;;  %v3245_v43 = vmul.f32 0.6931472, %v5531_v55  ;;  %v3757_v6 = vmul.f32 0.6931472, %v5533_v22  ;;  %v8782_v55 = vld [vmem:[#allocation29_spill] sm:$0xff] }
 0x4a3   : > { %5540 = vlog2.f32 %v3631_v36 }
 0x4a4   : > { %2854 = vmax.xlane.f32.xlu1 %v7890_v16  ;;  %v7901_v60 = vmul.f32 0.1, %v7895_v59  ;;  %v3020_v35 = vmul.f32 1.442695, %v7895_v59  ;;  %v3358_v12 = vsub.f32 %v7513_v52, %v3245_v43  ;;  %v3870_v3 = vsub.f32 %v8781_v13, %v3757_v6 }
 0x4a5   : > { %v5535_v50 = vpop.eup %5534 }
 0x4a6   : > { %v3532_v7 = vmul.f32 1.442695, %v7901_v60  ;;  %3146 = vadd.xlane.f32.xlu0 %v5535_v50 }
 0x4a7   : > { %v5537_v40 = vpop.eup %5536  ;;  %2856 = vmax.xlane.f32.xlu2 %v7904_v1  ;;  %v2556_v53 = vpop.f32.mrf.mxu2 }
 0x4a8   : > { %5542 = vpow2.f32 %v3532_v7  ;;  %v5539_v9 = vpop.eup %5538  ;;  %v3247_v37 = vmul.f32 0.6931472, %v5537_v40  ;;  %v2831_v25 = vpop.xlane.xlu1 %2830 }
 0x4a9   : > { %v5541_v26 = vpop.eup %5540  ;;  %v7911_v47 = vsub.f32 %v7559_v23, %v2831_v25  ;;  %5544 = vpow2.f32 %v3020_v35  ;;  %v2555_v35 = vadd.f32 %v7818_v32, %v2554_v58  ;;  %v2557_v58 = vadd.f32 %v7818_v32, %v2556_v53 }
 0x4aa   : > { %v2725_v18 = vpop.f32.mrf.mxu3  ;;  %v3759_v5 = vmul.f32 0.6931472, %v5541_v26  ;;  %v3359_v45 = vsub.f32 %v8780_v44, %v3247_v37 }
 0x4ab   : > { %v7920_v36 = vmul.f32 0.1, %v7911_v47  ;;  %v3022_v50 = vmul.f32 1.442695, %v7911_v47 }
 0x4ac   : > { %3658 = vadd.xlane.f32.xlu1 %v5539_v9  ;;  %v3871_v23 = vsub.f32 %v8782_v55, %v3759_v5  ;;  %v4972_v22 = vpack.c.bf16 %v3359_v45, %v3358_v12 }
 0x4ad   : > { %v3121_v7 = vpop.xlane.xlu2 %3120  ;;  %v3534_v43 = vmul.f32 1.442695, %v7920_v36 }
 0x4ae   : > { %v5543_v52 = vpop.eup %5542  ;;  %v5132_v40 = vpack.c.bf16 %v3871_v23, %v3870_v3  ;;  %5260 = vst [vmem:[%s7581_s29 + $0x38] sm:$0xff] %v4972_v22   ;;  %2858 = vmax.xlane.f32.xlu0 %v7917_v21  ;;  %v7939_v3 = vadd.f32 %v7897_v17, %v2555_v35 }
 0x4af   : > { %3660 = vadd.xlane.f32.xlu2 %v5543_v52  ;;  %v2559_v24 = vpop.f32.mrf.mxu2  ;;  %v3633_v28 = vpop.xlane.xlu0 %3632  ;;  %5546 = vpow2.f32 %v3534_v43  ;;  %v7946_v52 = vadd.f32 %v2725_v18, %v2557_v58 }
 0x4b0   : > { %5291 = vst [vmem:[%s7588_s23 + $0x38] sm:$0xff] %v5132_v40   ;;  %5548 = vpow2.f32 %v3022_v50  ;;  %v5545_v9 = vpop.eup %5544 }
 0x4b1   : > { %5550 = vlog2.f32 %v3121_v7 }
 0x4b2   : > { %v2728_v6 = vpop.f32.mrf.mxu3  ;;  %5552 = vlog2.f32 %v3633_v28 }
 0x4b4   : > { %3148 = vadd.xlane.f32.xlu1 %v5545_v9 }
 0x4b5   : > { %v5547_v37 = vpop.eup %5546  ;;  %v2833_v25 = vpop.xlane.xlu2 %2832 }
 0x4b6   : > { %v5549_v26 = vpop.eup %5548  ;;  %v7930_v12 = vsub.f32 %v7602_v11, %v2833_v25  ;;  %3662 = vadd.xlane.f32.xlu0 %v5547_v37 }
 0x4b7   : > { %3150 = vadd.xlane.f32.xlu2 %v5549_v26  ;;  %v7932_v5 = vpop.f32.mrf.mxu2  ;;  %v5551_v23 = vpop.eup %5550 }
 0x4b8   : > { %v3024_v44 = vmul.f32 1.442695, %v7930_v12  ;;  %v7936_v45 = vmul.f32 0.1, %v7930_v12  ;;  %v5553_v50 = vpop.eup %5552  ;;  %v3249_v7 = vmul.f32 0.6931472, %v5551_v23 }
 0x4b9   : > { %v3123_v13 = vpop.xlane.xlu0 %3122  ;;  %v3761_v43 = vmul.f32 0.6931472, %v5553_v50 }
 0x4ba   : > { %5554 = vlog2.f32 %v3123_v13  ;;  %v3536_v55 = vmul.f32 1.442695, %v7936_v45  ;;  %v7944_v22 = vpop.f32.mrf.mxu3 }
 0x4bb   : > { %5556 = vpow2.f32 %v3024_v44  ;;  %v3635_v11 = vpop.xlane.xlu1 %3634  ;;  %v8783_v44 = vld [vmem:[#allocation30_spill] sm:$0xff] }
 0x4bc   : > { %2860 = vmax.xlane.f32.xlu1 %v7939_v3  ;;  %5558 = vlog2.f32 %v3635_v11  ;;  %v3360_v18 = vsub.f32 %v8783_v44, %v3249_v7 }
 0x4bd   : > { %5560 = vpow2.f32 %v3536_v55  ;;  %v2560_v55 = vadd.f32 %v7818_v32, %v2559_v24 }
 0x4bf   : > { %2862 = vmax.xlane.f32.xlu2 %v7946_v52  ;;  %v7949_v37 = vpop.f32.mrf.mxu2 }
 0x4c0   : > { %v5555_v17 = vpop.eup %5554 }
 0x4c1   : > { %v5557_v53 = vpop.eup %5556  ;;  %v3251_v40 = vmul.f32 0.6931472, %v5555_v17  ;;  %v2835_v28 = vpop.xlane.xlu0 %2834 }
 0x4c2   : > { %v5559_v9 = vpop.eup %5558  ;;  %v7952_v35 = vsub.f32 %v7636_v14, %v2835_v28  ;;  %3152 = vadd.xlane.f32.xlu0 %v5557_v53  ;;  %v3637_v25 = vpop.xlane.xlu2 %3636  ;;  %v8784_v14 = vld [vmem:[#allocation31_spill] sm:$0xff] }
 0x4c3   : > { %v5561_v26 = vpop.eup %5560  ;;  %v3361_v13 = vsub.f32 %v7573_v30, %v3251_v40  ;;  %v3763_v58 = vmul.f32 0.6931472, %v5559_v9  ;;  %v3125_v11 = vpop.xlane.xlu1 %3124  ;;  %v3872_v17 = vsub.f32 %v8784_v14, %v3761_v43  ;;  %5562 = vlog2.f32 %v3637_v25 }
 0x4c4   : > { %v3026_v23 = vmul.f32 1.442695, %v7952_v35  ;;  %v7959_v50 = vmul.f32 0.1, %v7952_v35  ;;  %3664 = vadd.xlane.f32.xlu1 %v5561_v26  ;;  %v7963_v7 = vpop.f32.mrf.mxu3  ;;  %v7967_v40 = vadd.f32 %v2728_v6, %v2560_v55  ;;  %v2562_v55 = vadd.f32 %v7818_v32, %v7932_v5 }
 0x4c5   : > { %v4977_v53 = vpack.c.bf16 %v3361_v13, %v3360_v18  ;;  %v3873_v28 = vsub.f32 %v7593_v0, %v3763_v58 }
 0x4c6   : > { %5564 = vpow2.f32 %v3026_v23  ;;  %v3538_v30 = vmul.f32 1.442695, %v7959_v50 }
 0x4c7   : > { %5261 = vst [vmem:[%s7581_s29 + $0x40] sm:$0xff] %v4977_v53   ;;  %v5137_v24 = vpack.c.bf16 %v3873_v28, %v3872_v17  ;;  %5566 = vlog2.f32 %v3125_v11  ;;  %v7971_v44 = vpop.f32.mrf.mxu2 }
 0x4c8   : > { %5568 = vpow2.f32 %v3538_v30 }
 0x4c9   : > { %5292 = vst [vmem:[%s7588_s23 + $0x40] sm:$0xff] %v5137_v24   ;;  %v5563_v43 = vpop.eup %5562  ;;  %v3639_v0 = vpop.xlane.xlu0 %3638  ;;  %v7986_v24 = vadd.f32 %v7944_v22, %v2562_v55 }
 0x4ca   : > { %2864 = vmax.xlane.f32.xlu0 %v7967_v40  ;;  %v3127_v9 = vpop.xlane.xlu2 %3126  ;;  %v3765_v53 = vmul.f32 0.6931472, %v5563_v43 }
 0x4cb   : > { %5570 = vlog2.f32 %v3127_v9  ;;  %v2837_v26 = vpop.xlane.xlu1 %2836 }
 0x4cc   : > { %v5565_v25 = vpop.eup %5564  ;;  %v7974_v18 = vsub.f32 %v7658_v61, %v2837_v26  ;;  %5572 = vlog2.f32 %v3639_v0  ;;  %v7982_v14 = vpop.f32.mrf.mxu3 }
 0x4cd   : > { %v5567_v13 = vpop.eup %5566  ;;  %3154 = vadd.xlane.f32.xlu1 %v5565_v25 }
 0x4ce   : > { %v5569_v6 = vpop.eup %5568  ;;  %v3028_v58 = vmul.f32 1.442695, %v7974_v18  ;;  %v7978_v11 = vmul.f32 0.1, %v7974_v18  ;;  %v3253_v23 = vmul.f32 0.6931472, %v5567_v13 }
 0x4cf   : > { %3666 = vadd.xlane.f32.xlu2 %v5569_v6  ;;  %v3874_v6 = vsub.f32 %v7612_v20, %v3765_v53  ;;  %v7996_v55 = vpop.f32.mrf.mxu2 }
 0x4d0   : > { %5574 = vpow2.f32 %v3028_v58  ;;  %v3540_v61 = vmul.f32 1.442695, %v7978_v11  ;;  %v3362_v5 = vsub.f32 %v7605_v19, %v3253_v23 }
 0x4d1   : > { %v5571_v17 = vpop.eup %5570  ;;  %v3129_v0 = vpop.xlane.xlu0 %3128 }
 0x4d2   : > { %v5573_v28 = vpop.eup %5572  ;;  %v3255_v30 = vmul.f32 0.6931472, %v5571_v17  ;;  %5576 = vpow2.f32 %v3540_v61  ;;  %v2839_v26 = vpop.xlane.xlu2 %2838 }
 0x4d3   : > { %v3767_v9 = vmul.f32 0.6931472, %v5573_v28  ;;  %v7991_v13 = vsub.f32 %v7687_v29, %v2839_v26 }
 0x4d4   : > { %v3363_v25 = vsub.f32 %v7624_v41, %v3255_v30  ;;  %v8007_v17 = vpop.f32.mrf.mxu3 }
 0x4d5   : > { %8785 = vst [vmem:[#allocation38_spill] sm:$0xff] %v7991_v13  ;;  %v3875_v43 = vsub.f32 %v7633_v15, %v3767_v9  ;;  %2866 = vmax.xlane.f32.xlu1 %v7986_v24  ;;  %v3030_v61 = vmul.f32 1.442695, %v7991_v13  ;;  %v8000_v19 = vmul.f32 0.1, %v7991_v13  ;;  %v2565_v15 = vadd.f32 %v7818_v32, %v7949_v37  ;;  %v8789_v13 = vld [vmem:[#allocation32_spill] sm:$0xff] }
 0x4d6   : > { %v5575_v22 = vpop.eup %5574  ;;  %v4982_v58 = vpack.c.bf16 %v3363_v25, %v3362_v5 }
 0x4d7   : > { %v5142_v41 = vpack.c.bf16 %v3875_v43, %v3874_v6  ;;  %v3641_v23 = vpop.xlane.xlu1 %3640  ;;  %3156 = vadd.xlane.f32.xlu2 %v5575_v22  ;;  %5578 = vpow2.f32 %v3030_v61  ;;  %v3542_v20 = vmul.f32 1.442695, %v8000_v19  ;;  %v8013_v9 = vadd.f32 %v7963_v7, %v2565_v15  ;;  %v8020_v43 = vpop.f32.mrf.mxu2 }
 0x4d8   : > { %v5577_v29 = vpop.eup %5576  ;;  %5262 = vst [vmem:[%s7581_s29 + $0x48] sm:$0xff] %v4982_v58   ;;  %5580 = vlog2.f32 %v3641_v23  ;;  %v2567_v61 = vadd.f32 %v7818_v32, %v7971_v44 }
 0x4d9   : > { %5293 = vst [vmem:[%s7588_s23 + $0x48] sm:$0xff] %v5142_v41   ;;  %3668 = vadd.xlane.f32.xlu0 %v5577_v29  ;;  %5582 = vpow2.f32 %v3542_v20  ;;  %v2841_v28 = vpop.xlane.xlu0 %2840 }
 0x4da   : > { %5584 = vlog2.f32 %v3129_v0  ;;  %v3643_v53 = vpop.xlane.xlu2 %3642  ;;  %v8010_v30 = vsub.f32 %v7709_v48, %v2841_v28 }
 0x4db   : > { %5586 = vlog2.f32 %v3643_v53 }
 0x4dc   : > { %8786 = vst [vmem:[#allocation40_spill] sm:$0xff] %v8010_v30  ;;  %v8016_v5 = vmul.f32 0.1, %v8010_v30  ;;  %v3032_v6 = vmul.f32 1.442695, %v8010_v30  ;;  %v8025_v20 = vpop.f32.mrf.mxu3 }
 0x4dd   : > { %v5579_v26 = vpop.eup %5578 }
 0x4de   : > { %8787 = vst [vmem:[#allocation41_spill] sm:$0xff] %v8016_v5  ;;  %v5581_v37 = vpop.eup %5580  ;;  %v3544_v48 = vmul.f32 1.442695, %v8016_v5  ;;  %v8788_v5 = vld [vmem:[#allocation34_spill] sm:$0xff] }
 0x4df   : > { %v3131_v25 = vpop.xlane.xlu1 %3130  ;;  %2868 = vmax.xlane.f32.xlu2 %v8013_v9  ;;  %v5583_v0 = vpop.eup %5582  ;;  %v3769_v58 = vmul.f32 0.6931472, %v5581_v37 }
 0x4e0   : > { %5588 = vlog2.f32 %v3131_v25  ;;  %v5585_v22 = vpop.eup %5584  ;;  %3670 = vadd.xlane.f32.xlu1 %v5583_v0 }
 0x4e1   : > { %3158 = vadd.xlane.f32.xlu0 %v5579_v26  ;;  %v5587_v7 = vpop.eup %5586  ;;  %5590 = vpow2.f32 %v3544_v48  ;;  %v3645_v29 = vpop.xlane.xlu0 %3644  ;;  %v3876_v15 = vsub.f32 %v7662_v34, %v3769_v58  ;;  %v3257_v53 = vmul.f32 0.6931472, %v5585_v22  ;;  %v8030_v26 = vadd.f32 %v7982_v14, %v2567_v61 }
 0x4e2   : > { %v3771_v41 = vmul.f32 0.6931472, %v5587_v7  ;;  %5592 = vpow2.f32 %v3032_v6  ;;  %v3133_v23 = vpop.xlane.xlu2 %3132 }
 0x4e3   : > { %v3364_v30 = vsub.f32 %v8788_v5, %v3257_v53  ;;  %5594 = vlog2.f32 %v3133_v23 }
 0x4e4   : > { %v3877_v28 = vsub.f32 %v7681_v39, %v3771_v41  ;;  %v8039_v39 = vpop.f32.mrf.mxu2  ;;  %5596 = vlog2.f32 %v3645_v29  ;;  %v8052_v23 = vpop.f32.mrf.mxu3 }
 0x4e6   : > { %v5589_v37 = vpop.eup %5588  ;;  %v5147_v25 = vpack.c.bf16 %v3877_v28, %v3876_v15 }
 0x4e7   : > { %v3259_v0 = vmul.f32 0.6931472, %v5589_v37  ;;  %v2843_v48 = vpop.xlane.xlu1 %2842  ;;  %v5591_v44 = vpop.eup %5590 }
 0x4e8   : > { %v8033_v6 = vsub.f32 %v7745_v31, %v2843_v48  ;;  %v5593_v7 = vpop.eup %5592  ;;  %5294 = vst [vmem:[%s7588_s23 + $0x50] sm:$0xff] %v5147_v25   ;;  %3672 = vadd.xlane.f32.xlu2 %v5591_v44 }
 0x4e9   : > { %v3365_v34 = vsub.f32 %v8789_v13, %v3259_v0  ;;  %2870 = vmax.xlane.f32.xlu0 %v8030_v26  ;;  %3160 = vadd.xlane.f32.xlu1 %v5593_v7  ;;  %v3135_v5 = vpop.xlane.xlu0 %3134  ;;  %v2570_v13 = vadd.f32 %v7818_v32, %v7996_v55 }
 0x4ea   : > { %v3034_v14 = vmul.f32 1.442695, %v8033_v6  ;;  %v8043_v22 = vmul.f32 0.1, %v8033_v6  ;;  %v2845_v58 = vpop.xlane.xlu2 %2844 }
 0x4eb   : > { %v4987_v31 = vpack.c.bf16 %v3365_v34, %v3364_v30  ;;  %v8048_v61 = vsub.f32 %v7759_v38, %v2845_v58  ;;  %v5595_v30 = vpop.eup %5594  ;;  %v8058_v53 = vadd.f32 %v8007_v17, %v2570_v13 }
 0x4ec   : > { %5598 = vpow2.f32 %v3034_v14  ;;  %v3546_v41 = vmul.f32 1.442695, %v8043_v22  ;;  %v5597_v28 = vpop.eup %5596  ;;  %v3261_v37 = vmul.f32 0.6931472, %v5595_v30  ;;  %v2576_v34 = vpop.f32.mrf.mxu2 }
 0x4ed   : > { %5263 = vst [vmem:[%s7581_s29 + $0x50] sm:$0xff] %v4987_v31   ;;  %5600 = vlog2.f32 %v3135_v5  ;;  %v8055_v15 = vmul.f32 0.1, %v8048_v61  ;;  %v3036_v25 = vmul.f32 1.442695, %v8048_v61  ;;  %v2572_v31 = vadd.f32 %v7818_v32, %v8020_v43  ;;  %v8791_v5 = vld [vmem:[#allocation33_spill] sm:$0xff] }
 0x4ee   : > { %5602 = vpow2.f32 %v3546_v41  ;;  %v3773_v58 = vmul.f32 0.6931472, %v5597_v28  ;;  %v3366_v13 = vsub.f32 %v8791_v5, %v3261_v37  ;;  %v8792_v37 = vld [vmem:[#allocation35_spill] sm:$0xff] }
 0x4ef   : > { %8790 = vst [vmem:[#allocation44_spill] sm:$0xff] %v8055_v15  ;;  %v3647_v29 = vpop.xlane.xlu1 %3646  ;;  %v3548_v55 = vmul.f32 1.442695, %v8055_v15  ;;  %v8076_v28 = vadd.f32 %v8025_v20, %v2572_v31 }
 0x4f0   : > { %5604 = vlog2.f32 %v3647_v29 }
 0x4f1   : > { %2872 = vmax.xlane.f32.xlu1 %v8058_v53  ;;  %5606 = vpow2.f32 %v3548_v55  ;;  %v2847_v44 = vpop.xlane.xlu0 %2846 }
 0x4f2   : > { %v5599_v38 = vpop.eup %5598  ;;  %v3649_v48 = vpop.xlane.xlu2 %3648  ;;  %v8064_v17 = vsub.f32 %v7782_v2, %v2847_v44  ;;  %5608 = vpow2.f32 %v3036_v25 }
 0x4f3   : > { %v5601_v0 = vpop.eup %5600  ;;  %3162 = vadd.xlane.f32.xlu2 %v5599_v38 }
 0x4f4   : > { %v5603_v7 = vpop.eup %5602  ;;  %v3263_v14 = vmul.f32 0.6931472, %v5601_v0  ;;  %v8071_v30 = vmul.f32 0.1, %v8064_v17  ;;  %v3038_v38 = vmul.f32 1.442695, %v8064_v17  ;;  %v2745_v0 = vpop.f32.mrf.mxu3 }
 0x4f5   : > { %3674 = vadd.xlane.f32.xlu0 %v5603_v7 }
 0x4f6   : > { %v3367_v41 = vsub.f32 %v7725_v51, %v3263_v14  ;;  %v5605_v29 = vpop.eup %5604  ;;  %v3550_v43 = vmul.f32 1.442695, %v8071_v30  ;;  %v3878_v51 = vsub.f32 %v8792_v37, %v3773_v58 }
 0x4f7   : > { %v3137_v55 = vpop.xlane.xlu1 %3136  ;;  %v5607_v2 = vpop.eup %5606  ;;  %v3775_v44 = vmul.f32 0.6931472, %v5605_v29 }
 0x4f8   : > { %v4992_v15 = vpack.c.bf16 %v3367_v41, %v3366_v13  ;;  %5610 = vlog2.f32 %v3137_v55  ;;  %v5609_v5 = vpop.eup %5608 }
 0x4f9   : > { %5612 = vlog2.f32 %v3649_v48  ;;  %v3879_v25 = vsub.f32 %v7734_v62, %v3775_v44  ;;  %3676 = vadd.xlane.f32.xlu1 %v5607_v2  ;;  %v3651_v14 = vpop.xlane.xlu0 %3650  ;;  %v2579_v48 = vpop.f32.mrf.mxu2  ;;  %v2575_v62 = vadd.f32 %v7818_v32, %v8039_v39  ;;  %v2577_v39 = vadd.f32 %v7818_v32, %v2576_v34 }
 0x4fa   : > { %5264 = vst [vmem:[%s7581_s29 + $0x58] sm:$0xff] %v4992_v15   ;;  %5614 = vpow2.f32 %v3550_v43  ;;  %v3139_v7 = vpop.xlane.xlu2 %3138 }
 0x4fb   : > { %5616 = vpow2.f32 %v3038_v38  ;;  %2874 = vmax.xlane.f32.xlu2 %v8076_v28  ;;  %v5152_v13 = vpack.c.bf16 %v3879_v25, %v3878_v51  ;;  %v8093_v25 = vadd.f32 %v8052_v23, %v2575_v62 }
 0x4fc   : > { %5618 = vlog2.f32 %v3139_v7  ;;  %v2748_v2 = vpop.f32.mrf.mxu3 }
 0x4fd   : > { %3164 = vadd.xlane.f32.xlu0 %v5609_v5  ;;  %5620 = vlog2.f32 %v3651_v14  ;;  %5295 = vst [vmem:[%s7588_s23 + $0x58] sm:$0xff] %v5152_v13  }
 0x4fe   : > { %v5611_v20 = vpop.eup %5610 }
 0x4ff   : > { %v5613_v31 = vpop.eup %5612  ;;  %v2849_v15 = vpop.xlane.xlu1 %2848  ;;  %v3265_v55 = vmul.f32 0.6931472, %v5611_v20 }
 0x500   : > { %v5615_v58 = vpop.eup %5614  ;;  %v8086_v41 = vsub.f32 %v7812_v63, %v2849_v15  ;;  %v3777_v44 = vmul.f32 0.6931472, %v5613_v31 }
 0x501   : > { %v5617_v29 = vpop.eup %5616  ;;  %v3141_v14 = vpop.xlane.xlu0 %3140  ;;  %v3368_v31 = vsub.f32 %v7748_v42, %v3265_v55 }
 0x502   : > { %v5619_v38 = vpop.eup %5618  ;;  %v3040_v43 = vmul.f32 1.442695, %v8086_v41  ;;  %v8090_v37 = vmul.f32 0.1, %v8086_v41  ;;  %3166 = vadd.xlane.f32.xlu1 %v5617_v29  ;;  %v2851_v63 = vpop.xlane.xlu2 %2850  ;;  %v3880_v34 = vsub.f32 %v7755_v54, %v3777_v44  ;;  %v8108_v29 = vadd.f32 %v2745_v0, %v2577_v39 }
 0x503   : > { %v5621_v51 = vpop.eup %5620  ;;  %v3267_v7 = vmul.f32 0.6931472, %v5619_v38  ;;  %3678 = vadd.xlane.f32.xlu2 %v5615_v58  ;;  %v8097_v13 = vsub.f32 %v7839_v27, %v2851_v63  ;;  %v2581_v38 = vpop.f32.mrf.mxu2  ;;  %v2580_v39 = vadd.f32 %v7818_v32, %v2579_v48 }
 0x504   : > { %5622 = vpow2.f32 %v3040_v43  ;;  %v3779_v5 = vmul.f32 0.6931472, %v5621_v51  ;;  %v3552_v20 = vmul.f32 1.442695, %v8090_v37  ;;  %v2750_v0 = vpop.f32.mrf.mxu3 }
 0x505   : > { %v3369_v23 = vsub.f32 %v7771_v4, %v3267_v7  ;;  %2876 = vmax.xlane.f32.xlu0 %v8093_v25  ;;  %v8106_v15 = vmul.f32 0.1, %v8097_v13  ;;  %v3042_v54 = vmul.f32 1.442695, %v8097_v13 }
 0x506   : > { %v3881_v62 = vsub.f32 %v7779_v57, %v3779_v5  ;;  %5624 = vpow2.f32 %v3552_v20 }
 0x507   : > { %v4997_v58 = vpack.c.bf16 %v3369_v23, %v3368_v31  ;;  %v3653_v27 = vpop.xlane.xlu1 %3652  ;;  %v3554_v42 = vmul.f32 1.442695, %v8106_v15 }
 0x508   : > { %v5157_v43 = vpack.c.bf16 %v3881_v62, %v3880_v34  ;;  %5626 = vlog2.f32 %v3653_v27  ;;  %v8124_v34 = vadd.f32 %v2748_v2, %v2580_v39  ;;  %v2582_v39 = vadd.f32 %v7818_v32, %v2581_v38 }
 0x509   : > { %5265 = vst [vmem:[%s7581_s29 + $0x60] sm:$0xff] %v4997_v58   ;;  %5628 = vpow2.f32 %v3554_v42  ;;  %v2853_v55 = vpop.xlane.xlu0 %2852 }
 0x50a   : > { %v5623_v4 = vpop.eup %5622  ;;  %5296 = vst [vmem:[%s7588_s23 + $0x60] sm:$0xff] %v5157_v43   ;;  %2878 = vmax.xlane.f32.xlu1 %v8108_v29  ;;  %5630 = vlog2.f32 %v3141_v14  ;;  %v3655_v57 = vpop.xlane.xlu2 %3654  ;;  %v8116_v51 = vsub.f32 %v7861_v56, %v2853_v55  ;;  %v8140_v38 = vadd.f32 %v2750_v0, %v2582_v39 }
 0x50b   : > { %3168 = vadd.xlane.f32.xlu2 %v5623_v4  ;;  %5632 = vlog2.f32 %v3655_v57  ;;  %v2584_v58 = vpop.f32.mrf.mxu2  ;;  %v8795_v4 = vld [vmem:[#allocation39_spill] sm:$0xff] }
 0x50c   : > { %v5625_v44 = vpop.eup %5624  ;;  %8793 = vst [vmem:[#allocation42_spill] sm:$0xff] %v8116_v51  ;;  %5634 = vpow2.f32 %v3042_v54  ;;  %v8120_v7 = vmul.f32 0.1, %v8116_v51  ;;  %v3044_v14 = vmul.f32 1.442695, %v8116_v51 }
 0x50d   : > { %3680 = vadd.xlane.f32.xlu0 %v5625_v44  ;;  %v2753_v44 = vpop.f32.mrf.mxu3 }
 0x50e   : > { %8794 = vst [vmem:[#allocation43_spill] sm:$0xff] %v8120_v7  ;;  %v5627_v63 = vpop.eup %5626  ;;  %v3556_v31 = vmul.f32 1.442695, %v8120_v7  ;;  %v8796_v7 = vld [vmem:[#allocation36_spill] sm:$0xff] }
 0x50f   : > { %v3143_v5 = vpop.xlane.xlu1 %3142  ;;  %v5629_v20 = vpop.eup %5628  ;;  %v3781_v56 = vmul.f32 0.6931472, %v5627_v63 }
 0x510   : > { %5636 = vlog2.f32 %v3143_v5  ;;  %v5631_v23 = vpop.eup %5630 }
 0x511   : > { %v5633_v62 = vpop.eup %5632  ;;  %5638 = vpow2.f32 %v3556_v31  ;;  %v3657_v43 = vpop.xlane.xlu0 %3656  ;;  %v3882_v54 = vsub.f32 %v8795_v4, %v3781_v56  ;;  %v3269_v57 = vmul.f32 0.6931472, %v5631_v23 }
 0x512   : > { %3682 = vadd.xlane.f32.xlu1 %v5629_v20  ;;  %v3783_v48 = vmul.f32 0.6931472, %v5633_v62  ;;  %5640 = vpow2.f32 %v3044_v14  ;;  %v3145_v27 = vpop.xlane.xlu2 %3144  ;;  %v5635_v42 = vpop.eup %5634 }
 0x513   : > { %2880 = vmax.xlane.f32.xlu2 %v8124_v34  ;;  %v3370_v51 = vsub.f32 %v8796_v7, %v3269_v57  ;;  %5642 = vlog2.f32 %v3145_v27  ;;  %v2585_v7 = vadd.f32 %v7818_v32, %v2584_v58  ;;  %v2586_v4 = vpop.f32.mrf.mxu2 }
 0x514   : > { %v3883_v55 = vsub.f32 %v7833_v49, %v3783_v48  ;;  %5644 = vlog2.f32 %v3657_v43 }
 0x515   : > { %3170 = vadd.xlane.f32.xlu0 %v5635_v42  ;;  %v2755_v32 = vpop.f32.mrf.mxu3 }
 0x516   : > { %v5637_v2 = vpop.eup %5636  ;;  %v5162_v63 = vpack.c.bf16 %v3883_v55, %v3882_v54  ;;  %v8152_v54 = vadd.f32 %v2753_v44, %v2585_v7 }
 0x517   : > { %v3271_v5 = vmul.f32 0.6931472, %v5637_v2  ;;  %v2855_v20 = vpop.xlane.xlu1 %2854  ;;  %v5639_v14 = vpop.eup %5638 }
 0x518   : > { %v8131_v31 = vsub.f32 %v7890_v16, %v2855_v20  ;;  %v5641_v62 = vpop.eup %5640  ;;  %5297 = vst [vmem:[%s7588_s23 + $0x68] sm:$0xff] %v5162_v63  }
 0x519   : > { %v3371_v23 = vsub.f32 %v7824_v33, %v3271_v5  ;;  %v3147_v42 = vpop.xlane.xlu0 %3146 }
 0x51a   : > { %v3046_v49 = vmul.f32 1.442695, %v8131_v31  ;;  %v8138_v56 = vmul.f32 0.1, %v8131_v31  ;;  %3172 = vadd.xlane.f32.xlu1 %v5641_v62  ;;  %v2857_v16 = vpop.xlane.xlu2 %2856  ;;  %v8163_v62 = vld [vmem:[%s8482_s6] ss:$0 sm:$0xff] }
 0x51b   : > { %v5002_v48 = vpack.c.bf16 %v3371_v23, %v3370_v51  ;;  %3684 = vadd.xlane.f32.xlu2 %v5639_v14  ;;  %v8144_v33 = vsub.f32 %v7904_v1, %v2857_v16  ;;  %v5643_v51 = vpop.eup %5642  ;;  %v2587_v23 = vadd.f32 %v8163_v62, %v2586_v4 }
 0x51c   : > { %5646 = vpow2.f32 %v3046_v49  ;;  %v3558_v27 = vmul.f32 1.442695, %v8138_v56  ;;  %v5645_v57 = vpop.eup %5644  ;;  %v3273_v55 = vmul.f32 0.6931472, %v5643_v51 }
 0x51d   : > { %5266 = vst [vmem:[%s7581_s29 + $0x68] sm:$0xff] %v5002_v48   ;;  %2882 = vmax.xlane.f32.xlu0 %v8140_v38  ;;  %5648 = vlog2.f32 %v3147_v42  ;;  %v8150_v0 = vmul.f32 0.1, %v8144_v33  ;;  %v3048_v2 = vmul.f32 1.442695, %v8144_v33  ;;  %v2589_v48 = vpop.f32.mrf.mxu2 }
 0x51e   : > { %5650 = vpow2.f32 %v3558_v27  ;;  %v3785_v49 = vmul.f32 0.6931472, %v5645_v57  ;;  %v3372_v16 = vsub.f32 %v7852_v46, %v3273_v55  ;;  %v8173_v57 = vadd.f32 %v2755_v32, %v2587_v23  ;;  %v2758_v46 = vpop.f32.mrf.mxu3  ;;  %v8797_v55 = vld [vmem:[#allocation37_spill] sm:$0xff] }
 0x51f   : > { %v3659_v43 = vpop.xlane.xlu1 %3658  ;;  %v3560_v58 = vmul.f32 1.442695, %v8150_v0  ;;  %v2590_v23 = vadd.f32 %v8163_v62, %v2589_v48 }
 0x520   : > { %5652 = vlog2.f32 %v3659_v43 }
 0x521   : > { %5654 = vpow2.f32 %v3560_v58  ;;  %v2859_v5 = vpop.xlane.xlu0 %2858 }
 0x522   : > { %v5647_v1 = vpop.eup %5646  ;;  %2884 = vmax.xlane.f32.xlu1 %v8152_v54  ;;  %v3661_v63 = vpop.xlane.xlu2 %3660  ;;  %v8158_v44 = vsub.f32 %v7917_v21, %v2859_v5  ;;  %5656 = vpow2.f32 %v3048_v2 }
 0x523   : > { %v5649_v39 = vpop.eup %5648  ;;  %3174 = vadd.xlane.f32.xlu2 %v5647_v1 }
 0x524   : > { %v5651_v20 = vpop.eup %5650  ;;  %v3275_v14 = vmul.f32 0.6931472, %v5649_v39  ;;  %v8169_v7 = vmul.f32 0.1, %v8158_v44  ;;  %v3050_v51 = vmul.f32 1.442695, %v8158_v44 }
 0x525   : > { %3686 = vadd.xlane.f32.xlu0 %v5651_v20 }
 0x526   : > { %v3373_v42 = vsub.f32 %v7875_v8, %v3275_v14  ;;  %v5653_v21 = vpop.eup %5652  ;;  %v3562_v4 = vmul.f32 1.442695, %v8169_v7  ;;  %v3884_v8 = vsub.f32 %v8797_v55, %v3785_v49  ;;  %v8188_v55 = vadd.f32 %v2758_v46, %v2590_v23 }
 0x527   : > { %v3149_v27 = vpop.xlane.xlu1 %3148  ;;  %v5655_v43 = vpop.eup %5654  ;;  %v3787_v58 = vmul.f32 0.6931472, %v5653_v21 }
 0x528   : > { %v5007_v1 = vpack.c.bf16 %v3373_v42, %v3372_v16  ;;  %5658 = vlog2.f32 %v3149_v27  ;;  %v5657_v20 = vpop.eup %5656  ;;  %v2591_v16 = vpop.f32.mrf.mxu2 }
 0x529   : > { %5660 = vlog2.f32 %v3661_v63  ;;  %v3885_v2 = vsub.f32 %v7884_v10, %v3787_v58  ;;  %v3663_v5 = vpop.xlane.xlu0 %3662  ;;  %v2592_v48 = vadd.f32 %v8163_v62, %v2591_v16 }
 0x52a   : > { %5267 = vst [vmem:[%s7581_s29 + $0x70] sm:$0xff] %v5007_v1   ;;  %5662 = vpow2.f32 %v3562_v4  ;;  %3688 = vadd.xlane.f32.xlu1 %v5655_v43  ;;  %v3151_v39 = vpop.xlane.xlu2 %3150 }
 0x52b   : > { %5664 = vpow2.f32 %v3050_v51  ;;  %2886 = vmax.xlane.f32.xlu2 %v8173_v57  ;;  %v5167_v14 = vpack.c.bf16 %v3885_v2, %v3884_v8 }
 0x52c   : > { %5666 = vlog2.f32 %v3151_v39 }
 0x52d   : > { %3176 = vadd.xlane.f32.xlu0 %v5657_v20  ;;  %5668 = vlog2.f32 %v3663_v5  ;;  %5298 = vst [vmem:[%s7588_s23 + $0x70] sm:$0xff] %v5167_v14  }
 0x52e   : > { %v5659_v32 = vpop.eup %5658 }
 0x52f   : > { %v5661_v63 = vpop.eup %5660  ;;  %v2861_v49 = vpop.xlane.xlu1 %2860  ;;  %v3277_v27 = vmul.f32 0.6931472, %v5659_v32 }
 0x530   : > { %v5663_v10 = vpop.eup %5662  ;;  %v8182_v42 = vsub.f32 %v7939_v3, %v2861_v49  ;;  %v3789_v43 = vmul.f32 0.6931472, %v5661_v63  ;;  %v2760_v3 = vpop.f32.mrf.mxu3 }
 0x531   : > { %v5665_v21 = vpop.eup %5664  ;;  %v3374_v14 = vsub.f32 %v7895_v59, %v3277_v27  ;;  %v2594_v27 = vpop.f32.mrf.mxu2 }
 0x532   : > { %v5667_v51 = vpop.eup %5666  ;;  %v3052_v58 = vmul.f32 1.442695, %v8182_v42  ;;  %v8186_v1 = vmul.f32 0.1, %v8182_v42  ;;  %3178 = vadd.xlane.f32.xlu1 %v5665_v21  ;;  %v2863_v2 = vpop.xlane.xlu2 %2862  ;;  %v3886_v63 = vsub.f32 %v7901_v60, %v3789_v43 }
 0x533   : > { %v5669_v4 = vpop.eup %5668  ;;  %v3279_v8 = vmul.f32 0.6931472, %v5667_v51  ;;  %3690 = vadd.xlane.f32.xlu2 %v5663_v10  ;;  %v8193_v20 = vsub.f32 %v7946_v52, %v2863_v2  ;;  %v8203_v52 = vadd.f32 %v2760_v3, %v2592_v48 }
 0x534   : > { %5670 = vpow2.f32 %v3052_v58  ;;  %v3564_v39 = vmul.f32 1.442695, %v8186_v1  ;;  %v3791_v5 = vmul.f32 0.6931472, %v5669_v4 }
 0x535   : > { %v3375_v46 = vsub.f32 %v7911_v47, %v3279_v8  ;;  %2888 = vmax.xlane.f32.xlu0 %v8188_v55  ;;  %v3153_v32 = vpop.xlane.xlu0 %3152  ;;  %v8201_v49 = vmul.f32 0.1, %v8193_v20  ;;  %v3054_v51 = vmul.f32 1.442695, %v8193_v20 }
 0x536   : > { %5672 = vpow2.f32 %v3564_v39  ;;  %v3887_v23 = vsub.f32 %v7920_v36, %v3791_v5  ;;  %v2595_v36 = vadd.f32 %v8163_v62, %v2594_v27 }
 0x537   : > { %v5012_v10 = vpack.c.bf16 %v3375_v46, %v3374_v14  ;;  %v3665_v16 = vpop.xlane.xlu1 %3664  ;;  %v3566_v59 = vmul.f32 1.442695, %v8201_v49 }
 0x538   : > { %v5172_v21 = vpack.c.bf16 %v3887_v23, %v3886_v63  ;;  %v2763_v58 = vpop.f32.mrf.mxu3 }
 0x539   : > { %5268 = vst [vmem:[%s7581_s29 + $0x78] sm:$0xff] %v5012_v10   ;;  %5674 = vpow2.f32 %v3566_v59  ;;  %v8218_v39 = vadd.f32 %v2763_v58, %v2595_v36 }
 0x53a   : > { %v5671_v47 = vpop.eup %5670  ;;  %5299 = vst [vmem:[%s7588_s23 + $0x78] sm:$0xff] %v5172_v21   ;;  %2890 = vmax.xlane.f32.xlu1 %v8203_v52  ;;  %5676 = vlog2.f32 %v3153_v32  ;;  %v2596_v32 = vpop.f32.mrf.mxu2 }
 0x53b   : > { %3180 = vadd.xlane.f32.xlu2 %v5671_v47  ;;  %5678 = vpow2.f32 %v3054_v51 }
 0x53c   : > { %v5673_v60 = vpop.eup %5672  ;;  %5680 = vlog2.f32 %v3665_v16  ;;  %v2597_v16 = vadd.f32 %v8163_v62, %v2596_v32 }
 0x53d   : > { %3692 = vadd.xlane.f32.xlu0 %v5673_v60  ;;  %v2865_v43 = vpop.xlane.xlu0 %2864 }
 0x53e   : > { %v8212_v4 = vsub.f32 %v7967_v40, %v2865_v43 }
 0x53f   : > { %v5675_v48 = vpop.eup %5674 }
 0x540   : > { %v3056_v8 = vmul.f32 1.442695, %v8212_v4  ;;  %v8216_v2 = vmul.f32 0.1, %v8212_v4  ;;  %v3155_v3 = vpop.xlane.xlu1 %3154  ;;  %v5677_v46 = vpop.eup %5676 }
 0x541   : > { %5682 = vlog2.f32 %v3155_v3  ;;  %v5679_v40 = vpop.eup %5678  ;;  %v3281_v23 = vmul.f32 0.6931472, %v5677_v46  ;;  %v2765_v59 = vpop.f32.mrf.mxu3 }
 0x542   : > { %5684 = vpow2.f32 %v3056_v8  ;;  %v3568_v5 = vmul.f32 1.442695, %v8216_v2  ;;  %3694 = vadd.xlane.f32.xlu1 %v5675_v48  ;;  %v3667_v14 = vpop.xlane.xlu2 %3666  ;;  %v5681_v63 = vpop.eup %5680  ;;  %v8228_v62 = vadd.f32 %v2765_v59, %v2597_v16 }
 0x543   : > { %2892 = vmax.xlane.f32.xlu2 %v8218_v39  ;;  %5686 = vlog2.f32 %v3667_v14  ;;  %v3793_v47 = vmul.f32 0.6931472, %v5681_v63  ;;  %v3376_v58 = vsub.f32 %v7930_v12, %v3281_v23 }
 0x544   : > { %5688 = vpow2.f32 %v3568_v5 }
 0x545   : > { %3182 = vadd.xlane.f32.xlu0 %v5679_v40 }
 0x547   : > { %v5683_v10 = vpop.eup %5682 }
 0x548   : > { %v5685_v21 = vpop.eup %5684  ;;  %v3283_v27 = vmul.f32 0.6931472, %v5683_v10  ;;  %v2867_v51 = vpop.xlane.xlu1 %2866 }
 0x549   : > { %v5687_v60 = vpop.eup %5686  ;;  %v8224_v36 = vsub.f32 %v7986_v24, %v2867_v51  ;;  %v3888_v24 = vsub.f32 %v7936_v45, %v3793_v47 }
 0x54a   : > { %v5689_v43 = vpop.eup %5688  ;;  %v3377_v48 = vsub.f32 %v7952_v35, %v3283_v27  ;;  %v3795_v8 = vmul.f32 0.6931472, %v5687_v60  ;;  %v3157_v3 = vpop.xlane.xlu2 %3156  ;;  %3184 = vadd.xlane.f32.xlu1 %v5685_v21 }
 0x54b   : > { %v3058_v5 = vmul.f32 1.442695, %v8224_v36  ;;  %v8232_v14 = vmul.f32 0.1, %v8224_v36  ;;  %3696 = vadd.xlane.f32.xlu2 %v5689_v43 }
 0x54c   : > { %v5017_v46 = vpack.c.bf16 %v3377_v48, %v3376_v58  ;;  %v3889_v12 = vsub.f32 %v7959_v50, %v3795_v8  ;;  %v3669_v40 = vpop.xlane.xlu0 %3668 }
 0x54d   : > { %5690 = vpow2.f32 %v3058_v5  ;;  %v3570_v35 = vmul.f32 1.442695, %v8232_v14  ;;  %2894 = vmax.xlane.f32.xlu0 %v8228_v62 }
 0x54e   : > { %5269 = vst [vmem:[%s7581_s29 + $0x80] sm:$0xff] %v5017_v46   ;;  %v5177_v32 = vpack.c.bf16 %v3889_v12, %v3888_v24 }
 0x54f   : > { %5692 = vpow2.f32 %v3570_v35 }
 0x550   : > { %5300 = vst [vmem:[%s7588_s23 + $0x80] sm:$0xff] %v5177_v32   ;;  %5694 = vlog2.f32 %v3669_v40 }
 0x551   : > { %5696 = vlog2.f32 %v3157_v3 }
 0x552   : > { %v2869_v63 = vpop.xlane.xlu2 %2868 }
 0x553   : > { %v5691_v23 = vpop.eup %5690  ;;  %v8241_v10 = vsub.f32 %v8013_v9, %v2869_v63  ;;  %v3671_v45 = vpop.xlane.xlu1 %3670 }
 0x554   : > { %3186 = vadd.xlane.f32.xlu2 %v5691_v23  ;;  %v3159_v50 = vpop.xlane.xlu0 %3158  ;;  %5698 = vlog2.f32 %v3671_v45  ;;  %v8798_v23 = vld [vmem:[#allocation38_spill] sm:$0xff] }
 0x555   : > { %v5693_v16 = vpop.eup %5692  ;;  %v3060_v21 = vmul.f32 1.442695, %v8241_v10  ;;  %v8245_v59 = vmul.f32 0.1, %v8241_v10  ;;  %5700 = vlog2.f32 %v3159_v50 }
 0x556   : > { %3698 = vadd.xlane.f32.xlu0 %v5693_v16  ;;  %v5695_v47 = vpop.eup %5694 }
 0x557   : > { %5702 = vpow2.f32 %v3060_v21  ;;  %v3572_v27 = vmul.f32 1.442695, %v8245_v59  ;;  %v5697_v51 = vpop.eup %5696  ;;  %v3797_v9 = vmul.f32 0.6931472, %v5695_v47 }
 0x558   : > { %v3285_v43 = vmul.f32 0.6931472, %v5697_v51 }
 0x559   : > { %5704 = vpow2.f32 %v3572_v27  ;;  %v3890_v40 = vsub.f32 %v7978_v11, %v3797_v9 }
 0x55a   : > { %v5699_v60 = vpop.eup %5698  ;;  %v3378_v63 = vsub.f32 %v7974_v18, %v3285_v43 }
 0x55b   : > { %v5701_v58 = vpop.eup %5700  ;;  %v3799_v48 = vmul.f32 0.6931472, %v5699_v60  ;;  %v3673_v8 = vpop.xlane.xlu2 %3672 }
 0x55c   : > { %v2871_v3 = vpop.xlane.xlu0 %2870  ;;  %v3287_v24 = vmul.f32 0.6931472, %v5701_v58  ;;  %v3161_v46 = vpop.xlane.xlu1 %3160 }
 0x55d   : > { %v5703_v5 = vpop.eup %5702  ;;  %v8249_v12 = vsub.f32 %v8030_v26, %v2871_v3  ;;  %v3891_v35 = vsub.f32 %v8000_v19, %v3799_v48 }
 0x55e   : > { %3188 = vadd.xlane.f32.xlu0 %v5703_v5  ;;  %v3379_v45 = vsub.f32 %v8798_v23, %v3287_v24 }
 0x55f   : > { %v5705_v32 = vpop.eup %5704  ;;  %v3062_v50 = vmul.f32 1.442695, %v8249_v12  ;;  %v8257_v16 = vmul.f32 0.1, %v8249_v12  ;;  %v5182_v21 = vpack.c.bf16 %v3891_v35, %v3890_v40 }
 0x560   : > { %3700 = vadd.xlane.f32.xlu1 %v5705_v32  ;;  %v5022_v26 = vpack.c.bf16 %v3379_v45, %v3378_v63  ;;  %v8799_v63 = vld [vmem:[#allocation40_spill] sm:$0xff] }
 0x561   : > { %5706 = vpow2.f32 %v3062_v50  ;;  %v3574_v47 = vmul.f32 1.442695, %v8257_v16  ;;  %5301 = vst [vmem:[%s7588_s23 + $0x88] sm:$0xff] %v5182_v21  }
 0x562   : > { %5708 = vlog2.f32 %v3161_v46  ;;  %5270 = vst [vmem:[%s7581_s29 + $0x88] sm:$0xff] %v5022_v26  }
 0x563   : > { %5710 = vpow2.f32 %v3574_v47 }
 0x564   : > { %5712 = vlog2.f32 %v3673_v8  ;;  %v2873_v11 = vpop.xlane.xlu1 %2872 }
 0x565   : > { %v8263_v19 = vsub.f32 %v8058_v53, %v2873_v11 }
 0x566   : > { %v3163_v18 = vpop.xlane.xlu2 %3162 }
 0x567   : > { %v5707_v27 = vpop.eup %5706  ;;  %5714 = vlog2.f32 %v3163_v18  ;;  %v3064_v9 = vmul.f32 1.442695, %v8263_v19  ;;  %v8267_v60 = vmul.f32 0.1, %v8263_v19 }
 0x568   : > { %v5709_v51 = vpop.eup %5708  ;;  %v3675_v43 = vpop.xlane.xlu0 %3674  ;;  %3190 = vadd.xlane.f32.xlu1 %v5707_v27  ;;  %v8800_v27 = vld [vmem:[#allocation41_spill] sm:$0xff] }
 0x569   : > { %v5711_v58 = vpop.eup %5710  ;;  %5716 = vlog2.f32 %v3675_v43  ;;  %v3576_v48 = vmul.f32 1.442695, %v8267_v60  ;;  %v3289_v3 = vmul.f32 0.6931472, %v5709_v51 }
 0x56a   : > { %3702 = vadd.xlane.f32.xlu2 %v5711_v58  ;;  %v5713_v8 = vpop.eup %5712  ;;  %5718 = vpow2.f32 %v3064_v9 }
 0x56b   : > { %5720 = vpow2.f32 %v3576_v48  ;;  %v3801_v24 = vmul.f32 0.6931472, %v5713_v8  ;;  %v3380_v23 = vsub.f32 %v8799_v63, %v3289_v3 }
 0x56c   : > { %v3677_v5 = vpop.xlane.xlu1 %3676 }
 0x56d   : > { %v5715_v53 = vpop.eup %5714  ;;  %v3892_v51 = vsub.f32 %v8800_v27, %v3801_v24 }
 0x56e   : > { %v3291_v46 = vmul.f32 0.6931472, %v5715_v53  ;;  %v2875_v40 = vpop.xlane.xlu2 %2874 }
 0x56f   : > { %v5717_v35 = vpop.eup %5716  ;;  %v8271_v32 = vsub.f32 %v8076_v28, %v2875_v40 }
 0x570   : > { %v3381_v45 = vsub.f32 %v8033_v6, %v3291_v46  ;;  %v3803_v50 = vmul.f32 0.6931472, %v5717_v35  ;;  %v3165_v21 = vpop.xlane.xlu0 %3164  ;;  %v5719_v26 = vpop.eup %5718 }
 0x571   : > { %v3066_v47 = vmul.f32 1.442695, %v8271_v32  ;;  %v8277_v11 = vmul.f32 0.1, %v8271_v32  ;;  %v5721_v18 = vpop.eup %5720  ;;  %5722 = vlog2.f32 %v3165_v21 }
 0x572   : > { %v5027_v9 = vpack.c.bf16 %v3381_v45, %v3380_v23  ;;  %v3893_v28 = vsub.f32 %v8043_v22, %v3803_v50  ;;  %3192 = vadd.xlane.f32.xlu2 %v5719_v26  ;;  %5724 = vlog2.f32 %v3677_v5  ;;  %3704 = vadd.xlane.f32.xlu0 %v5721_v18 }
 0x573   : > { %v3578_v43 = vmul.f32 1.442695, %v8277_v11  ;;  %5726 = vpow2.f32 %v3066_v47 }
 0x574   : > { %5271 = vst [vmem:[%s7581_s29 + $0x90] sm:$0xff] %v5027_v9   ;;  %v5187_v6 = vpack.c.bf16 %v3893_v28, %v3892_v51  ;;  %v8801_v9 = vld [vmem:[#allocation44_spill] sm:$0xff] }
 0x575   : > { %5728 = vpow2.f32 %v3578_v43  ;;  %v3167_v58 = vpop.xlane.xlu1 %3166 }
 0x576   : > { %5302 = vst [vmem:[%s7588_s23 + $0x90] sm:$0xff] %v5187_v6   ;;  %v3679_v48 = vpop.xlane.xlu2 %3678  ;;  %5730 = vlog2.f32 %v3167_v58 }
 0x577   : > { %5732 = vlog2.f32 %v3679_v48  ;;  %v5723_v8 = vpop.eup %5722 }
 0x578   : > { %v2877_v3 = vpop.xlane.xlu0 %2876  ;;  %v5725_v53 = vpop.eup %5724  ;;  %v3293_v40 = vmul.f32 0.6931472, %v5723_v8 }
 0x579   : > { %v8285_v22 = vsub.f32 %v8093_v25, %v2877_v3  ;;  %v5727_v24 = vpop.eup %5726  ;;  %v3805_v23 = vmul.f32 0.6931472, %v5725_v53 }
 0x57a   : > { %3194 = vadd.xlane.f32.xlu0 %v5727_v24  ;;  %v3382_v27 = vsub.f32 %v8048_v61, %v3293_v40 }
 0x57b   : > { %v5729_v46 = vpop.eup %5728  ;;  %v3068_v5 = vmul.f32 1.442695, %v8285_v22  ;;  %v8289_v35 = vmul.f32 0.1, %v8285_v22  ;;  %v3894_v28 = vsub.f32 %v8801_v9, %v3805_v23 }
 0x57c   : > { %v5731_v63 = vpop.eup %5730  ;;  %3706 = vadd.xlane.f32.xlu1 %v5729_v46 }
 0x57d   : > { %v5733_v45 = vpop.eup %5732  ;;  %v3295_v50 = vmul.f32 0.6931472, %v5731_v63  ;;  %5734 = vpow2.f32 %v3068_v5  ;;  %v3580_v21 = vmul.f32 1.442695, %v8289_v35  ;;  %v2879_v26 = vpop.xlane.xlu1 %2878 }
 0x57e   : > { %v3807_v25 = vmul.f32 0.6931472, %v5733_v45  ;;  %v3169_v47 = vpop.xlane.xlu2 %3168  ;;  %v8293_v18 = vsub.f32 %v8108_v29, %v2879_v26 }
 0x57f   : > { %v3383_v51 = vsub.f32 %v8064_v17, %v3295_v50  ;;  %5736 = vpow2.f32 %v3580_v21 }
 0x580   : > { %v3895_v43 = vsub.f32 %v8071_v30, %v3807_v25  ;;  %v8300_v6 = vmul.f32 0.1, %v8293_v18  ;;  %v3681_v58 = vpop.xlane.xlu0 %3680  ;;  %v3070_v61 = vmul.f32 1.442695, %v8293_v18 }
 0x581   : > { %v5032_v48 = vpack.c.bf16 %v3383_v51, %v3382_v27  ;;  %5738 = vlog2.f32 %v3681_v58 }
 0x582   : > { %v5192_v8 = vpack.c.bf16 %v3895_v43, %v3894_v28  ;;  %v3582_v3 = vmul.f32 1.442695, %v8300_v6 }
 0x583   : > { %v5735_v29 = vpop.eup %5734  ;;  %5272 = vst [vmem:[%s7581_s29 + $0x98] sm:$0xff] %v5032_v48  }
 0x584   : > { %5303 = vst [vmem:[%s7588_s23 + $0x98] sm:$0xff] %v5192_v8   ;;  %5740 = vpow2.f32 %v3582_v3  ;;  %3196 = vadd.xlane.f32.xlu1 %v5735_v29 }
 0x585   : > { %v5737_v17 = vpop.eup %5736  ;;  %5742 = vlog2.f32 %v3169_v47  ;;  %v3683_v53 = vpop.xlane.xlu1 %3682 }
 0x586   : > { %3708 = vadd.xlane.f32.xlu2 %v5737_v17  ;;  %v2881_v30 = vpop.xlane.xlu2 %2880  ;;  %5744 = vlog2.f32 %v3683_v53 }
 0x587   : > { %5746 = vpow2.f32 %v3070_v61  ;;  %v8307_v24 = vsub.f32 %v8124_v34, %v2881_v30  ;;  %v5739_v46 = vpop.eup %5738 }
 0x588   : > { %v3171_v40 = vpop.xlane.xlu0 %3170  ;;  %v3809_v50 = vmul.f32 0.6931472, %v5739_v46 }
 0x589   : > { %v3072_v5 = vmul.f32 1.442695, %v8307_v24  ;;  %v8311_v63 = vmul.f32 0.1, %v8307_v24  ;;  %5748 = vlog2.f32 %v3171_v40 }
 0x58a   : > { %v5741_v23 = vpop.eup %5740  ;;  %v3896_v28 = vsub.f32 %v8090_v37, %v3809_v50 }
 0x58b   : > { %v5743_v45 = vpop.eup %5742  ;;  %v3584_v21 = vmul.f32 1.442695, %v8311_v63  ;;  %3710 = vadd.xlane.f32.xlu0 %v5741_v23  ;;  %5750 = vpow2.f32 %v3072_v5 }
 0x58c   : > { %v5745_v26 = vpop.eup %5744  ;;  %v3297_v27 = vmul.f32 0.6931472, %v5743_v45 }
 0x58d   : > { %v5747_v25 = vpop.eup %5746  ;;  %5752 = vpow2.f32 %v3584_v21  ;;  %v3811_v34 = vmul.f32 0.6931472, %v5745_v26  ;;  %v3173_v47 = vpop.xlane.xlu1 %3172 }
 0x58e   : > { %3198 = vadd.xlane.f32.xlu2 %v5747_v25  ;;  %v3685_v51 = vpop.xlane.xlu2 %3684  ;;  %v3384_v61 = vsub.f32 %v8086_v41, %v3297_v27  ;;  %5754 = vlog2.f32 %v3173_v47 }
 0x58f   : > { %v5749_v9 = vpop.eup %5748  ;;  %v3897_v43 = vsub.f32 %v8106_v15, %v3811_v34  ;;  %5756 = vlog2.f32 %v3685_v51 }
 0x590   : > { %v3299_v58 = vmul.f32 0.6931472, %v5749_v9  ;;  %v2883_v48 = vpop.xlane.xlu0 %2882 }
 0x591   : > { %v5197_v8 = vpack.c.bf16 %v3897_v43, %v3896_v28  ;;  %v8317_v3 = vsub.f32 %v8140_v38, %v2883_v48  ;;  %v5751_v29 = vpop.eup %5750 }
 0x592   : > { %v3385_v17 = vsub.f32 %v8097_v13, %v3299_v58 }
 0x593   : > { %v5753_v53 = vpop.eup %5752  ;;  %5304 = vst [vmem:[%s7588_s23 + $0xa0] sm:$0xff] %v5197_v8   ;;  %v3074_v30 = vmul.f32 1.442695, %v8317_v3  ;;  %v8324_v37 = vmul.f32 0.1, %v8317_v3  ;;  %3200 = vadd.xlane.f32.xlu0 %v5751_v29  ;;  %v8802_v8 = vld [vmem:[#allocation42_spill] sm:$0xff] }
 0x594   : > { %v5037_v15 = vpack.c.bf16 %v3385_v17, %v3384_v61  ;;  %3712 = vadd.xlane.f32.xlu1 %v5753_v53  ;;  %v5755_v23 = vpop.eup %5754 }
 0x595   : > { %5758 = vpow2.f32 %v3074_v30  ;;  %v3586_v38 = vmul.f32 1.442695, %v8324_v37  ;;  %v2885_v46 = vpop.xlane.xlu1 %2884  ;;  %v5757_v45 = vpop.eup %5756  ;;  %v3301_v34 = vmul.f32 0.6931472, %v5755_v23 }
 0x596   : > { %5273 = vst [vmem:[%s7581_s29 + $0xa0] sm:$0xff] %v5037_v15   ;;  %v3175_v41 = vpop.xlane.xlu2 %3174  ;;  %v8329_v13 = vsub.f32 %v8152_v54, %v2885_v46  ;;  %v3813_v27 = vmul.f32 0.6931472, %v5757_v45  ;;  %v8803_v15 = vld [vmem:[#allocation43_spill] sm:$0xff] }
 0x597   : > { %5760 = vpow2.f32 %v3586_v38  ;;  %v3386_v29 = vsub.f32 %v8802_v8, %v3301_v34 }
 0x598   : > { %5762 = vlog2.f32 %v3175_v41  ;;  %v8332_v40 = vmul.f32 0.1, %v8329_v13  ;;  %v3687_v5 = vpop.xlane.xlu0 %3686  ;;  %v3076_v26 = vmul.f32 1.442695, %v8329_v13  ;;  %v3898_v38 = vsub.f32 %v8803_v15, %v3813_v27 }
 0x599   : > { %5764 = vlog2.f32 %v3687_v5 }
 0x59a   : > { %v3588_v50 = vmul.f32 1.442695, %v8332_v40 }
 0x59b   : > { %v5759_v21 = vpop.eup %5758 }
 0x59c   : > { %5766 = vpow2.f32 %v3588_v50  ;;  %3202 = vadd.xlane.f32.xlu1 %v5759_v21 }
 0x59d   : > { %v5761_v25 = vpop.eup %5760  ;;  %v3689_v54 = vpop.xlane.xlu1 %3688  ;;  %5768 = vpow2.f32 %v3076_v26 }
 0x59e   : > { %v5763_v47 = vpop.eup %5762  ;;  %3714 = vadd.xlane.f32.xlu2 %v5761_v25  ;;  %v2887_v51 = vpop.xlane.xlu2 %2886 }
 0x59f   : > { %v5765_v9 = vpop.eup %5764  ;;  %v3303_v28 = vmul.f32 0.6931472, %v5763_v47  ;;  %v8337_v43 = vsub.f32 %v8173_v57, %v2887_v51 }
 0x5a0   : > { %v3815_v58 = vmul.f32 0.6931472, %v5765_v9  ;;  %v3177_v48 = vpop.xlane.xlu0 %3176 }
 0x5a1   : > { %v3387_v61 = vsub.f32 %v8131_v31, %v3303_v28  ;;  %v3078_v17 = vmul.f32 1.442695, %v8337_v43  ;;  %v8343_v53 = vmul.f32 0.1, %v8337_v43  ;;  %5770 = vlog2.f32 %v3177_v48 }
 0x5a2   : > { %v5767_v30 = vpop.eup %5766  ;;  %v3899_v46 = vsub.f32 %v8138_v56, %v3815_v58  ;;  %5772 = vlog2.f32 %v3689_v54 }
 0x5a3   : > { %v5042_v57 = vpack.c.bf16 %v3387_v61, %v3386_v29  ;;  %v3590_v41 = vmul.f32 1.442695, %v8343_v53  ;;  %3716 = vadd.xlane.f32.xlu0 %v5767_v30  ;;  %5774 = vpow2.f32 %v3078_v17  ;;  %v5769_v31 = vpop.eup %5768 }
 0x5a4   : > { %v5202_v5 = vpack.c.bf16 %v3899_v46, %v3898_v38 }
 0x5a5   : > { %5274 = vst [vmem:[%s7581_s29 + $0xa8] sm:$0xff] %v5042_v57   ;;  %5776 = vpow2.f32 %v3590_v41  ;;  %v3179_v23 = vpop.xlane.xlu1 %3178 }
 0x5a6   : > { %5305 = vst [vmem:[%s7588_s23 + $0xa8] sm:$0xff] %v5202_v5   ;;  %3204 = vadd.xlane.f32.xlu2 %v5769_v31  ;;  %v3691_v45 = vpop.xlane.xlu2 %3690  ;;  %5778 = vlog2.f32 %v3179_v23 }
 0x5a7   : > { %5780 = vlog2.f32 %v3691_v45  ;;  %v5771_v50 = vpop.eup %5770 }
 0x5a8   : > { %v2889_v21 = vpop.xlane.xlu0 %2888  ;;  %v5773_v56 = vpop.eup %5772  ;;  %v3305_v54 = vmul.f32 0.6931472, %v5771_v50 }
 0x5a9   : > { %v8351_v26 = vsub.f32 %v8188_v55, %v2889_v21  ;;  %v5775_v25 = vpop.eup %5774  ;;  %v3817_v9 = vmul.f32 0.6931472, %v5773_v56 }
 0x5aa   : > { %v3388_v61 = vsub.f32 %v8144_v33, %v3305_v54 }
 0x5ab   : > { %v5777_v34 = vpop.eup %5776  ;;  %v3080_v47 = vmul.f32 1.442695, %v8351_v26  ;;  %v8355_v27 = vmul.f32 0.1, %v8351_v26  ;;  %3206 = vadd.xlane.f32.xlu0 %v5775_v25  ;;  %v3900_v15 = vsub.f32 %v8150_v0, %v3817_v9 }
 0x5ac   : > { %v5779_v51 = vpop.eup %5778  ;;  %3718 = vadd.xlane.f32.xlu1 %v5777_v34 }
 0x5ad   : > { %v5781_v28 = vpop.eup %5780  ;;  %v3307_v58 = vmul.f32 0.6931472, %v5779_v51  ;;  %5782 = vpow2.f32 %v3080_v47  ;;  %v3592_v48 = vmul.f32 1.442695, %v8355_v27  ;;  %v2891_v55 = vpop.xlane.xlu1 %2890 }
 0x5ae   : > { %v3819_v8 = vmul.f32 0.6931472, %v5781_v28  ;;  %v3181_v29 = vpop.xlane.xlu2 %3180  ;;  %v8361_v30 = vsub.f32 %v8203_v52, %v2891_v55 }
 0x5af   : > { %v3389_v17 = vsub.f32 %v8158_v44, %v3307_v58  ;;  %5784 = vpow2.f32 %v3592_v48 }
 0x5b0   : > { %v3901_v38 = vsub.f32 %v8169_v7, %v3819_v8  ;;  %v3693_v46 = vpop.xlane.xlu0 %3692  ;;  %v3082_v31 = vmul.f32 1.442695, %v8361_v30  ;;  %v8373_v21 = vmul.f32 0.1, %v8361_v30 }
 0x5b1   : > { %v5047_v57 = vpack.c.bf16 %v3389_v17, %v3388_v61  ;;  %5786 = vlog2.f32 %v3693_v46 }
 0x5b2   : > { %v5207_v41 = vpack.c.bf16 %v3901_v38, %v3900_v15  ;;  %5788 = vlog2.f32 %v3181_v29  ;;  %v3594_v9 = vmul.f32 1.442695, %v8373_v21 }
 0x5b3   : > { %v5783_v5 = vpop.eup %5782  ;;  %5275 = vst [vmem:[%s7581_s29 + $0xb0] sm:$0xff] %v5047_v57  }
 0x5b4   : > { %5306 = vst [vmem:[%s7588_s23 + $0xb0] sm:$0xff] %v5207_v41   ;;  %3208 = vadd.xlane.f32.xlu1 %v5783_v5 }
 0x5b5   : > { %v5785_v33 = vpop.eup %5784  ;;  %v3695_v44 = vpop.xlane.xlu1 %3694 }
 0x5b6   : > { %3720 = vadd.xlane.f32.xlu2 %v5785_v33  ;;  %v2893_v52 = vpop.xlane.xlu2 %2892  ;;  %5790 = vlog2.f32 %v3695_v44 }
 0x5b7   : > { %5792 = vpow2.f32 %v3082_v31  ;;  %v8369_v0 = vsub.f32 %v8218_v39, %v2893_v52  ;;  %v5787_v7 = vpop.eup %5786 }
 0x5b8   : > { %v3183_v23 = vpop.xlane.xlu0 %3182  ;;  %v5789_v50 = vpop.eup %5788  ;;  %v3821_v56 = vmul.f32 0.6931472, %v5787_v7 }
 0x5b9   : > { %v3084_v45 = vmul.f32 1.442695, %v8369_v0  ;;  %5794 = vlog2.f32 %v3183_v23  ;;  %v3309_v47 = vmul.f32 0.6931472, %v5789_v50  ;;  %v8389_v57 = vmul.f32 0.1, %v8369_v0 }
 0x5ba   : > { %v3902_v28 = vsub.f32 %v8186_v1, %v3821_v56 }
 0x5bb   : > { %5796 = vpow2.f32 %v3084_v45  ;;  %v3390_v15 = vsub.f32 %v8182_v42, %v3309_v47  ;;  %v3596_v41 = vmul.f32 1.442695, %v8389_v57 }
 0x5bc   : > { %v5791_v25 = vpop.eup %5790  ;;  %5798 = vpow2.f32 %v3594_v9 }
 0x5bd   : > { %v5793_v34 = vpop.eup %5792  ;;  %v3823_v54 = vmul.f32 0.6931472, %v5791_v25  ;;  %v3185_v17 = vpop.xlane.xlu1 %3184 }
 0x5be   : > { %3210 = vadd.xlane.f32.xlu2 %v5793_v34  ;;  %v3697_v51 = vpop.xlane.xlu2 %3696  ;;  %5800 = vlog2.f32 %v3185_v17 }
 0x5bf   : > { %v5795_v39 = vpop.eup %5794  ;;  %v3903_v58 = vsub.f32 %v8201_v49, %v3823_v54 }
 0x5c0   : > { %v3311_v48 = vmul.f32 0.6931472, %v5795_v39  ;;  %v2895_v55 = vpop.xlane.xlu0 %2894 }
 0x5c1   : > { %v5797_v8 = vpop.eup %5796  ;;  %v5212_v29 = vpack.c.bf16 %v3903_v58, %v3902_v28  ;;  %v8379_v61 = vsub.f32 %v8228_v62, %v2895_v55 }
 0x5c2   : > { %v3391_v38 = vsub.f32 %v8193_v20, %v3311_v48  ;;  %3212 = vadd.xlane.f32.xlu0 %v5797_v8  ;;  %v5799_v20 = vpop.eup %5798 }
 0x5c3   : > { %5307 = vst [vmem:[%s7588_s23 + $0xb8] sm:$0xff] %v5212_v29   ;;  %v3086_v1 = vmul.f32 1.442695, %v8379_v61  ;;  %v8386_v49 = vmul.f32 0.1, %v8379_v61 }
 0x5c4   : > { %v5052_v46 = vpack.c.bf16 %v3391_v38, %v3390_v15  ;;  %v5801_v31 = vpop.eup %5800 }
 0x5c5   : > { %5802 = vpow2.f32 %v3086_v1  ;;  %v3598_v62 = vmul.f32 1.442695, %v8386_v49  ;;  %v3313_v7 = vmul.f32 0.6931472, %v5801_v31 }
 0x5c6   : > { %5276 = vst [vmem:[%s7581_s29 + $0xb8] sm:$0xff] %v5052_v46   ;;  %5804 = vlog2.f32 %v3697_v51 }
 0x5c7   : > { %5806 = vpow2.f32 %v3598_v62  ;;  %v3187_v42 = vpop.xlane.xlu2 %3186  ;;  %v3392_v25 = vsub.f32 %v8212_v4, %v3313_v7 }
 0x5c8   : > { %5808 = vlog2.f32 %v3187_v42 }
 0x5c9   : > { %v3699_v5 = vpop.xlane.xlu0 %3698 }
 0x5ca   : > { %3722 = vadd.xlane.f32.xlu0 %v5799_v20  ;;  %5810 = vlog2.f32 %v3699_v5 }
 0x5cb   : > { %v5803_v33 = vpop.eup %5802  ;;  %5812 = vpow2.f32 %v3596_v41 }
 0x5cc   : > { %v5805_v44 = vpop.eup %5804  ;;  %3214 = vadd.xlane.f32.xlu1 %v5803_v33 }
 0x5cd   : > { %v5807_v52 = vpop.eup %5806  ;;  %v3825_v45 = vmul.f32 0.6931472, %v5805_v44 }
 0x5ce   : > { %v5809_v23 = vpop.eup %5808  ;;  %3726 = vadd.xlane.f32.xlu2 %v5807_v52 }
 0x5cf   : > { %v3315_v50 = vmul.f32 0.6931472, %v5809_v23  ;;  %v3904_v51 = vsub.f32 %v8216_v2, %v3825_v45 }
 0x5d0   : > { %v5811_v56 = vpop.eup %5810 }
 0x5d1   : > { %v3393_v34 = vsub.f32 %v8224_v36, %v3315_v50  ;;  %v3827_v54 = vmul.f32 0.6931472, %v5811_v56  ;;  %v5813_v47 = vpop.eup %5812  ;;  %v3189_v36 = vpop.xlane.xlu0 %3188 }
 0x5d2   : > { %5814 = vlog2.f32 %v3189_v36 }
 0x5d3   : > { %v5057_v39 = vpack.c.bf16 %v3393_v34, %v3392_v25  ;;  %v3905_v9 = vsub.f32 %v8232_v14, %v3827_v54  ;;  %v3701_v28 = vpop.xlane.xlu1 %3700 }
 0x5d4   : > { %3724 = vadd.xlane.f32.xlu1 %v5813_v47 }
 0x5d5   : > { %5277 = vst [vmem:[%s7581_s29 + $0xc0] sm:$0xff] %v5057_v39   ;;  %v5217_v4 = vpack.c.bf16 %v3905_v9, %v3904_v51 }
 0x5d7   : > { %5308 = vst [vmem:[%s7588_s23 + $0xc0] sm:$0xff] %v5217_v4  }
 0x5d8   : > { %5901 = shalt.err (!%p5898_p3)
}
 0x5d9   : > { %s5938_s16 = smov 128   ;;  %s5939_s0 = smov 8   ;;  %5816 = vlog2.f32 %v3701_v28  ;;  %v5815_v58 = vpop.eup %5814 }
 0x5da   : > { %5316 = dma.vmem_to_hbm [thread:$0]  (%p6028_p5), %s4333_s17, 8192, %s4335_s25, %s4310_s13, %s5938_s16, %s5938_s16, %s5939_s0   ;;  %v3317_v55 = vmul.f32 0.6931472, %v5815_v58 }
 0x5db   : > { %v3191_v2 = vpop.xlane.xlu1 %3190 }
 0x5dc   : > { %5818 = vlog2.f32 %v3191_v2  ;;  %v3394_v38 = vsub.f32 %v8241_v10, %v3317_v55 }
 0x5dd   : > { %v3703_v14 = vpop.xlane.xlu2 %3702 }
 0x5de   : > { %5820 = vlog2.f32 %v3703_v14 }
 0x5df   : > { %v5817_v48 = vpop.eup %5816 }
 0x5e0   : > { %v3829_v29 = vmul.f32 0.6931472, %v5817_v48 }
 0x5e2   : > { %v5819_v8 = vpop.eup %5818  ;;  %v3906_v42 = vsub.f32 %v8245_v59, %v3829_v29 }
 0x5e3   : > { %v3319_v17 = vmul.f32 0.6931472, %v5819_v8 }
 0x5e4   : > { %v5821_v15 = vpop.eup %5820 }
 0x5e5   : > { %v3395_v1 = vsub.f32 %v8249_v12, %v3319_v17  ;;  %v3831_v46 = vmul.f32 0.6931472, %v5821_v15  ;;  %v3705_v62 = vpop.xlane.xlu0 %3704  ;;  %v3193_v5 = vpop.xlane.xlu2 %3192 }
 0x5e6   : > { %5822 = vlog2.f32 %v3193_v5 }
 0x5e7   : > { %v5062_v20 = vpack.c.bf16 %v3395_v1, %v3394_v38  ;;  %v3907_v41 = vsub.f32 %v8257_v16, %v3831_v46  ;;  %5824 = vlog2.f32 %v3705_v62 }
 0x5e9   : > { %5278 = vst [vmem:[%s7581_s29 + $0xc8] sm:$0xff] %v5062_v20   ;;  %v5222_v31 = vpack.c.bf16 %v3907_v41, %v3906_v42 }
 0x5eb   : > { %5309 = vst [vmem:[%s7588_s23 + $0xc8] sm:$0xff] %v5222_v31  }
 0x5ec   : > { %v5823_v10 = vpop.eup %5822 }
 0x5ed   : > { %v3195_v33 = vpop.xlane.xlu0 %3194  ;;  %v5825_v52 = vpop.eup %5824  ;;  %v3321_v12 = vmul.f32 0.6931472, %v5823_v10 }
 0x5ee   : > { %5826 = vlog2.f32 %v3195_v33  ;;  %v3833_v59 = vmul.f32 0.6931472, %v5825_v52 }
 0x5ef   : > { %v3707_v44 = vpop.xlane.xlu1 %3706  ;;  %v3396_v50 = vsub.f32 %v8263_v19, %v3321_v12 }
 0x5f0   : > { %5828 = vlog2.f32 %v3707_v44  ;;  %v3908_v25 = vsub.f32 %v8267_v60, %v3833_v59 }
 0x5f4   : > { %v5827_v7 = vpop.eup %5826 }
 0x5f5   : > { %v3323_v45 = vmul.f32 0.6931472, %v5827_v7 }
 0x5f6   : > { %v5829_v23 = vpop.eup %5828 }
 0x5f7   : > { %v3835_v16 = vmul.f32 0.6931472, %v5829_v23  ;;  %v3397_v56 = vsub.f32 %v8271_v32, %v3323_v45  ;;  %v3197_v39 = vpop.xlane.xlu1 %3196 }
 0x5f9   : > { %v3909_v34 = vsub.f32 %v8277_v11, %v3835_v16  ;;  %v3709_v54 = vpop.xlane.xlu2 %3708  ;;  %v5067_v47 = vpack.c.bf16 %v3397_v56, %v3396_v50 }
 0x5fa   : > { %5830 = vlog2.f32 %v3709_v54 }
 0x5fb   : > { %v5227_v51 = vpack.c.bf16 %v3909_v34, %v3908_v25  ;;  %5279 = vst [vmem:[%s7581_s29 + $0xd0] sm:$0xff] %v5067_v47   ;;  %5832 = vlog2.f32 %v3197_v39 }
 0x5fd   : > { %5310 = vst [vmem:[%s7588_s23 + $0xd0] sm:$0xff] %v5227_v51  }
 0x5fe   : > { %v3711_v9 = vpop.xlane.xlu0 %3710 }
 0x5ff   : > { %5834 = vlog2.f32 %v3711_v9 }
 0x600   : > { %v5831_v28 = vpop.eup %5830 }
 0x601   : > { %v3199_v4 = vpop.xlane.xlu2 %3198  ;;  %v5833_v19 = vpop.eup %5832  ;;  %v3837_v32 = vmul.f32 0.6931472, %v5831_v28 }
 0x602   : > { %5836 = vlog2.f32 %v3199_v4  ;;  %v3325_v11 = vmul.f32 0.6931472, %v5833_v19 }
 0x603   : > { %v3910_v58 = vsub.f32 %v8289_v35, %v3837_v32 }
 0x604   : > { %v3398_v17 = vsub.f32 %v8285_v22, %v3325_v11 }
 0x605   : > { %v5835_v36 = vpop.eup %5834 }
 0x606   : > { %v3839_v60 = vmul.f32 0.6931472, %v5835_v36  ;;  %v3201_v8 = vpop.xlane.xlu0 %3200 }
 0x607   : > { %v3713_v2 = vpop.xlane.xlu1 %3712  ;;  %5838 = vlog2.f32 %v3201_v8 }
 0x608   : > { %v5837_v14 = vpop.eup %5836  ;;  %v3911_v48 = vsub.f32 %v8300_v6, %v3839_v60  ;;  %5840 = vlog2.f32 %v3713_v2 }
 0x609   : > { %v3327_v55 = vmul.f32 0.6931472, %v5837_v14 }
 0x60a   : > { %v5232_v29 = vpack.c.bf16 %v3911_v48, %v3910_v58 }
 0x60b   : > { %v3399_v15 = vsub.f32 %v8293_v18, %v3327_v55 }
 0x60c   : > { %5311 = vst [vmem:[%s7588_s23 + $0xd8] sm:$0xff] %v5232_v29  }
 0x60d   : > { %v5072_v38 = vpack.c.bf16 %v3399_v15, %v3398_v17  ;;  %v5839_v62 = vpop.eup %5838 }
 0x60e   : > { %v5841_v35 = vpop.eup %5840  ;;  %v3329_v42 = vmul.f32 0.6931472, %v5839_v62 }
 0x60f   : > { %5280 = vst [vmem:[%s7581_s29 + $0xd8] sm:$0xff] %v5072_v38   ;;  %v3203_v1 = vpop.xlane.xlu1 %3202  ;;  %v3841_v41 = vmul.f32 0.6931472, %v5841_v35 }
 0x610   : > { %5842 = vlog2.f32 %v3203_v1  ;;  %v3400_v18 = vsub.f32 %v8307_v24, %v3329_v42 }
 0x611   : > { %v3715_v46 = vpop.xlane.xlu2 %3714  ;;  %v3912_v10 = vsub.f32 %v8311_v63, %v3841_v41 }
 0x612   : > { %5844 = vlog2.f32 %v3715_v46 }
 0x616   : > { %v5843_v6 = vpop.eup %5842  ;;  %v3717_v20 = vpop.xlane.xlu0 %3716 }
 0x617   : > { %v3331_v22 = vmul.f32 0.6931472, %v5843_v6 }
 0x618   : > { %v5845_v5 = vpop.eup %5844 }
 0x619   : > { %v3843_v31 = vmul.f32 0.6931472, %v5845_v5  ;;  %v3401_v33 = vsub.f32 %v8317_v3, %v3331_v22  ;;  %v3205_v44 = vpop.xlane.xlu2 %3204 }
 0x61a   : > { %5846 = vlog2.f32 %v3205_v44 }
 0x61b   : > { %v3913_v52 = vsub.f32 %v8324_v37, %v3843_v31  ;;  %v5077_v12 = vpack.c.bf16 %v3401_v33, %v3400_v18  ;;  %5848 = vlog2.f32 %v3717_v20 }
 0x61d   : > { %v5237_v7 = vpack.c.bf16 %v3913_v52, %v3912_v10  ;;  %5281 = vst [vmem:[%s7581_s29 + $0xe0] sm:$0xff] %v5077_v12  }
 0x61e   : > { %v3207_v59 = vpop.xlane.xlu0 %3206 }
 0x61f   : > { %5312 = vst [vmem:[%s7588_s23 + $0xe0] sm:$0xff] %v5237_v7   ;;  %v3719_v23 = vpop.xlane.xlu1 %3718  ;;  %5850 = vlog2.f32 %v3207_v59 }
 0x620   : > { %5852 = vlog2.f32 %v3719_v23  ;;  %v5847_v45 = vpop.eup %5846 }
 0x621   : > { %v5849_v24 = vpop.eup %5848  ;;  %v3333_v3 = vmul.f32 0.6931472, %v5847_v45 }
 0x622   : > { %v3845_v50 = vmul.f32 0.6931472, %v5849_v24 }
 0x623   : > { %v3402_v25 = vsub.f32 %v8329_v13, %v3333_v3 }
 0x624   : > { %v3914_v54 = vsub.f32 %v8332_v40, %v3845_v50 }
 0x625   : > { %v5851_v16 = vpop.eup %5850 }
 0x626   : > { %v5853_v63 = vpop.eup %5852  ;;  %v3335_v56 = vmul.f32 0.6931472, %v5851_v16 }
 0x627   : > { %v3847_v37 = vmul.f32 0.6931472, %v5853_v63  ;;  %v3209_v28 = vpop.xlane.xlu1 %3208 }
 0x628   : > { %v3403_v34 = vsub.f32 %v8337_v43, %v3335_v56  ;;  %5854 = vlog2.f32 %v3209_v28 }
 0x629   : > { %v3915_v47 = vsub.f32 %v8343_v53, %v3847_v37  ;;  %v3721_v51 = vpop.xlane.xlu2 %3720 }
 0x62a   : > { %v5082_v39 = vpack.c.bf16 %v3403_v34, %v3402_v25 }
 0x62b   : > { %v5242_v9 = vpack.c.bf16 %v3915_v47, %v3914_v54 }
 0x62c   : > { %5282 = vst [vmem:[%s7581_s29 + $0xe8] sm:$0xff] %v5082_v39  }
 0x62d   : > { %5313 = vst [vmem:[%s7588_s23 + $0xe8] sm:$0xff] %v5242_v9  }
 0x62e   : > { %v5855_v19 = vpop.eup %5854 }
 0x62f   : > { %v3337_v36 = vmul.f32 0.6931472, %v5855_v19 }
 0x631   : > { %v3211_v4 = vpop.xlane.xlu2 %3210  ;;  %v3404_v40 = vsub.f32 %v8351_v26, %v3337_v36 }
 0x632   : > { %5856 = vlog2.f32 %v3211_v4 }
 0x633   : > { %5858 = vlog2.f32 %v3721_v51 }
 0x635   : > { %v3213_v32 = vpop.xlane.xlu0 %3212 }
 0x636   : > { %5860 = vlog2.f32 %v3213_v32 }
 0x638   : > { %v5857_v13 = vpop.eup %5856 }
 0x639   : > { %v3339_v60 = vmul.f32 0.6931472, %v5857_v13  ;;  %v5859_v14 = vpop.eup %5858 }
 0x63a   : > { %v3849_v55 = vmul.f32 0.6931472, %v5859_v14 }
 0x63b   : > { %v3405_v43 = vsub.f32 %v8361_v30, %v3339_v60 }
 0x63c   : > { %v5861_v48 = vpop.eup %5860  ;;  %v3916_v30 = vsub.f32 %v8355_v27, %v3849_v55 }
 0x63d   : > { %v5087_v53 = vpack.c.bf16 %v3405_v43, %v3404_v40  ;;  %v3723_v11 = vpop.xlane.xlu0 %3722  ;;  %v3341_v29 = vmul.f32 0.6931472, %v5861_v48 }
 0x63e   : > { %5862 = vlog2.f32 %v3723_v11 }
 0x63f   : > { %5283 = vst [vmem:[%s7581_s29 + $0xf0] sm:$0xff] %v5087_v53   ;;  %v3215_v2 = vpop.xlane.xlu1 %3214  ;;  %v3406_v46 = vsub.f32 %v8369_v0, %v3341_v29 }
 0x640   : > { %5864 = vlog2.f32 %v3215_v2 }
 0x641   : > { %v3727_v58 = vpop.xlane.xlu2 %3726 }
 0x642   : > { %5866 = vlog2.f32 %v3727_v58 }
 0x644   : > { %v5863_v8 = vpop.eup %5862 }
 0x645   : > { %v3851_v17 = vmul.f32 0.6931472, %v5863_v8 }
 0x646   : > { %v5865_v26 = vpop.eup %5864 }
 0x647   : > { %v3343_v15 = vmul.f32 0.6931472, %v5865_v26  ;;  %v3917_v38 = vsub.f32 %v8373_v21, %v3851_v17  ;;  %v3725_v1 = vpop.xlane.xlu1 %3724 }
 0x648   : > { %5868 = vlog2.f32 %v3725_v1  ;;  %v5867_v42 = vpop.eup %5866 }
 0x649   : > { %v3407_v62 = vsub.f32 %v8379_v61, %v3343_v15  ;;  %v5247_v35 = vpack.c.bf16 %v3917_v38, %v3916_v30  ;;  %v3855_v20 = vmul.f32 0.6931472, %v5867_v42 }
 0x64b   : > { %v5092_v6 = vpack.c.bf16 %v3407_v62, %v3406_v46  ;;  %5314 = vst [vmem:[%s7588_s23 + $0xf0] sm:$0xff] %v5247_v35   ;;  %v3919_v27 = vsub.f32 %v8386_v49, %v3855_v20 }
 0x64d   : > { %5284 = vst [vmem:[%s7581_s29 + $0xf8] sm:$0xff] %v5092_v6  }
 0x64e   : > { %v5869_v41 = vpop.eup %5868 }
 0x64f   : > { %v3853_v22 = vmul.f32 0.6931472, %v5869_v41 }
 0x651   : > { %v3918_v5 = vsub.f32 %v8389_v57, %v3853_v22 }
 0x653   : > { %v5252_v21 = vpack.c.bf16 %v3919_v27, %v3918_v5 }
 0x655   : > { %5315 = vst [vmem:[%s7588_s23 + $0xf8] sm:$0xff] %v5252_v21  }
 0x656 PF: > { %p5322_p4 = scmp.ge.s32.totalorder %s5936_s12, 2  ;;  %s4361_s0 = sand.u32 1, %s5924_s30  }
 0x657   : > { %s4362_s19 = scalar_lea.sflag [#allocation3], %s4361_s0 }
 0x658   : > { %p5319_p5 = pnand %p5322_p4, %p6032_p6 }
 0x65a   : > { %p5320_p7 = pneg %p5319_p5 }
 0x65c   : > { %5919 = dma.done.wait (%p5320_p7), %s4362_s19, 8192  }
 0x65d   : > { %5921 = vsyncadd (%p5320_p7), %s4362_s19, 4294959104  ;;  %p20_p8 = scmp.ge.s32.totalorder %s6015_s15, 4   ;;  %s8804_s30 = smov %s5928_s10 }
 0x65e   : > { %s8805_s10 = smov %s5932_s11  ;;  %s8806_s11 = smov %s6026_s18 }
 0x65f   : > { %s8807_s12 = smov %s6015_s15  ;;  %22 = sbr.rel (!%p20_p8) target bundleno = 5 (0x5), region = 107 }
 0x664   :  { %4376 = vsyncpa [#allocation3], 1 }
 0x665   :  { %4378 = vsyncpa [#allocation3 + $0x1], 1 }

</bundles_post_ra>
